<compile_context>
chip_gen: v5e
topology: v5e:2x2
jax: 0.10.0
libtpu: 0.0.40
codegen_flags: <defaults>
</compile_context>

<pallas_src>
import functools

import jax
import jax.numpy as jnp
import numpy as np
from jax.experimental import pallas as pl
from jax.experimental.pallas import tpu as pltpu


# ----------------------------------------------------------------------------
# Helpers
# ----------------------------------------------------------------------------
def _w_window(row, s, w_in, w_out, hidden):
    """Dense W-window at (possibly negative) W-offset `s`, zero-filled OOB.

    row: (R, w_in*hidden) lane-packed  ->  (R, w_out*hidden).
    Lowered as static lane shifts (XLU slot), so no W padding ring is needed.
    """
    rows = row.shape[0]
    lo, hi = max(s, 0), min(w_in, s + w_out)
    if hi <= lo:
        return jnp.zeros((rows, w_out * hidden), row.dtype)
    pieces = []
    if lo - s > 0:
        pieces.append(jnp.zeros((rows, (lo - s) * hidden), row.dtype))
    pieces.append(row[:, lo * hidden:hi * hidden])
    if (s + w_out) - hi > 0:
        pieces.append(jnp.zeros((rows, (s + w_out - hi) * hidden), row.dtype))
    return pieces[0] if len(pieces) == 1 else jnp.concatenate(pieces, axis=-1)


def _tile_rounded_bytes(shape, dtype):
    """(8,128)-tile-rounded byte size of an array as it sits in VMEM."""
    itemsize = np.dtype(dtype).itemsize
    if len(shape) == 0:
        return 4
    if len(shape) == 1:
        return (-(-int(shape[0]) // 128) * 128) * itemsize
    lead = 1
    for s in shape[:-2]:
        lead *= int(s)
    sub = -(-int(shape[-2]) // 8) * 8
    lane = -(-int(shape[-1]) // 128) * 128
    return lead * sub * lane * itemsize


# ----------------------------------------------------------------------------
# Fused Pallas kernel: one batch element per grid step.
# ----------------------------------------------------------------------------
def _fused_kernel(x_ref, w1_ref, b1_ref, wd_ref, b2_ref, w3_ref, b3_ref,
                  o_ref, x_scr, g_scr, *, in_dims, out_dims, pad, stride,
                  ksize, expand, use_res):
    D, H, W = in_dims
    DO, HO, WO = out_dims
    pd, ph, pw = pad
    sd, sh, sw = stride
    KD, KH, KW = ksize
    hidden = w3_ref.shape[1]
    L = W * hidden                      # packed lane width of one (d, h) row
    Wd = (WO - 1) * sw + 1              # dense W positions (== WO when sw == 1)
    Dp, Hp = D + 2 * pd, H + 2 * ph

    x_cf = x_ref[0]                                            # (Cin, P) bf16

    # ---- expand 1x1x1 (+folded BN) + ReLU6: LHS-transposed bf16 MXU matmul ---
    if expand:
        h2d = jax.lax.dot_general(x_cf, w1_ref[...],
                                  (((0,), (0,)), ((), ())),
                                  preferred_element_type=jnp.float32)
        h2d = jnp.clip(h2d + b1_ref[...], 0.0, 6.0)            # (P, hidden) f32
    else:
        h2d = x_cf.astype(jnp.float32).T                       # (P, hidden)

    # ---- W*C lane packing: (P, hidden) -> (D, H, W*hidden) -------------------
    h3 = h2d.reshape(D * H, W, hidden)
    packed = jnp.concatenate([h3[:, w, :] for w in range(W)], axis=-1)
    packed = packed.reshape(D, H, L)

    # ---- refresh only the D/H zero pad ring, then lane-aligned interior store
    if pd > 0:
        x_scr[0:pd] = jnp.zeros((pd, Hp, L), jnp.float32)
        x_scr[pd + D:Dp] = jnp.zeros((pd, Hp, L), jnp.float32)
    if ph > 0:
        x_scr[pd:pd + D, 0:ph, :] = jnp.zeros((D, ph, L), jnp.float32)
        x_scr[pd:pd + D, ph + H:Hp, :] = jnp.zeros((D, ph, L), jnp.float32)
    x_scr[pd:pd + D, ph:ph + H, :] = packed

    # ---- depthwise k^3 conv (+folded BN) + ReLU6, one DO-slab per iteration --
    b2p = b2_ref[...]                                          # (1, WO*hidden)

    def dw_slab(do, carry):
        acc = jnp.zeros((HO, Wd * hidden), jnp.float32)
        t = 0
        for kd in range(KD):
            di = do * sd + kd
            for kh in range(KH):
                if sh == 1:
                    row = x_scr[di, kh:kh + HO, :]             # (HO, W*hidden)
                else:
                    row = x_scr[di, pl.ds(kh, HO, sh), :]
                for kw in range(KW):
                    win = _w_window(row, kw - pw, W, Wd, hidden)
                    acc = acc + win * wd_ref[t:t + 1, :]       # lane-dense VPU
                    t += 1
        if sw > 1:  # subsample the dense-W result once per slab
            acc = jnp.concatenate(
                [acc[:, (wo * sw) * hidden:(wo * sw + 1) * hidden]
                 for wo in range(WO)], axis=-1)
        g_scr[do] = jnp.clip(acc + b2p, 0.0, 6.0).astype(g_scr.dtype)
        return carry

    jax.lax.fori_loop(0, DO, dw_slab, 0)

    # ---- un-pack (DO,HO,WO*hidden) -> (PO, hidden), project (bf16, trans_b) --
    gall = g_scr[...].reshape(DO * HO, WO * hidden)
    g2d = jnp.stack(
        [gall[:, wo * hidden:(wo + 1) * hidden] for wo in range(WO)],
        axis=1).reshape(DO * HO * WO, hidden)                  # (PO, hidden) bf16
    out_cf = jax.lax.dot_general(w3_ref[...], g2d,
                                 (((1,), (1,)), ((), ())),
                                 preferred_element_type=jnp.float32)  # (oup, PO)
    out_cf = out_cf + b3_ref[...]
    if use_res:
        out_cf = out_cf + x_cf.astype(jnp.float32)             # fused residual
    o_ref[0] = out_cf.astype(o_ref.dtype)                      # lane-dense store


# ----------------------------------------------------------------------------
# pallas_call wrapper
# ----------------------------------------------------------------------------
def inverted_residual_fused(x_cf, w1, b1, wd, b2, w3, b3, *, in_dims, out_dims,
                            pad, stride, ksize, expand, use_res):
    N, Cin, P = x_cf.shape
    D, H, W = in_dims
    DO, HO, WO = out_dims
    pd, ph, pw = pad
    hidden = w3.shape[1]
    oup = w3.shape[0]
    PO = DO * HO * WO
    Dp, Hp = D + 2 * pd, H + 2 * ph
    L = W * hidden

    kernel = functools.partial(
        _fused_kernel, in_dims=in_dims, out_dims=out_dims, pad=pad,
        stride=stride, ksize=ksize, expand=expand, use_res=use_res)

    # (8,128)-tile-rounded VMEM estimate, clamped below the physical capacity.
    est = (2 * (_tile_rounded_bytes((Cin, P), x_cf.dtype)
                + _tile_rounded_bytes((oup, PO), jnp.float32))
           + 2 * sum(_tile_rounded_bytes(a.shape, a.dtype)
                     for a in (w1, b1, wd, b2, w3, b3))
           + _tile_rounded_bytes((Dp, Hp, L), jnp.float32)
           + _tile_rounded_bytes((DO, HO, WO * hidden), jnp.bfloat16)
           + 2 * _tile_rounded_bytes((P, hidden), jnp.float32))   # relayout slack
    try:
        cap = int(pltpu.get_tpu_info().vmem_capacity_bytes)
    except Exception:
        cap = 64 * 2 ** 20   # most restrictive generation if the query fails
    vmem_limit = int(min(cap - 8 * 2 ** 20, max(32 * 2 ** 20, 2 * est)))

    return pl.pallas_call(
        kernel,
        out_shape=jax.ShapeDtypeStruct((N, oup, PO), jnp.float32),
        grid_spec=pltpu.PrefetchScalarGridSpec(
            num_scalar_prefetch=0,
            grid=(N,),
            in_specs=[
                pl.BlockSpec((1, Cin, P), lambda n: (n, 0, 0)),
                pl.BlockSpec(w1.shape, lambda n: (0, 0)),
                pl.BlockSpec(b1.shape, lambda n: (0, 0)),
                pl.BlockSpec(wd.shape, lambda n: (0, 0)),
                pl.BlockSpec(b2.shape, lambda n: (0, 0)),
                pl.BlockSpec(w3.shape, lambda n: (0, 0)),
                pl.BlockSpec(b3.shape, lambda n: (0, 0)),
            ],
            out_specs=pl.BlockSpec((1, oup, PO), lambda n: (n, 0, 0)),
            scratch_shapes=[
                pltpu.VMEM((Dp, Hp, L), jnp.float32),        # padded packed act.
                pltpu.VMEM((DO, HO, WO * hidden), jnp.bfloat16),  # dw output
            ],
        ),
        compiler_params=pltpu.CompilerParams(
            dimension_semantics=("parallel",),
            vmem_limit_bytes=vmem_limit),
    )(x_cf, w1, b1, wd, b2, w3, b3)


# ----------------------------------------------------------------------------
# Module wrapper (parameter init + BN folding + forward glue)
# ----------------------------------------------------------------------------
class InvertedResidualPallas:
    def __init__(self, inp, oup, stride, expand_ratio,
                 depthwise_kernel_size=3, padding=(0, 0, 0), *, key):
        self.inp, self.oup = inp, oup
        self.stride = tuple(stride)
        self.padding = tuple(padding)
        self.k = depthwise_kernel_size
        self.hidden = int(round(inp * expand_ratio))
        self.expand = expand_ratio != 1
        self.use_res_connect = self.stride == (1, 1, 1) and inp == oup
        eps = 1e-5

        keys = iter(jax.random.split(key, 32))

        def bn_init(c):
            gamma = jax.random.uniform(next(keys), (c,), jnp.float32, 0.5, 1.5)
            beta = 0.1 * jax.random.normal(next(keys), (c,), jnp.float32)
            mean = 0.1 * jax.random.normal(next(keys), (c,), jnp.float32)
            var = jax.random.uniform(next(keys), (c,), jnp.float32, 0.5, 1.5)
            return (gamma, beta, mean, var)

        def fold(p):
            g, b, m, v = p
            s = g / jnp.sqrt(v + eps)
            return s, b - m * s

        hidden, k = self.hidden, self.k

        # Parameters stored in PyTorch conv-weight layout for the reference.
        self.params = {}
        if self.expand:
            self.params['w1'] = (jax.random.normal(
                next(keys), (hidden, inp, 1, 1, 1), jnp.float32)
                / jnp.sqrt(inp))
            self.params['bn1'] = bn_init(hidden)
        self.params['wd'] = (jax.random.normal(
            next(keys), (hidden, 1, k, k, k), jnp.float32) / jnp.sqrt(k ** 3))
        self.params['bn2'] = bn_init(hidden)
        self.params['w3'] = (jax.random.normal(
            next(keys), (oup, hidden, 1, 1, 1), jnp.float32)
            / jnp.sqrt(hidden))
        self.params['bn3'] = bn_init(oup)

        # Kernel-layout weights with BN scales folded in (MXU weights in bf16).
        if self.expand:
            s1, b1 = fold(self.params['bn1'])
            self.w1_k = ((self.params['w1'][:, :, 0, 0, 0] * s1[:, None]).T
                         .astype(jnp.bfloat16))                  # (inp, hidden)
            self.b1_k = b1.reshape(1, hidden).astype(jnp.float32)
        else:
            self.w1_k = jnp.zeros((inp, hidden), jnp.bfloat16)   # unused
            self.b1_k = jnp.zeros((1, hidden), jnp.float32)
        s2, b2 = fold(self.params['bn2'])
        wd_t = jnp.transpose(self.params['wd'][:, 0], (1, 2, 3, 0))  # (k,k,k,hid)
        self.wd_k = (wd_t.reshape(k ** 3, hidden) * s2[None, :]).astype(jnp.float32)
        self.b2_k = b2.reshape(1, hidden).astype(jnp.float32)
        s3, b3 = fold(self.params['bn3'])
        self.w3_k = ((self.params['w3'][:, :, 0, 0, 0] * s3[:, None])
                     .astype(jnp.bfloat16))                       # (oup, hidden)
        self.b3_k = b3.reshape(oup, 1).astype(jnp.float32)

    def __call__(self, x):
        # x: NCDHW (PyTorch convention) -- consumed directly, no transpose.
        N, Cin, D, H, W = x.shape
        assert Cin == self.inp
        pd, ph, pw = self.padding
        sd, sh, sw = self.stride
        k = self.k
        DO = (D + 2 * pd - k) // sd + 1
        HO = (H + 2 * ph - k) // sh + 1
        WO = (W + 2 * pw - k) // sw + 1
        if self.use_res_connect:
            assert (DO, HO, WO) == (D, H, W), \
                "residual connection requires spatial dims to be preserved"
        Wd = (WO - 1) * sw + 1

        # Hoisted per-tap weight/bias tiling for the W*C lane-packed depthwise.
        wd_p = jnp.tile(self.wd_k, (1, Wd))          # (k^3, Wd*hidden)
        b2_p = jnp.tile(self.b2_k, (1, WO))          # (1, WO*hidden)

        # Free NCDHW view; bf16 operands for the MXU matmuls / halved DMA.
        x_cf = x.reshape(N, Cin, D * H * W).astype(jnp.bfloat16)

        out = inverted_residual_fused(
            x_cf, self.w1_k, self.b1_k, wd_p, b2_p, self.w3_k, self.b3_k,
            in_dims=(D, H, W), out_dims=(DO, HO, WO),
            pad=(pd, ph, pw), stride=(sd, sh, sw), ksize=(k, k, k),
            expand=self.expand, use_res=self.use_res_connect)
        return out.reshape(N, self.oup, DO, HO, WO)    # already NCDHW


# ----------------------------------------------------------------------------
# Pure-JAX reference (NCDHW, eval-mode BN) for verification
# ----------------------------------------------------------------------------
def reference_forward(x, params, stride, padding, use_res, expand, eps=1e-5):
    def bn(y, p):
        g, b, m, v = p
        s = (1, -1, 1, 1, 1)
        return (g.reshape(s) * (y - m.reshape(s))
                / jnp.sqrt(v.reshape(s) + eps) + b.reshape(s))

    dn = ('NCDHW', 'OIDHW', 'NCDHW')
    h = x
    if expand:
        h = jax.lax.conv_general_dilated(h, params['w1'], (1, 1, 1), 'VALID',
                                         dimension_numbers=dn)
        h = jnp.clip(bn(h, params['bn1']), 0.0, 6.0)
    hidden = params['wd'].shape[0]
    h = jax.lax.conv_general_dilated(h, params['wd'], stride,
                                     [(p, p) for p in padding],
                                     dimension_numbers=dn,
                                     feature_group_count=hidden)
    h = jnp.clip(bn(h, params['bn2']), 0.0, 6.0)
    h = jax.lax.conv_general_dilated(h, params['w3'], (1, 1, 1), 'VALID',
                                     dimension_numbers=dn)
    h = bn(h, params['bn3'])
    if use_res:
        h = x + h
    return h


if __name__ == "__main__":
    key = jax.random.PRNGKey(0)
    kx, kp = jax.random.split(key)

    # Small config: inp == oup, stride (1,1,1) -> residual connection is used.
    # hidden = 16, W = 8 -> the packed depthwise lane width is exactly 128.
    N, inp, D, H, W = 2, 4, 4, 8, 8
    oup, expand_ratio = 4, 4
    stride, padding, ksize = (1, 1, 1), (1, 1, 1), 3

    x = jax.random.normal(kx, (N, inp, D, H, W), jnp.float32)

    mod = InvertedResidualPallas(inp, oup, stride, expand_ratio, ksize,
                                 padding, key=kp)
    out = jax.block_until_ready(mod(x))

    ref = reference_forward(x, mod.params, stride, padding,
                            mod.use_res_connect, mod.expand)
    assert out.shape == ref.shape == (N, oup, D, H, W)
    max_err = float(jnp.max(jnp.abs(out - ref)))
    # bf16 MXU operands -> slightly relaxed tolerance vs the pure-f32 reference.
    if not jnp.allclose(out, ref, atol=1e-1, rtol=1e-1):
        raise AssertionError(f"Pallas vs reference mismatch, max err {max_err}")

    print("KERNEL_OK")
</pallas_src>

<mosaic_0001>
module attributes {stable_mosaic.version = 11 : i64} {
  func.func @_fused_kernel(%arg0: i32, %arg1: memref<1x4x256xbf16, #tpu.memory_space<vmem>>, %arg2: memref<4x16xbf16, #tpu.memory_space<vmem>>, %arg3: memref<1x16xf32, #tpu.memory_space<vmem>>, %arg4: memref<27x128xf32, #tpu.memory_space<vmem>>, %arg5: memref<1x128xf32, #tpu.memory_space<vmem>>, %arg6: memref<4x16xbf16, #tpu.memory_space<vmem>>, %arg7: memref<4x1xf32, #tpu.memory_space<vmem>>, %arg8: memref<1x4x256xf32, #tpu.memory_space<vmem>>, %arg9: memref<6x10x128xf32, #tpu.memory_space<vmem>>, %arg10: memref<4x8x128xbf16, #tpu.memory_space<vmem>>) attributes {dimension_semantics = [#tpu.dimension_semantics<parallel>], iteration_bounds = array<i64: 2>, scalar_prefetch = 0 : i64, scratch_operands = 2 : i64, tpu.core_type = #tpu.core_type<tc>, window_params = [{transform_indices = @transform_0, window_bounds = array<i64: 1, 4, 256>}, {pipeline_mode = #tpu.pipeline_mode<synchronous>, transform_indices = @transform_1, window_bounds = array<i64: 4, 16>}, {pipeline_mode = #tpu.pipeline_mode<synchronous>, transform_indices = @transform_2, window_bounds = array<i64: 1, 16>}, {pipeline_mode = #tpu.pipeline_mode<synchronous>, transform_indices = @transform_3, window_bounds = array<i64: 27, 128>}, {pipeline_mode = #tpu.pipeline_mode<synchronous>, transform_indices = @transform_4, window_bounds = array<i64: 1, 128>}, {pipeline_mode = #tpu.pipeline_mode<synchronous>, transform_indices = @transform_5, window_bounds = array<i64: 4, 16>}, {pipeline_mode = #tpu.pipeline_mode<synchronous>, transform_indices = @transform_6, window_bounds = array<i64: 4, 1>}, {transform_indices = @transform_7, window_bounds = array<i64: 1, 4, 256>}]} {
    %c0 = arith.constant 0 : index
    %c0_0 = arith.constant 0 : index
    %c0_1 = arith.constant 0 : index
    %0 = vector.load %arg1[%c0, %c0_0, %c0_1] : memref<1x4x256xbf16, #tpu.memory_space<vmem>>, vector<1x4x256xbf16>
    %1 = vector.shape_cast %0 : vector<1x4x256xbf16> to vector<4x256xbf16>
    %c0_2 = arith.constant 0 : index
    %c0_3 = arith.constant 0 : index
    %2 = vector.load %arg2[%c0_2, %c0_3] : memref<4x16xbf16, #tpu.memory_space<vmem>>, vector<4x16xbf16>
    %cst = arith.constant dense<0.000000e+00> : vector<256x16xf32>
    %3 = tpu.matmul %1, %2, %cst {dimension_numbers = #tpu.dot_dimension_numbers<[0], [0], [1], [1], [0, 1, 1, 1], [], []>} : vector<4x256xbf16>, vector<4x16xbf16>, vector<256x16xf32> -> vector<256x16xf32>
    %c0_4 = arith.constant 0 : index
    %c0_5 = arith.constant 0 : index
    %4 = vector.load %arg3[%c0_4, %c0_5] : memref<1x16xf32, #tpu.memory_space<vmem>>, vector<1x16xf32>
    %5 = vector.broadcast %4 : vector<1x16xf32> to vector<256x16xf32>
    %6 = arith.addf %3, %5 : vector<256x16xf32>
    %cst_6 = arith.constant 0.000000e+00 : f32
    %cst_7 = arith.constant 6.000000e+00 : f32
    %7 = vector.broadcast %cst_6 : f32 to vector<256x16xf32>
    %8 = arith.maximumf %7, %6 : vector<256x16xf32>
    %9 = vector.broadcast %cst_7 : f32 to vector<256x16xf32>
    %10 = arith.minimumf %9, %8 : vector<256x16xf32>
    %11 = vector.shape_cast %10 : vector<256x16xf32> to vector<32x8x16xf32>
    %12 = vector.extract_strided_slice %11 {offsets = [0, 0, 0], sizes = [32, 1, 16], strides = [1, 1, 1]} : vector<32x8x16xf32> to vector<32x1x16xf32>
    %13 = vector.shape_cast %12 : vector<32x1x16xf32> to vector<32x16xf32>
    %14 = vector.extract_strided_slice %11 {offsets = [0, 1, 0], sizes = [32, 1, 16], strides = [1, 1, 1]} : vector<32x8x16xf32> to vector<32x1x16xf32>
    %15 = vector.shape_cast %14 : vector<32x1x16xf32> to vector<32x16xf32>
    %16 = vector.extract_strided_slice %11 {offsets = [0, 2, 0], sizes = [32, 1, 16], strides = [1, 1, 1]} : vector<32x8x16xf32> to vector<32x1x16xf32>
    %17 = vector.shape_cast %16 : vector<32x1x16xf32> to vector<32x16xf32>
    %18 = vector.extract_strided_slice %11 {offsets = [0, 3, 0], sizes = [32, 1, 16], strides = [1, 1, 1]} : vector<32x8x16xf32> to vector<32x1x16xf32>
    %19 = vector.shape_cast %18 : vector<32x1x16xf32> to vector<32x16xf32>
    %20 = vector.extract_strided_slice %11 {offsets = [0, 4, 0], sizes = [32, 1, 16], strides = [1, 1, 1]} : vector<32x8x16xf32> to vector<32x1x16xf32>
    %21 = vector.shape_cast %20 : vector<32x1x16xf32> to vector<32x16xf32>
    %22 = vector.extract_strided_slice %11 {offsets = [0, 5, 0], sizes = [32, 1, 16], strides = [1, 1, 1]} : vector<32x8x16xf32> to vector<32x1x16xf32>
    %23 = vector.shape_cast %22 : vector<32x1x16xf32> to vector<32x16xf32>
    %24 = vector.extract_strided_slice %11 {offsets = [0, 6, 0], sizes = [32, 1, 16], strides = [1, 1, 1]} : vector<32x8x16xf32> to vector<32x1x16xf32>
    %25 = vector.shape_cast %24 : vector<32x1x16xf32> to vector<32x16xf32>
    %26 = vector.extract_strided_slice %11 {offsets = [0, 7, 0], sizes = [32, 1, 16], strides = [1, 1, 1]} : vector<32x8x16xf32> to vector<32x1x16xf32>
    %27 = vector.shape_cast %26 : vector<32x1x16xf32> to vector<32x16xf32>
    %28 = tpu.concatenate %13, %15, %17, %19, %21, %23, %25, %27 in 1 : vector<32x16xf32>, vector<32x16xf32>, vector<32x16xf32>, vector<32x16xf32>, vector<32x16xf32>, vector<32x16xf32>, vector<32x16xf32>, vector<32x16xf32> -> vector<32x128xf32>
    %29 = vector.shape_cast %28 : vector<32x128xf32> to vector<4x8x128xf32>
    %cst_8 = arith.constant 0.000000e+00 : f32
    %30 = vector.broadcast %cst_8 : f32 to vector<1x10x128xf32>
    %c0_9 = arith.constant 0 : index
    %c0_10 = arith.constant 0 : index
    %c0_11 = arith.constant 0 : index
    %31 = vector.load %arg9[%c0_9, %c0_10, %c0_11] : memref<6x10x128xf32, #tpu.memory_space<vmem>>, vector<1x10x128xf32>
    tpu.vector_store %arg9[%c0_9, %c0_10, %c0_11], %30 {strides = array<i32>} : memref<6x10x128xf32, #tpu.memory_space<vmem>>, vector<1x10x128xf32>,
    %cst_12 = arith.constant 0.000000e+00 : f32
    %32 = vector.broadcast %cst_12 : f32 to vector<1x10x128xf32>
    %c5 = arith.constant 5 : index
    %c0_13 = arith.constant 0 : index
    %c0_14 = arith.constant 0 : index
    %33 = vector.load %arg9[%c5, %c0_13, %c0_14] : memref<6x10x128xf32, #tpu.memory_space<vmem>>, vector<1x10x128xf32>
    tpu.vector_store %arg9[%c5, %c0_13, %c0_14], %32 {strides = array<i32>} : memref<6x10x128xf32, #tpu.memory_space<vmem>>, vector<1x10x128xf32>,
    %cst_15 = arith.constant 0.000000e+00 : f32
    %34 = vector.broadcast %cst_15 : f32 to vector<4x1x128xf32>
    %c1 = arith.constant 1 : index
    %c0_16 = arith.constant 0 : index
    %c0_17 = arith.constant 0 : index
    %35 = vector.load %arg9[%c1, %c0_16, %c0_17] : memref<6x10x128xf32, #tpu.memory_space<vmem>>, vector<4x1x128xf32>
    tpu.vector_store %arg9[%c1, %c0_16, %c0_17], %34 {strides = array<i32>} : memref<6x10x128xf32, #tpu.memory_space<vmem>>, vector<4x1x128xf32>,
    %cst_18 = arith.constant 0.000000e+00 : f32
    %36 = vector.broadcast %cst_18 : f32 to vector<4x1x128xf32>
    %c1_19 = arith.constant 1 : index
    %c9 = arith.constant 9 : index
    %c0_20 = arith.constant 0 : index
    %37 = vector.load %arg9[%c1_19, %c9, %c0_20] : memref<6x10x128xf32, #tpu.memory_space<vmem>>, vector<4x1x128xf32>
    tpu.vector_store %arg9[%c1_19, %c9, %c0_20], %36 {strides = array<i32>} : memref<6x10x128xf32, #tpu.memory_space<vmem>>, vector<4x1x128xf32>,
    %c1_21 = arith.constant 1 : index
    %c1_22 = arith.constant 1 : index
    %c0_23 = arith.constant 0 : index
    %38 = vector.load %arg9[%c1_21, %c1_22, %c0_23] : memref<6x10x128xf32, #tpu.memory_space<vmem>>, vector<4x8x128xf32>
    tpu.vector_store %arg9[%c1_21, %c1_22, %c0_23], %29 {strides = array<i32>} : memref<6x10x128xf32, #tpu.memory_space<vmem>>, vector<4x8x128xf32>,
    %c0_24 = arith.constant 0 : index
    %c0_25 = arith.constant 0 : index
    %39 = vector.load %arg5[%c0_24, %c0_25] : memref<1x128xf32, #tpu.memory_space<vmem>>, vector<1x128xf32>
    %c0_i32 = arith.constant 0 : i32
    %c4_i32 = arith.constant 4 : i32
    %40 = arith.addi %c0_i32, %c4_i32 : i32
    %c1_i32 = arith.constant 1 : i32
    scf.for %arg11 = %c0_i32 to %40 step %c1_i32  : i32 {
      %cst_38 = arith.constant 0.000000e+00 : f32
      %71 = vector.broadcast %cst_38 : f32 to vector<8x128xf32>
      %c1_i32_39 = arith.constant 1 : i32
      %72 = arith.muli %arg11, %c1_i32_39 : i32
      %c0_i32_40 = arith.constant 0 : i32
      %73 = arith.addi %72, %c0_i32_40 : i32
      %74 = arith.index_cast %73 : i32 to index
      %c0_41 = arith.constant 0 : index
      %c0_42 = arith.constant 0 : index
      %75 = vector.load %arg9[%74, %c0_41, %c0_42] : memref<6x10x128xf32, #tpu.memory_space<vmem>>, vector<1x8x128xf32>
      %76 = vector.shape_cast %75 : vector<1x8x128xf32> to vector<8x128xf32>
      %cst_43 = arith.constant 0.000000e+00 : f32
      %77 = vector.broadcast %cst_43 : f32 to vector<8x16xf32>
      %78 = vector.extract_strided_slice %76 {offsets = [0, 0], sizes = [8, 112], strides = [1, 1]} : vector<8x128xf32> to vector<8x112xf32>
      %79 = tpu.concatenate %77, %78 in 1 : vector<8x16xf32>, vector<8x112xf32> -> vector<8x128xf32>
      %c0_44 = arith.constant 0 : index
      %c0_45 = arith.constant 0 : index
      %80 = vector.load %arg4[%c0_44, %c0_45] : memref<27x128xf32, #tpu.memory_space<vmem>>, vector<1x128xf32>
      %81 = vector.broadcast %80 : vector<1x128xf32> to vector<8x128xf32>
      %82 = arith.mulf %79, %81 : vector<8x128xf32>
      %83 = arith.addf %71, %82 : vector<8x128xf32>
      %c1_46 = arith.constant 1 : index
      %c0_47 = arith.constant 0 : index
      %84 = vector.load %arg4[%c1_46, %c0_47] : memref<27x128xf32, #tpu.memory_space<vmem>>, vector<1x128xf32>
      %85 = vector.broadcast %84 : vector<1x128xf32> to vector<8x128xf32>
      %86 = arith.mulf %76, %85 : vector<8x128xf32>
      %87 = arith.addf %83, %86 : vector<8x128xf32>
      %88 = vector.extract_strided_slice %76 {offsets = [0, 16], sizes = [8, 112], strides = [1, 1]} : vector<8x128xf32> to vector<8x112xf32>
      %cst_48 = arith.constant 0.000000e+00 : f32
      %89 = vector.broadcast %cst_48 : f32 to vector<8x16xf32>
      %90 = tpu.concatenate %88, %89 in 1 : vector<8x112xf32>, vector<8x16xf32> -> vector<8x128xf32>
      %c2 = arith.constant 2 : index
      %c0_49 = arith.constant 0 : index
      %91 = vector.load %arg4[%c2, %c0_49] : memref<27x128xf32, #tpu.memory_space<vmem>>, vector<1x128xf32>
      %92 = vector.broadcast %91 : vector<1x128xf32> to vector<8x128xf32>
      %93 = arith.mulf %90, %92 : vector<8x128xf32>
      %94 = arith.addf %87, %93 : vector<8x128xf32>
      %95 = arith.index_cast %73 : i32 to index
      %c1_50 = arith.constant 1 : index
      %c0_51 = arith.constant 0 : index
      %96 = vector.load %arg9[%95, %c1_50, %c0_51] : memref<6x10x128xf32, #tpu.memory_space<vmem>>, vector<1x8x128xf32>
      %97 = vector.shape_cast %96 : vector<1x8x128xf32> to vector<8x128xf32>
      %cst_52 = arith.constant 0.000000e+00 : f32
      %98 = vector.broadcast %cst_52 : f32 to vector<8x16xf32>
      %99 = vector.extract_strided_slice %97 {offsets = [0, 0], sizes = [8, 112], strides = [1, 1]} : vector<8x128xf32> to vector<8x112xf32>
      %100 = tpu.concatenate %98, %99 in 1 : vector<8x16xf32>, vector<8x112xf32> -> vector<8x128xf32>
      %c3 = arith.constant 3 : index
      %c0_53 = arith.constant 0 : index
      %101 = vector.load %arg4[%c3, %c0_53] : memref<27x128xf32, #tpu.memory_space<vmem>>, vector<1x128xf32>
      %102 = vector.broadcast %101 : vector<1x128xf32> to vector<8x128xf32>
      %103 = arith.mulf %100, %102 : vector<8x128xf32>
      %104 = arith.addf %94, %103 : vector<8x128xf32>
      %c4 = arith.constant 4 : index
      %c0_54 = arith.constant 0 : index
      %105 = vector.load %arg4[%c4, %c0_54] : memref<27x128xf32, #tpu.memory_space<vmem>>, vector<1x128xf32>
      %106 = vector.broadcast %105 : vector<1x128xf32> to vector<8x128xf32>
      %107 = arith.mulf %97, %106 : vector<8x128xf32>
      %108 = arith.addf %104, %107 : vector<8x128xf32>
      %109 = vector.extract_strided_slice %97 {offsets = [0, 16], sizes = [8, 112], strides = [1, 1]} : vector<8x128xf32> to vector<8x112xf32>
      %cst_55 = arith.constant 0.000000e+00 : f32
      %110 = vector.broadcast %cst_55 : f32 to vector<8x16xf32>
      %111 = tpu.concatenate %109, %110 in 1 : vector<8x112xf32>, vector<8x16xf32> -> vector<8x128xf32>
      %c5_56 = arith.constant 5 : index
      %c0_57 = arith.constant 0 : index
      %112 = vector.load %arg4[%c5_56, %c0_57] : memref<27x128xf32, #tpu.memory_space<vmem>>, vector<1x128xf32>
      %113 = vector.broadcast %112 : vector<1x128xf32> to vector<8x128xf32>
      %114 = arith.mulf %111, %113 : vector<8x128xf32>
      %115 = arith.addf %108, %114 : vector<8x128xf32>
      %116 = arith.index_cast %73 : i32 to index
      %c2_58 = arith.constant 2 : index
      %c0_59 = arith.constant 0 : index
      %117 = vector.load %arg9[%116, %c2_58, %c0_59] : memref<6x10x128xf32, #tpu.memory_space<vmem>>, vector<1x8x128xf32>
      %118 = vector.shape_cast %117 : vector<1x8x128xf32> to vector<8x128xf32>
      %cst_60 = arith.constant 0.000000e+00 : f32
      %119 = vector.broadcast %cst_60 : f32 to vector<8x16xf32>
      %120 = vector.extract_strided_slice %118 {offsets = [0, 0], sizes = [8, 112], strides = [1, 1]} : vector<8x128xf32> to vector<8x112xf32>
      %121 = tpu.concatenate %119, %120 in 1 : vector<8x16xf32>, vector<8x112xf32> -> vector<8x128xf32>
      %c6 = arith.constant 6 : index
      %c0_61 = arith.constant 0 : index
      %122 = vector.load %arg4[%c6, %c0_61] : memref<27x128xf32, #tpu.memory_space<vmem>>, vector<1x128xf32>
      %123 = vector.broadcast %122 : vector<1x128xf32> to vector<8x128xf32>
      %124 = arith.mulf %121, %123 : vector<8x128xf32>
      %125 = arith.addf %115, %124 : vector<8x128xf32>
      %c7 = arith.constant 7 : index
      %c0_62 = arith.constant 0 : index
      %126 = vector.load %arg4[%c7, %c0_62] : memref<27x128xf32, #tpu.memory_space<vmem>>, vector<1x128xf32>
      %127 = vector.broadcast %126 : vector<1x128xf32> to vector<8x128xf32>
      %128 = arith.mulf %118, %127 : vector<8x128xf32>
      %129 = arith.addf %125, %128 : vector<8x128xf32>
      %130 = vector.extract_strided_slice %118 {offsets = [0, 16], sizes = [8, 112], strides = [1, 1]} : vector<8x128xf32> to vector<8x112xf32>
      %cst_63 = arith.constant 0.000000e+00 : f32
      %131 = vector.broadcast %cst_63 : f32 to vector<8x16xf32>
      %132 = tpu.concatenate %130, %131 in 1 : vector<8x112xf32>, vector<8x16xf32> -> vector<8x128xf32>
      %c8 = arith.constant 8 : index
      %c0_64 = arith.constant 0 : index
      %133 = vector.load %arg4[%c8, %c0_64] : memref<27x128xf32, #tpu.memory_space<vmem>>, vector<1x128xf32>
      %134 = vector.broadcast %133 : vector<1x128xf32> to vector<8x128xf32>
      %135 = arith.mulf %132, %134 : vector<8x128xf32>
      %136 = arith.addf %129, %135 : vector<8x128xf32>
      %c1_i32_65 = arith.constant 1 : i32
      %137 = arith.muli %arg11, %c1_i32_65 : i32
      %c1_i32_66 = arith.constant 1 : i32
      %138 = arith.addi %137, %c1_i32_66 : i32
      %139 = arith.index_cast %138 : i32 to index
      %c0_67 = arith.constant 0 : index
      %c0_68 = arith.constant 0 : index
      %140 = vector.load %arg9[%139, %c0_67, %c0_68] : memref<6x10x128xf32, #tpu.memory_space<vmem>>, vector<1x8x128xf32>
      %141 = vector.shape_cast %140 : vector<1x8x128xf32> to vector<8x128xf32>
      %cst_69 = arith.constant 0.000000e+00 : f32
      %142 = vector.broadcast %cst_69 : f32 to vector<8x16xf32>
      %143 = vector.extract_strided_slice %141 {offsets = [0, 0], sizes = [8, 112], strides = [1, 1]} : vector<8x128xf32> to vector<8x112xf32>
      %144 = tpu.concatenate %142, %143 in 1 : vector<8x16xf32>, vector<8x112xf32> -> vector<8x128xf32>
      %c9_70 = arith.constant 9 : index
      %c0_71 = arith.constant 0 : index
      %145 = vector.load %arg4[%c9_70, %c0_71] : memref<27x128xf32, #tpu.memory_space<vmem>>, vector<1x128xf32>
      %146 = vector.broadcast %145 : vector<1x128xf32> to vector<8x128xf32>
      %147 = arith.mulf %144, %146 : vector<8x128xf32>
      %148 = arith.addf %136, %147 : vector<8x128xf32>
      %c10 = arith.constant 10 : index
      %c0_72 = arith.constant 0 : index
      %149 = vector.load %arg4[%c10, %c0_72] : memref<27x128xf32, #tpu.memory_space<vmem>>, vector<1x128xf32>
      %150 = vector.broadcast %149 : vector<1x128xf32> to vector<8x128xf32>
      %151 = arith.mulf %141, %150 : vector<8x128xf32>
      %152 = arith.addf %148, %151 : vector<8x128xf32>
      %153 = vector.extract_strided_slice %141 {offsets = [0, 16], sizes = [8, 112], strides = [1, 1]} : vector<8x128xf32> to vector<8x112xf32>
      %cst_73 = arith.constant 0.000000e+00 : f32
      %154 = vector.broadcast %cst_73 : f32 to vector<8x16xf32>
      %155 = tpu.concatenate %153, %154 in 1 : vector<8x112xf32>, vector<8x16xf32> -> vector<8x128xf32>
      %c11 = arith.constant 11 : index
      %c0_74 = arith.constant 0 : index
      %156 = vector.load %arg4[%c11, %c0_74] : memref<27x128xf32, #tpu.memory_space<vmem>>, vector<1x128xf32>
      %157 = vector.broadcast %156 : vector<1x128xf32> to vector<8x128xf32>
      %158 = arith.mulf %155, %157 : vector<8x128xf32>
      %159 = arith.addf %152, %158 : vector<8x128xf32>
      %160 = arith.index_cast %138 : i32 to index
      %c1_75 = arith.constant 1 : index
      %c0_76 = arith.constant 0 : index
      %161 = vector.load %arg9[%160, %c1_75, %c0_76] : memref<6x10x128xf32, #tpu.memory_space<vmem>>, vector<1x8x128xf32>
      %162 = vector.shape_cast %161 : vector<1x8x128xf32> to vector<8x128xf32>
      %cst_77 = arith.constant 0.000000e+00 : f32
      %163 = vector.broadcast %cst_77 : f32 to vector<8x16xf32>
      %164 = vector.extract_strided_slice %162 {offsets = [0, 0], sizes = [8, 112], strides = [1, 1]} : vector<8x128xf32> to vector<8x112xf32>
      %165 = tpu.concatenate %163, %164 in 1 : vector<8x16xf32>, vector<8x112xf32> -> vector<8x128xf32>
      %c12 = arith.constant 12 : index
      %c0_78 = arith.constant 0 : index
      %166 = vector.load %arg4[%c12, %c0_78] : memref<27x128xf32, #tpu.memory_space<vmem>>, vector<1x128xf32>
      %167 = vector.broadcast %166 : vector<1x128xf32> to vector<8x128xf32>
      %168 = arith.mulf %165, %167 : vector<8x128xf32>
      %169 = arith.addf %159, %168 : vector<8x128xf32>
      %c13 = arith.constant 13 : index
      %c0_79 = arith.constant 0 : index
      %170 = vector.load %arg4[%c13, %c0_79] : memref<27x128xf32, #tpu.memory_space<vmem>>, vector<1x128xf32>
      %171 = vector.broadcast %170 : vector<1x128xf32> to vector<8x128xf32>
      %172 = arith.mulf %162, %171 : vector<8x128xf32>
      %173 = arith.addf %169, %172 : vector<8x128xf32>
      %174 = vector.extract_strided_slice %162 {offsets = [0, 16], sizes = [8, 112], strides = [1, 1]} : vector<8x128xf32> to vector<8x112xf32>
      %cst_80 = arith.constant 0.000000e+00 : f32
      %175 = vector.broadcast %cst_80 : f32 to vector<8x16xf32>
      %176 = tpu.concatenate %174, %175 in 1 : vector<8x112xf32>, vector<8x16xf32> -> vector<8x128xf32>
      %c14 = arith.constant 14 : index
      %c0_81 = arith.constant 0 : index
      %177 = vector.load %arg4[%c14, %c0_81] : memref<27x128xf32, #tpu.memory_space<vmem>>, vector<1x128xf32>
      %178 = vector.broadcast %177 : vector<1x128xf32> to vector<8x128xf32>
      %179 = arith.mulf %176, %178 : vector<8x128xf32>
      %180 = arith.addf %173, %179 : vector<8x128xf32>
      %181 = arith.index_cast %138 : i32 to index
      %c2_82 = arith.constant 2 : index
      %c0_83 = arith.constant 0 : index
      %182 = vector.load %arg9[%181, %c2_82, %c0_83] : memref<6x10x128xf32, #tpu.memory_space<vmem>>, vector<1x8x128xf32>
      %183 = vector.shape_cast %182 : vector<1x8x128xf32> to vector<8x128xf32>
      %cst_84 = arith.constant 0.000000e+00 : f32
      %184 = vector.broadcast %cst_84 : f32 to vector<8x16xf32>
      %185 = vector.extract_strided_slice %183 {offsets = [0, 0], sizes = [8, 112], strides = [1, 1]} : vector<8x128xf32> to vector<8x112xf32>
      %186 = tpu.concatenate %184, %185 in 1 : vector<8x16xf32>, vector<8x112xf32> -> vector<8x128xf32>
      %c15 = arith.constant 15 : index
      %c0_85 = arith.constant 0 : index
      %187 = vector.load %arg4[%c15, %c0_85] : memref<27x128xf32, #tpu.memory_space<vmem>>, vector<1x128xf32>
      %188 = vector.broadcast %187 : vector<1x128xf32> to vector<8x128xf32>
      %189 = arith.mulf %186, %188 : vector<8x128xf32>
      %190 = arith.addf %180, %189 : vector<8x128xf32>
      %c16 = arith.constant 16 : index
      %c0_86 = arith.constant 0 : index
      %191 = vector.load %arg4[%c16, %c0_86] : memref<27x128xf32, #tpu.memory_space<vmem>>, vector<1x128xf32>
      %192 = vector.broadcast %191 : vector<1x128xf32> to vector<8x128xf32>
      %193 = arith.mulf %183, %192 : vector<8x128xf32>
      %194 = arith.addf %190, %193 : vector<8x128xf32>
      %195 = vector.extract_strided_slice %183 {offsets = [0, 16], sizes = [8, 112], strides = [1, 1]} : vector<8x128xf32> to vector<8x112xf32>
      %cst_87 = arith.constant 0.000000e+00 : f32
      %196 = vector.broadcast %cst_87 : f32 to vector<8x16xf32>
      %197 = tpu.concatenate %195, %196 in 1 : vector<8x112xf32>, vector<8x16xf32> -> vector<8x128xf32>
      %c17 = arith.constant 17 : index
      %c0_88 = arith.constant 0 : index
      %198 = vector.load %arg4[%c17, %c0_88] : memref<27x128xf32, #tpu.memory_space<vmem>>, vector<1x128xf32>
      %199 = vector.broadcast %198 : vector<1x128xf32> to vector<8x128xf32>
      %200 = arith.mulf %197, %199 : vector<8x128xf32>
      %201 = arith.addf %194, %200 : vector<8x128xf32>
      %c1_i32_89 = arith.constant 1 : i32
      %202 = arith.muli %arg11, %c1_i32_89 : i32
      %c2_i32 = arith.constant 2 : i32
      %203 = arith.addi %202, %c2_i32 : i32
      %204 = arith.index_cast %203 : i32 to index
      %c0_90 = arith.constant 0 : index
      %c0_91 = arith.constant 0 : index
      %205 = vector.load %arg9[%204, %c0_90, %c0_91] : memref<6x10x128xf32, #tpu.memory_space<vmem>>, vector<1x8x128xf32>
      %206 = vector.shape_cast %205 : vector<1x8x128xf32> to vector<8x128xf32>
      %cst_92 = arith.constant 0.000000e+00 : f32
      %207 = vector.broadcast %cst_92 : f32 to vector<8x16xf32>
      %208 = vector.extract_strided_slice %206 {offsets = [0, 0], sizes = [8, 112], strides = [1, 1]} : vector<8x128xf32> to vector<8x112xf32>
      %209 = tpu.concatenate %207, %208 in 1 : vector<8x16xf32>, vector<8x112xf32> -> vector<8x128xf32>
      %c18 = arith.constant 18 : index
      %c0_93 = arith.constant 0 : index
      %210 = vector.load %arg4[%c18, %c0_93] : memref<27x128xf32, #tpu.memory_space<vmem>>, vector<1x128xf32>
      %211 = vector.broadcast %210 : vector<1x128xf32> to vector<8x128xf32>
      %212 = arith.mulf %209, %211 : vector<8x128xf32>
      %213 = arith.addf %201, %212 : vector<8x128xf32>
      %c19 = arith.constant 19 : index
      %c0_94 = arith.constant 0 : index
      %214 = vector.load %arg4[%c19, %c0_94] : memref<27x128xf32, #tpu.memory_space<vmem>>, vector<1x128xf32>
      %215 = vector.broadcast %214 : vector<1x128xf32> to vector<8x128xf32>
      %216 = arith.mulf %206, %215 : vector<8x128xf32>
      %217 = arith.addf %213, %216 : vector<8x128xf32>
      %218 = vector.extract_strided_slice %206 {offsets = [0, 16], sizes = [8, 112], strides = [1, 1]} : vector<8x128xf32> to vector<8x112xf32>
      %cst_95 = arith.constant 0.000000e+00 : f32
      %219 = vector.broadcast %cst_95 : f32 to vector<8x16xf32>
      %220 = tpu.concatenate %218, %219 in 1 : vector<8x112xf32>, vector<8x16xf32> -> vector<8x128xf32>
      %c20 = arith.constant 20 : index
      %c0_96 = arith.constant 0 : index
      %221 = vector.load %arg4[%c20, %c0_96] : memref<27x128xf32, #tpu.memory_space<vmem>>, vector<1x128xf32>
      %222 = vector.broadcast %221 : vector<1x128xf32> to vector<8x128xf32>
      %223 = arith.mulf %220, %222 : vector<8x128xf32>
      %224 = arith.addf %217, %223 : vector<8x128xf32>
      %225 = arith.index_cast %203 : i32 to index
      %c1_97 = arith.constant 1 : index
      %c0_98 = arith.constant 0 : index
      %226 = vector.load %arg9[%225, %c1_97, %c0_98] : memref<6x10x128xf32, #tpu.memory_space<vmem>>, vector<1x8x128xf32>
      %227 = vector.shape_cast %226 : vector<1x8x128xf32> to vector<8x128xf32>
      %cst_99 = arith.constant 0.000000e+00 : f32
      %228 = vector.broadcast %cst_99 : f32 to vector<8x16xf32>
      %229 = vector.extract_strided_slice %227 {offsets = [0, 0], sizes = [8, 112], strides = [1, 1]} : vector<8x128xf32> to vector<8x112xf32>
      %230 = tpu.concatenate %228, %229 in 1 : vector<8x16xf32>, vector<8x112xf32> -> vector<8x128xf32>
      %c21 = arith.constant 21 : index
      %c0_100 = arith.constant 0 : index
      %231 = vector.load %arg4[%c21, %c0_100] : memref<27x128xf32, #tpu.memory_space<vmem>>, vector<1x128xf32>
      %232 = vector.broadcast %231 : vector<1x128xf32> to vector<8x128xf32>
      %233 = arith.mulf %230, %232 : vector<8x128xf32>
      %234 = arith.addf %224, %233 : vector<8x128xf32>
      %c22 = arith.constant 22 : index
      %c0_101 = arith.constant 0 : index
      %235 = vector.load %arg4[%c22, %c0_101] : memref<27x128xf32, #tpu.memory_space<vmem>>, vector<1x128xf32>
      %236 = vector.broadcast %235 : vector<1x128xf32> to vector<8x128xf32>
      %237 = arith.mulf %227, %236 : vector<8x128xf32>
      %238 = arith.addf %234, %237 : vector<8x128xf32>
      %239 = vector.extract_strided_slice %227 {offsets = [0, 16], sizes = [8, 112], strides = [1, 1]} : vector<8x128xf32> to vector<8x112xf32>
      %cst_102 = arith.constant 0.000000e+00 : f32
      %240 = vector.broadcast %cst_102 : f32 to vector<8x16xf32>
      %241 = tpu.concatenate %239, %240 in 1 : vector<8x112xf32>, vector<8x16xf32> -> vector<8x128xf32>
      %c23 = arith.constant 23 : index
      %c0_103 = arith.constant 0 : index
      %242 = vector.load %arg4[%c23, %c0_103] : memref<27x128xf32, #tpu.memory_space<vmem>>, vector<1x128xf32>
      %243 = vector.broadcast %242 : vector<1x128xf32> to vector<8x128xf32>
      %244 = arith.mulf %241, %243 : vector<8x128xf32>
      %245 = arith.addf %238, %244 : vector<8x128xf32>
      %246 = arith.index_cast %203 : i32 to index
      %c2_104 = arith.constant 2 : index
      %c0_105 = arith.constant 0 : index
      %247 = vector.load %arg9[%246, %c2_104, %c0_105] : memref<6x10x128xf32, #tpu.memory_space<vmem>>, vector<1x8x128xf32>
      %248 = vector.shape_cast %247 : vector<1x8x128xf32> to vector<8x128xf32>
      %cst_106 = arith.constant 0.000000e+00 : f32
      %249 = vector.broadcast %cst_106 : f32 to vector<8x16xf32>
      %250 = vector.extract_strided_slice %248 {offsets = [0, 0], sizes = [8, 112], strides = [1, 1]} : vector<8x128xf32> to vector<8x112xf32>
      %251 = tpu.concatenate %249, %250 in 1 : vector<8x16xf32>, vector<8x112xf32> -> vector<8x128xf32>
      %c24 = arith.constant 24 : index
      %c0_107 = arith.constant 0 : index
      %252 = vector.load %arg4[%c24, %c0_107] : memref<27x128xf32, #tpu.memory_space<vmem>>, vector<1x128xf32>
      %253 = vector.broadcast %252 : vector<1x128xf32> to vector<8x128xf32>
      %254 = arith.mulf %251, %253 : vector<8x128xf32>
      %255 = arith.addf %245, %254 : vector<8x128xf32>
      %c25 = arith.constant 25 : index
      %c0_108 = arith.constant 0 : index
      %256 = vector.load %arg4[%c25, %c0_108] : memref<27x128xf32, #tpu.memory_space<vmem>>, vector<1x128xf32>
      %257 = vector.broadcast %256 : vector<1x128xf32> to vector<8x128xf32>
      %258 = arith.mulf %248, %257 : vector<8x128xf32>
      %259 = arith.addf %255, %258 : vector<8x128xf32>
      %260 = vector.extract_strided_slice %248 {offsets = [0, 16], sizes = [8, 112], strides = [1, 1]} : vector<8x128xf32> to vector<8x112xf32>
      %cst_109 = arith.constant 0.000000e+00 : f32
      %261 = vector.broadcast %cst_109 : f32 to vector<8x16xf32>
      %262 = tpu.concatenate %260, %261 in 1 : vector<8x112xf32>, vector<8x16xf32> -> vector<8x128xf32>
      %c26 = arith.constant 26 : index
      %c0_110 = arith.constant 0 : index
      %263 = vector.load %arg4[%c26, %c0_110] : memref<27x128xf32, #tpu.memory_space<vmem>>, vector<1x128xf32>
      %264 = vector.broadcast %263 : vector<1x128xf32> to vector<8x128xf32>
      %265 = arith.mulf %262, %264 : vector<8x128xf32>
      %266 = arith.addf %259, %265 : vector<8x128xf32>
      %267 = vector.broadcast %39 : vector<1x128xf32> to vector<8x128xf32>
      %268 = arith.addf %266, %267 : vector<8x128xf32>
      %cst_111 = arith.constant 0.000000e+00 : f32
      %cst_112 = arith.constant 6.000000e+00 : f32
      %269 = vector.broadcast %cst_111 : f32 to vector<8x128xf32>
      %270 = arith.maximumf %269, %268 : vector<8x128xf32>
      %271 = vector.broadcast %cst_112 : f32 to vector<8x128xf32>
      %272 = arith.minimumf %271, %270 : vector<8x128xf32>
      %273 = arith.truncf %272 : vector<8x128xf32> to vector<8x128xbf16>
      %274 = arith.index_cast %arg11 : i32 to index
      %c0_113 = arith.constant 0 : index
      %c0_114 = arith.constant 0 : index
      %275 = vector.load %arg10[%274, %c0_113, %c0_114] : memref<4x8x128xbf16, #tpu.memory_space<vmem>>, vector<1x8x128xbf16>
      %276 = vector.shape_cast %275 : vector<1x8x128xbf16> to vector<8x128xbf16>
      %277 = vector.shape_cast %273 : vector<8x128xbf16> to vector<1x8x128xbf16>
      tpu.vector_store %arg10[%274, %c0_113, %c0_114], %277 {strides = array<i32>} : memref<4x8x128xbf16, #tpu.memory_space<vmem>>, vector<1x8x128xbf16>,
    }
    %c4_i32_26 = arith.constant 4 : i32
    %c0_27 = arith.constant 0 : index
    %c0_28 = arith.constant 0 : index
    %c0_29 = arith.constant 0 : index
    %41 = vector.load %arg10[%c0_27, %c0_28, %c0_29] : memref<4x8x128xbf16, #tpu.memory_space<vmem>>, vector<4x8x128xbf16>
    %42 = vector.shape_cast %41 : vector<4x8x128xbf16> to vector<32x128xbf16>
    %43 = vector.extract_strided_slice %42 {offsets = [0, 0], sizes = [32, 16], strides = [1, 1]} : vector<32x128xbf16> to vector<32x16xbf16>
    %44 = vector.extract_strided_slice %42 {offsets = [0, 16], sizes = [32, 16], strides = [1, 1]} : vector<32x128xbf16> to vector<32x16xbf16>
    %45 = vector.extract_strided_slice %42 {offsets = [0, 32], sizes = [32, 16], strides = [1, 1]} : vector<32x128xbf16> to vector<32x16xbf16>
    %46 = vector.extract_strided_slice %42 {offsets = [0, 48], sizes = [32, 16], strides = [1, 1]} : vector<32x128xbf16> to vector<32x16xbf16>
    %47 = vector.extract_strided_slice %42 {offsets = [0, 64], sizes = [32, 16], strides = [1, 1]} : vector<32x128xbf16> to vector<32x16xbf16>
    %48 = vector.extract_strided_slice %42 {offsets = [0, 80], sizes = [32, 16], strides = [1, 1]} : vector<32x128xbf16> to vector<32x16xbf16>
    %49 = vector.extract_strided_slice %42 {offsets = [0, 96], sizes = [32, 16], strides = [1, 1]} : vector<32x128xbf16> to vector<32x16xbf16>
    %50 = vector.extract_strided_slice %42 {offsets = [0, 112], sizes = [32, 16], strides = [1, 1]} : vector<32x128xbf16> to vector<32x16xbf16>
    %51 = vector.shape_cast %43 : vector<32x16xbf16> to vector<32x1x16xbf16>
    %52 = vector.shape_cast %44 : vector<32x16xbf16> to vector<32x1x16xbf16>
    %53 = vector.shape_cast %45 : vector<32x16xbf16> to vector<32x1x16xbf16>
    %54 = vector.shape_cast %46 : vector<32x16xbf16> to vector<32x1x16xbf16>
    %55 = vector.shape_cast %47 : vector<32x16xbf16> to vector<32x1x16xbf16>
    %56 = vector.shape_cast %48 : vector<32x16xbf16> to vector<32x1x16xbf16>
    %57 = vector.shape_cast %49 : vector<32x16xbf16> to vector<32x1x16xbf16>
    %58 = vector.shape_cast %50 : vector<32x16xbf16> to vector<32x1x16xbf16>
    %59 = tpu.concatenate %51, %52, %53, %54, %55, %56, %57, %58 in 1 : vector<32x1x16xbf16>, vector<32x1x16xbf16>, vector<32x1x16xbf16>, vector<32x1x16xbf16>, vector<32x1x16xbf16>, vector<32x1x16xbf16>, vector<32x1x16xbf16>, vector<32x1x16xbf16> -> vector<32x8x16xbf16>
    %60 = vector.shape_cast %59 : vector<32x8x16xbf16> to vector<256x16xbf16>
    %c0_30 = arith.constant 0 : index
    %c0_31 = arith.constant 0 : index
    %61 = vector.load %arg6[%c0_30, %c0_31] : memref<4x16xbf16, #tpu.memory_space<vmem>>, vector<4x16xbf16>
    %cst_32 = arith.constant dense<0.000000e+00> : vector<4x256xf32>
    %62 = tpu.matmul %61, %60, %cst_32 {dimension_numbers = #tpu.dot_dimension_numbers<[1], [1], [0], [0], [0, 0, 1, 0], [], []>} : vector<4x16xbf16>, vector<256x16xbf16>, vector<4x256xf32> -> vector<4x256xf32>
    %c0_33 = arith.constant 0 : index
    %c0_34 = arith.constant 0 : index
    %63 = vector.load %arg7[%c0_33, %c0_34] : memref<4x1xf32, #tpu.memory_space<vmem>>, vector<4x1xf32>
    %64 = vector.broadcast %63 : vector<4x1xf32> to vector<4x256xf32>
    %65 = arith.addf %62, %64 : vector<4x256xf32>
    %66 = arith.extf %1 : vector<4x256xbf16> to vector<4x256xf32>
    %67 = arith.addf %65, %66 : vector<4x256xf32>
    %c0_35 = arith.constant 0 : index
    %c0_36 = arith.constant 0 : index
    %c0_37 = arith.constant 0 : index
    %68 = vector.load %arg8[%c0_35, %c0_36, %c0_37] : memref<1x4x256xf32, #tpu.memory_space<vmem>>, vector<1x4x256xf32>
    %69 = vector.shape_cast %68 : vector<1x4x256xf32> to vector<4x256xf32>
    %70 = vector.shape_cast %67 : vector<4x256xf32> to vector<1x4x256xf32>
    tpu.vector_store %arg8[%c0_35, %c0_36, %c0_37], %70 {strides = array<i32>} : memref<1x4x256xf32, #tpu.memory_space<vmem>>, vector<1x4x256xf32>,
    return
  }
  func.func @transform_0(%arg0: i32) -> (i32, i32, i32) {
    %c0_i32 = arith.constant 0 : i32
    %c0_i32_0 = arith.constant 0 : i32
    %c0_i32_1 = arith.constant 0 : i32
    return %arg0, %c0_i32, %c0_i32_0 : i32, i32, i32
  }
  func.func @transform_1(%arg0: i32) -> (i32, i32) {
    %c0_i32 = arith.constant 0 : i32
    %c0_i32_0 = arith.constant 0 : i32
    %c0_i32_1 = arith.constant 0 : i32
    return %c0_i32, %c0_i32_0 : i32, i32
  }
  func.func @transform_2(%arg0: i32) -> (i32, i32) {
    %c0_i32 = arith.constant 0 : i32
    %c0_i32_0 = arith.constant 0 : i32
    %c0_i32_1 = arith.constant 0 : i32
    return %c0_i32, %c0_i32_0 : i32, i32
  }
  func.func @transform_3(%arg0: i32) -> (i32, i32) {
    %c0_i32 = arith.constant 0 : i32
    %c0_i32_0 = arith.constant 0 : i32
    %c0_i32_1 = arith.constant 0 : i32
    return %c0_i32, %c0_i32_0 : i32, i32
  }
  func.func @transform_4(%arg0: i32) -> (i32, i32) {
    %c0_i32 = arith.constant 0 : i32
    %c0_i32_0 = arith.constant 0 : i32
    %c0_i32_1 = arith.constant 0 : i32
    return %c0_i32, %c0_i32_0 : i32, i32
  }
  func.func @transform_5(%arg0: i32) -> (i32, i32) {
    %c0_i32 = arith.constant 0 : i32
    %c0_i32_0 = arith.constant 0 : i32
    %c0_i32_1 = arith.constant 0 : i32
    return %c0_i32, %c0_i32_0 : i32, i32
  }
  func.func @transform_6(%arg0: i32) -> (i32, i32) {
    %c0_i32 = arith.constant 0 : i32
    %c0_i32_0 = arith.constant 0 : i32
    %c0_i32_1 = arith.constant 0 : i32
    return %c0_i32, %c0_i32_0 : i32, i32
  }
  func.func @transform_7(%arg0: i32) -> (i32, i32, i32) {
    %c0_i32 = arith.constant 0 : i32
    %c0_i32_0 = arith.constant 0 : i32
    %c0_i32_1 = arith.constant 0 : i32
    return %arg0, %c0_i32, %c0_i32_0 : i32, i32, i32
  }
}

</mosaic_0001>

<bundles_post_ra>
// kernel: tpu_custom_call.1
= control target key start
LH: loop header
LB: loop body
LE: loop exit
PB: predicated region body
PF: predicated region fallthrough
CT: control target
= control target key end

     0   :  { %s5767_s0 = inlined_call_operand.hbm [shape: bf16[2,4,256], index: 0, kind: input, shape index: {}]   ;;  %s5768_s1 = inlined_call_operand.vmem [shape: bf16[4,16], index: 1, kind: input, shape index: {}]   ;;  %s5769_s2 = inlined_call_operand.vmem [shape: f32[1,16], index: 2, kind: input, shape index: {}]   ;;  %s5770_s3 = inlined_call_operand.hbm [shape: f32[27,128], index: 3, kind: input, shape index: {}]   ;;  %s5771_s4 = inlined_call_operand.vmem [shape: f32[1,128], index: 4, kind: input, shape index: {}]   ;;  %s5772_s5 = inlined_call_operand.vmem [shape: bf16[4,16], index: 5, kind: input, shape index: {}]   ;;  %s5773_s6 = inlined_call_operand.vmem [shape: f32[4,1], index: 6, kind: input, shape index: {}]   ;;  %s5774_s7 = inlined_call_operand.hbm [shape: f32[2,4,256], index: 7, kind: output, shape index: {}]  }
   0x1   :  { %5816 = sst [smem:[#allocation98_spill]] %s5770_s3 }
   0x2   :  { %12 = vsyncpa [#allocation5], 0 }
   0x3   :  { %14 = vsyncpa [#allocation5 + $0x1], 0 }
   0x4   :  { %15 = vsyncpa [#allocation8], 0 }
   0x5   :  { %16 = vsyncpa [#allocation6], 0 }
   0x6   :  { %18 = vsyncpa [#allocation6 + $0x1], 0  ;;  %s3360_s24 = smov 0   ;;  %s3362_s25 = smov 0  }
   0x7   :  { %s3364_s26 = smov 0   ;;  %s3366_s27 = smov 0  }
   0x8 LB: > { %s5817_s3 = sld [smem:[#allocation98_spill]]  ;;  %s3384_s8 = sadd.s32 4294967295, %s3300_s27   ;;  %s3300_s27 = sphi %s3366_s27, %s6049_s27   ;;  %s3296_s26 = sphi %s3364_s26, %s6048_s26   ;;  %s3292_s25 = sphi %s3362_s25, %s6047_s25   ;;  %s3288_s24 = sphi %s3360_s24, %s6046_s24  }
   0x9   : > { %p2995_p0 = scmp.ge.s32.totalorder %s3300_s27, 1  ;;  %p45_p1 = scmp.eq.s32.totalorder %s3384_s8, 0 }
   0xa   : > { %p207_p2 = scmp.lt.s32.totalorder %s3300_s27, 3  ;;  %s3306_s10 = smov [#allocation7]  }
   0xb   : > { %s226_s11 = sshll.u32 %s3306_s10, 4  ;;  %s3307_s12 = smov 128   ;;  %s227_s11 = int_to_ptr.vmem [resolvable:$true] %s226_s11 }
   0xc   : > { %p3389_p3 = pnand %p2995_p0, %p207_p2  ;;  %s3308_s13 = smov 8  }
   0xd   : > { %s2994_s14 = sadd.s32 4294967294, %s3300_s27   ;;  %s3400_s15 = sadd.s32 1, %s3300_s27  }
   0xe   : > { %s224_s30 = sshll.u32 %s5817_s3, 4  ;;  %p3065_p4 = pneg %p3389_p3  ;;  %s225_s30 = int_to_ptr.hbm [resolvable:$true] %s224_s30 }
   0xf   : > { %s31_s16 = sadd.s32 1, %s3296_s26  ;;  %s28_s17 = ssub.s32 %s3300_s27, %s3400_s15 }
  0x10   : > { %p3066_p6 = pnand %p3065_p4, %p45_p1  ;;  %p38_p7 = scmp.ne.s32.totalorder %s3296_s26, %s3292_s25 }
  0x11   : > { %p29_p8 = scmp.eq.s32.totalorder %s28_s17, 0  ;;  %p39_p9 = scmp.eq.s32.totalorder %s3300_s27, 0 }
  0x12   : > { %3068 = dma.hbm_to_vmem [thread:$0]  (!%p3066_p6), %s225_s30, 512, %s227_s11, [#allocation8], %s3307_s12, %s3307_s12, %s3308_s13  }
  0x13   : > { %p44_p10 = scmp.ne.s32.totalorder %s3292_s25, %s3288_s24  ;;  %p194_p11 = scmp.eq.s32.totalorder %s3384_s8, 1 }
  0x14   : > { %s3412_s18 = scalar_select %p29_p8, %s3296_s26, %s31_s16  }
  0x15   : > { %p3416_p12 = por %p45_p1, %p44_p10  ;;  %p3420_p13 = por %p194_p11, %p38_p7 }
  0x16   : > { %p200_p0 = scmp.eq.s32.totalorder %s2994_s14, 1  ;;  %p40_p2 = por %p39_p9, %p38_p7 }
  0x17   : > { %s249_s21 = sand.u32 1, %s3296_s26   ;;  %p3078_p6 = scmp.lt.s32.totalorder %s3300_s27, 2 }
  0x18   : > { %p3425_p4 = por %p200_p0, %p44_p10  ;;  %s2998_s23 = sshll.u32 %s249_s21, 2 }
  0x19   : > { %s3054_s28 = sshll.u32 %s3300_s27, 2  ;;  %s253_s12 = scalar_lea.vmem [#allocation4], %s2998_s23 }
  0x1a   : > { %s258_s10 = scalar_lea.hbm %s5767_s0, %s3054_s28  ;;  %s262_s13 = sshll.u32 %s253_s12, 4  ;;  %s263_s13 = int_to_ptr.vmem [resolvable:$true] %s262_s13 }
  0x1b   : > { %s260_s11 = sshll.u32 %s258_s10, 4  ;;  %p3434_p8 = pnand %p3078_p6, %p40_p2  ;;  %s261_s11 = int_to_ptr.hbm [resolvable:$true] %s260_s11 }
  0x1c   : > { %s250_s16 = scalar_lea.sflag [#allocation5], %s249_s21  ;;  %s3196_s17 = sshra.s32 %s261_s11, 4  ;;  %s3197_s17 = int_to_ptr.hbm [resolvable:$true] %s3196_s17 }
  0x1d   : > { %s3198_s3 = scalar_lea.hbm %s3197_s17, 4  ;;  %p3200_p9 = pneg %p3434_p8 }
  0x1e   : > { %p3199_p7 = scmp.ne.s32.totalorder %s3197_s17, %s3198_s3  ;;  %s3203_s23 = scalar_lea.hbm %s5767_s0, 8 }
  0x1f   : > { %p3204_p0 = scmp.lt.s32.totalorder %s3197_s17, %s5767_s0  ;;  %p3205_p2 = scmp.lt.s32.totalorder %s3203_s23, %s3198_s3 }
  0x20   : > { %p3201_p10 = pnand %p3200_p9, %p3199_p7 }
  0x21   : > { %p3206_p6 = por %p3205_p2, %p3204_p0 }
  0x22   : > { %p3202_p11 = pneg %p3201_p10 }
  0x24   : > { %p3207_p5 = pnand %p3206_p6, %p3202_p11 }
  0x26   : > { %3210 = shalt.err (!%p3207_p5)
}
  0x27   : > { %3072 = dma.hbm_to_vmem [thread:$0]  (!%p3434_p8), %s261_s11, 64, %s263_s13, %s250_s16  }
  0x28   : > { %271 = sbr.rel (%p3389_p3) target bundleno = 1854 (0x73e), region = 48 }
  0x2d   : > { %s3451_s21 = sand.u32 1, %s3292_s25  }
  0x2e   : > { %s3002_s12 = sshll.u32 %s3451_s21, 2  ;;  %s274_s28 = scalar_lea.sflag [#allocation5], %s3451_s21 }
  0x2f   : > { %s277_s29 = scalar_lea.vmem [#allocation4], %s3002_s12 }
  0x30   : > { %3275 = dma.done.wait (%p3416_p12), %s274_s28, 64  }
  0x31   : > { %3277 = vsyncadd (%p3416_p12), %s274_s28, 4294967232 }
  0x32   : > { %3279 = dma.done.wait (%p45_p1), [#allocation8], 512  }
  0x33   : > { %3281 = vsyncadd (%p45_p1), [#allocation8], 4294966784  ;;  %s3004_s3 = sshll.u32 %s3451_s21, 3  ;;  %v3309_v0 = vmov 0.0   ;;  %vm400_vm0 = vcmask 1041408   ;;  %vm351_vm1 = vcmask 31744  }
  0x34   : > { %1167 = vst [vmem:[#allocation2] sm:$0xff] %v3309_v0  ;;  %v3467_v1 = vld [vmem:[%s5771_s4] sm:$0x1]  ;;  %v3473_v4 = vld [vmem:[%s277_s29] sm:$0xf]  ;;  %vm590_vm2 = vcmask 1041409  }
  0x35   : > { %1168 = vst [vmem:[#allocation2 + $0x8] sm:$0x3] %v3309_v0  ;;  %v316_v2 = vld [vmem:[%s5768_s1] sm:$0x3]  ;;  %vm593_vm3 = vcmask 1042434   ;;  %vm596_vm4 = vcmask 1043459  }
  0x36   : > { %1170 = vst [vmem:[#allocation2 + $0x50] sm:$0xff] %v3309_v0  ;;  %v402_v3 = vsel %vm400_vm0, %v316_v2, 0  ;;  %v3494_v23 = vld [vmem:[%s5769_s2] ss:$0 sm:$0xff]  ;;  %vm599_vm5 = vcmask 1044484   ;;  %vm602_vm6 = vcmask 1045509  }
  0x37   : > { %1171 = vst [vmem:[#allocation2 + $0x58] sm:$0x3] %v3309_v0  ;;  %411 = vmatpush.bf16.msra.mxu0 %v402_v3  ;;  %3056 = vmatpush.bf16.msra.mxu3 %v402_v3  ;;  %vm605_vm7 = vcmask 1046534   ;;  %vm608_vm8 = vcmask 1047559   ;;  %s3310_s17 = smov 112   ;;  %s3311_s23 = smov 16  }
  0x38   : > { %1173 = vst [vmem:[#allocation2 + $0x10] sm:$0x1] %v3309_v0  ;;  %s3312_s30 = smov 32   ;;  %s3313_s10 = smov 48   ;;  %vm1132_vm9 = vcmask 130048   ;;  %vm1137_vm10 = vcmask 261120  }
  0x39   : > { %1174 = vst [vmem:[#allocation2 + $0x20] sm:$0x1] %v3309_v0  ;;  %s3314_s12 = smov 64   ;;  %s3315_s28 = smov 80   ;;  %vm1142_vm11 = vcmask 392192   ;;  %vm1147_vm12 = vcmask 523264  }
  0x3a   : > { %1175 = vst [vmem:[#allocation2 + $0x30] sm:$0x1] %v3309_v0  ;;  %s3316_s29 = smov 96   ;;  %vm1152_vm13 = vcmask 654336   ;;  %vm1157_vm14 = vcmask 785408   ;;  %vm1162_vm15 = vcmask 916480  }
  0x3b   : > { %1176 = vst [vmem:[#allocation2 + $0x40] sm:$0x1] %v3309_v0  ;;  %s4169_s11 = scalar_lea.vmem [#allocation9], %s3004_s3  ;;  %s4171_s13 = smov 0  }
  0x3c   : > { %1177 = vst [vmem:[#allocation2 + $0x19] sm:$0x1] %v3309_v0 }
  0x3d   : > { %1178 = vst [vmem:[#allocation2 + $0x29] sm:$0x1] %v3309_v0 }
  0x3e   : > { %5823 = vst [vmem:[#allocation13_spill] sm:$0xff] %v3473_v4 }
  0x3f   : > { %1179 = vst [vmem:[#allocation2 + $0x39] sm:$0x1] %v3309_v0 }
  0x40   : > { %1180 = vst [vmem:[#allocation2 + $0x49] sm:$0x1] %v3309_v0 }
  0x41   : > { %322 = vst [vmem:[#allocation1] ss:$4 sm:$0xff] %v3473_v4 }
  0x48   : > { %v323_v5 = vld.sshfl [vmem:[#allocation1] sm:$0xff pattern:$0x73625140]  ;;  %v324_v6 = vld.sshfl [vmem:[#allocation1 + $0x8] sm:$0xff pattern:$0x73625140] }
  0x49   : > { %327 = vxpose.binary.xlu0.c.b16.start.end [1/2] (short) %v324_v6, %v323_v5, 128 }
  0xf5   : > { %v335_v7 = vpop.trf.xlu0 }
  0xf6   : > { %3005 = vmatmul.msk.bf16.vlgmr.msra.gmra.mxu0 %vm351_vm1, %v335_v7 }
  0xfd   : > { %v336_v8 = vpop.trf.xlu0 }
 0x105   : > { %v337_v9 = vpop.trf.xlu0 }
 0x106   : > { %3006 = vmatmul.msk.bf16.gmra.mxu0 %vm351_vm1, %v337_v9 }
 0x10d   : > { %v338_v10 = vpop.trf.xlu0 }
 0x115   : > { %v339_v11 = vpop.trf.xlu0 }
 0x116   : > { %3007 = vmatmul.msk.bf16.gmra.mxu0 %vm351_vm1, %v339_v11 }
 0x11d   : > { %v340_v12 = vpop.trf.xlu0 }
 0x125   : > { %v341_v13 = vpop.trf.xlu0 }
 0x126   : > { %3008 = vmatmul.msk.bf16.gmra.mxu0 %vm351_vm1, %v341_v13 }
 0x12d   : > { %v342_v14 = vpop.trf.xlu0 }
 0x135   : > { %v343_v15 = vpop.trf.xlu0 }
 0x136   : > { %3009 = vmatmul.msk.bf16.gmra.mxu0 %vm351_vm1, %v343_v15 }
 0x13d   : > { %v3481_v16 = vpop.trf.xlu0 }
 0x145   : > { %v345_v17 = vpop.trf.xlu0 }
 0x146   : > { %3010 = vmatmul.msk.bf16.gmra.mxu0 %vm351_vm1, %v345_v17 }
 0x14d   : > { %v3484_v18 = vpop.trf.xlu0 }
 0x155   : > { %v347_v19 = vpop.trf.xlu0 }
 0x156   : > { %3011 = vmatmul.msk.bf16.gmra.mxu0 %vm351_vm1, %v347_v19 }
 0x15d   : > { %v3487_v20 = vpop.trf.xlu0 }
 0x165   : > { %v349_v21 = vpop.trf.xlu0 }
 0x166   : > { %3012 = vmatmul.msk.bf16.vlgmr.msra.gmra.mxu3 %vm351_vm1, %v349_v21 }
 0x173   : > { %v413_v22 = vpop.f32.mrf.mxu0 }
 0x174   : > { %v414_v24 = vadd.f32 %v3494_v23, %v413_v22 }
 0x176   : > { %3013 = vmatmul.msk.bf16.gmra.mxu3 %vm351_vm1, %v336_v8  ;;  %v493_v28 = vmax.f32 %v414_v24, 0.0 }
 0x178   : > { %v3500_v30 = vmin.f32 %v493_v28, 6.0 }
 0x17a   : > { %v1064_v62 = vrot.slane %v3500_v30, 7  ;;  %v656_v2 = vrot.slane %v3500_v30, 1 }
 0x17b   : > { %v415_v25 = vpop.f32.mrf.mxu0 }
 0x17c   : > { %v416_v26 = vadd.f32 %v3494_v23, %v415_v25 }
 0x17e   : > { %v494_v27 = vmax.f32 %v416_v26, 0.0 }
 0x180   : > { %v3498_v29 = vmin.f32 %v494_v27, 6.0 }
 0x182   : > { %v589_v32 = vrot.slane %v3498_v29, 7  ;;  %v1065_v60 = vrot.slane %v3498_v29, 6  ;;  %v657_v21 = vsel %vm590_vm2, %v3498_v29, %v656_v2 }
 0x183   : > { %v418_v31 = vpop.f32.mrf.mxu0 }
 0x184   : > { %v419_v33 = vadd.f32 %v3494_v23, %v418_v31  ;;  %v591_v34 = vsel %vm590_vm2, %v589_v32, %v3500_v30  ;;  %v1066_v5 = vsel %vm590_vm2, %v1065_v60, %v1064_v62  ;;  %v725_v32 = vrot.slane %v3498_v29, 1 }
 0x186   : > { %v495_v35 = vmax.f32 %v419_v33, 0.0  ;;  %3014 = vmatmul.msk.bf16.gmra.mxu3 %vm351_vm1, %v338_v10 }
 0x188   : > { %v3507_v36 = vmin.f32 %v495_v35, 6.0  ;;  %v724_v35 = vrot.slane %v3500_v30, 2 }
 0x18a   : > { %v592_v38 = vrot.slane %v3507_v36, 6  ;;  %v1067_v63 = vrot.slane %v3507_v36, 5  ;;  %v658_v7 = vrot.slane %v3507_v36, 7  ;;  %v795_v60 = vrot.slane %v3507_v36, 1 }
 0x18b   : > { %v420_v37 = vpop.f32.mrf.mxu0 }
 0x18c   : > { %v421_v39 = vadd.f32 %v3494_v23, %v420_v37  ;;  %v594_v40 = vsel %vm593_vm3, %v592_v38, %v591_v34  ;;  %v659_v25 = vsel %vm593_vm3, %v658_v7, %v657_v21  ;;  %v863_v21 = vrot.slane %v3507_v36, 2 }
 0x18e   : > { %v496_v41 = vmax.f32 %v421_v39, 0.0 }
 0x190   : > { %v3512_v42 = vmin.f32 %v496_v41, 6.0 }
 0x192   : > { %v595_v44 = vrot.slane %v3512_v42, 5  ;;  %v1069_v0 = vrot.slane %v3512_v42, 4  ;;  %v660_v11 = vrot.slane %v3512_v42, 6 }
 0x193   : > { %v423_v43 = vpop.f32.mrf.mxu0 }
 0x194   : > { %v424_v45 = vadd.f32 %v3494_v23, %v423_v43  ;;  %v597_v46 = vsel %vm596_vm4, %v595_v44, %v594_v40  ;;  %v661_v31 = vsel %vm596_vm4, %v660_v11, %v659_v25  ;;  %v728_v40 = vrot.slane %v3512_v42, 7 }
 0x195   : > { %v865_v25 = vrot.slane %v3512_v42, 1 }
 0x196   : > { %v497_v47 = vmax.f32 %v424_v45, 0.0  ;;  %3015 = vmatmul.msk.bf16.gmra.mxu3 %vm351_vm1, %v340_v12  ;;  %v1068_v12 = vsel %vm593_vm3, %v1067_v63, %v1066_v5  ;;  %v792_v63 = vrot.slane %v3500_v30, 3 }
 0x197   : > { %v1070_v19 = vsel %vm596_vm4, %v1069_v0, %v1068_v12 }
 0x198   : > { %v3518_v48 = vmin.f32 %v497_v47, 6.0  ;;  %v726_v47 = vsel %vm590_vm2, %v725_v32, %v724_v35 }
 0x19a   : > { %v598_v50 = vrot.slane %v3518_v48, 4  ;;  %v1071_v6 = vrot.slane %v3518_v48, 3  ;;  %v730_v44 = vrot.slane %v3518_v48, 6  ;;  %v798_v2 = vrot.slane %v3518_v48, 7 }
 0x19b   : > { %v425_v49 = vpop.f32.mrf.mxu0 }
 0x19c   : > { %v426_v51 = vadd.f32 %v3494_v23, %v425_v49  ;;  %v600_v52 = vsel %vm599_vm5, %v598_v50, %v597_v46  ;;  %v1072_v24 = vsel %vm599_vm5, %v1071_v6, %v1070_v19  ;;  %v727_v50 = vsel %vm593_vm3, %v3507_v36, %v726_v47 }
 0x19e   : > { %v498_v53 = vmax.f32 %v426_v51, 0.0 }
 0x1a0   : > { %v3523_v54 = vmin.f32 %v498_v53, 6.0  ;;  %v729_v53 = vsel %vm596_vm4, %v728_v40, %v727_v50 }
 0x1a2   : > { %v601_v56 = vrot.slane %v3523_v54, 3  ;;  %v1073_v10 = vrot.slane %v3523_v54, 2  ;;  %v664_v22 = vrot.slane %v3523_v54, 4  ;;  %v732_v49 = vrot.slane %v3523_v54, 5 }
 0x1a3   : > { %v428_v55 = vpop.f32.mrf.mxu0  ;;  %v800_v6 = vrot.slane %v3523_v54, 6 }
 0x1a4   : > { %v429_v57 = vadd.f32 %v3494_v23, %v428_v55  ;;  %v603_v58 = vsel %vm602_vm6, %v601_v56, %v600_v52  ;;  %v1074_v28 = vsel %vm602_vm6, %v1073_v10, %v1072_v24  ;;  %v731_v56 = vsel %vm599_vm5, %v730_v44, %v729_v53 }
 0x1a5   : > { %v860_v24 = vrot.slane %v3500_v30, 4 }
 0x1a6   : > { %v499_v59 = vmax.f32 %v429_v57, 0.0  ;;  %3016 = vmatmul.msk.bf16.gmra.mxu3 %vm351_vm1, %v342_v14  ;;  %v662_v14 = vrot.slane %v3518_v48, 5  ;;  %v733_v57 = vsel %vm602_vm6, %v732_v49, %v731_v56  ;;  %v931_v49 = vrot.slane %v3507_v36, 3 }
 0x1a8   : > { %v3530_v61 = vmin.f32 %v499_v59, 6.0  ;;  %v663_v34 = vsel %vm599_vm5, %v662_v14, %v661_v31 }
 0x1a9   : > { %v665_v38 = vsel %vm602_vm6, %v664_v22, %v663_v34  ;;  %v868_v34 = vrot.slane %v3523_v54, 7 }
 0x1aa   : > { %v604_v8 = vrot.slane %v3530_v61, 2  ;;  %v1075_v13 = vrot.slane %v3530_v61, 1  ;;  %v666_v26 = vrot.slane %v3530_v61, 3  ;;  %v734_v51 = vrot.slane %v3530_v61, 4 }
 0x1ab   : > { %v430_v3 = vpop.f32.mrf.mxu0 }
 0x1ac   : > { %v431_v9 = vadd.f32 %v3494_v23, %v430_v3  ;;  %v606_v15 = vsel %vm605_vm7, %v604_v8, %v603_v58  ;;  %v1076_v33 = vsel %vm605_vm7, %v1075_v13, %v1074_v28  ;;  %v667_v43 = vsel %vm605_vm7, %v666_v26, %v665_v38 }
 0x1ad   : > { %v793_v58 = vrot.slane %v3498_v29, 2  ;;  %v735_v59 = vsel %vm605_vm7, %v734_v51, %v733_v57  ;;  %v802_v8 = vrot.slane %v3530_v61, 5  ;;  %v933_v51 = vrot.slane %v3512_v42, 2 }
 0x1ae   : > { %v500_v17 = vmax.f32 %v431_v9, 0.0 }
 0x1af   : > { %v794_v5 = vsel %vm590_vm2, %v793_v58, %v792_v63 }
 0x1b0   : > { %v3554_v27 = vmin.f32 %v500_v17, 6.0  ;;  %v796_v7 = vsel %vm593_vm3, %v795_v60, %v794_v5  ;;  %v861_v17 = vrot.slane %v3498_v29, 3  ;;  %v938_v60 = vrot.slane %v3530_v61, 7 }
 0x1b1   : > { %v797_v10 = vsel %vm596_vm4, %v3512_v42, %v796_v7 }
 0x1b2   : > { %v1077_v37 = vsel %vm608_vm8, %v3554_v27, %v1076_v33  ;;  %v668_v39 = vrot.slane %v3554_v27, 2  ;;  %v607_v45 = vrot.slane %v3554_v27, 1  ;;  %v736_v55 = vrot.slane %v3554_v27, 3 }
 0x1b3   : > { %1120 = vrot.lane.b32.xlu2 %v1077_v37, %s3310_s17  ;;  %v433_v41 = vpop.f32.mrf.mxu0  ;;  %v804_v11 = vrot.slane %v3554_v27, 4  ;;  %v799_v13 = vsel %vm599_vm5, %v798_v2, %v797_v10  ;;  %v862_v33 = vsel %vm590_vm2, %v861_v17, %v860_v24  ;;  %v870_v37 = vrot.slane %v3530_v61, 6 }
 0x1b4   : > { %v669_v46 = vsel %vm608_vm8, %v668_v39, %v667_v43  ;;  %v3579_v52 = vsel %vm608_vm8, %v607_v45, %v606_v15  ;;  %v737_v62 = vsel %vm608_vm8, %v736_v55, %v735_v59  ;;  %v801_v15 = vsel %vm602_vm6, %v800_v6, %v799_v13 }
 0x1b5   : > { %712 = vrot.lane.b32.xlu0 %v669_v46, %s3311_s23  ;;  %v803_v19 = vsel %vm605_vm7, %v802_v8, %v801_v15  ;;  %v864_v35 = vsel %vm593_vm3, %v863_v21, %v862_v33  ;;  %v929_v46 = vrot.slane %v3498_v29, 4  ;;  %v935_v55 = vrot.slane %v3518_v48, 1 }
 0x1b6   : > { %3017 = vmatmul.msk.bf16.gmra.mxu3 %vm351_vm1, %v3481_v16  ;;  %v434_v16 = vadd.f32 %v3494_v23, %v433_v41  ;;  %v805_v22 = vsel %vm608_vm8, %v804_v11, %v803_v19  ;;  %v866_v40 = vsel %vm596_vm4, %v865_v25, %v864_v35  ;;  %v872_v41 = vrot.slane %v3554_v27, 5  ;;  %v350_v35 = vpop.trf.xlu0 }
 0x1b7   : > { %v867_v43 = vsel %vm599_vm5, %v3518_v48, %v866_v40  ;;  %v997_v6 = vrot.slane %v3498_v29, 5  ;;  %v999_v8 = vrot.slane %v3507_v36, 4  ;;  %v996_v10 = vrot.slane %v3500_v30, 6 }
 0x1b8   : > { %v501_v12 = vmax.f32 %v434_v16, 0.0  ;;  %v869_v45 = vsel %vm602_vm6, %v868_v34, %v867_v43  ;;  %v1001_v11 = vrot.slane %v3512_v42, 3  ;;  %v1003_v13 = vrot.slane %v3518_v48, 2 }
 0x1b9   : > { %v871_v47 = vsel %vm605_vm7, %v870_v37, %v869_v45  ;;  %v998_v17 = vsel %vm590_vm2, %v997_v6, %v996_v10  ;;  %v1005_v36 = vrot.slane %v3523_v54, 1  ;;  %v1008_v48 = vrot.slane %v3554_v27, 7 }
 0x1ba   : > { %v3613_v26 = vmin.f32 %v501_v12, 6.0  ;;  %v873_v50 = vsel %vm608_vm8, %v872_v41, %v871_v47  ;;  %v1000_v19 = vsel %vm593_vm3, %v999_v8, %v998_v17 }
 0x1bb   : > { %780 = vrot.lane.b32.xlu2 %v737_v62, %s3312_s30  ;;  %v435_v0 = vpop.f32.mrf.mxu0  ;;  %v1002_v42 = vsel %vm596_vm4, %v1001_v11, %v1000_v19 }
 0x1bc   : > { %v436_v3 = vadd.f32 %v3494_v23, %v435_v0  ;;  %v940_v0 = vrot.slane %v3554_v27, 6  ;;  %v670_v6 = vrot.slane %v3613_v26, 1 }
 0x1be   : > { %v502_v9 = vmax.f32 %v436_v3, 0.0 }
 0x1c0   : > { %v3604_v14 = vmin.f32 %v502_v9, 6.0 }
 0x1c2   : > { %v610_v31 = vrot.slane %v3604_v14, 7  ;;  %v1079_v43 = vrot.slane %v3604_v14, 6  ;;  %v671_v11 = vsel %vm590_vm2, %v3604_v14, %v670_v6 }
 0x1c3   : > { %848 = vrot.lane.b32.xlu2 %v805_v22, %s3313_s10  ;;  %v438_v28 = vpop.f32.mrf.mxu0  ;;  %v1004_v22 = vsel %vm599_vm5, %v1003_v13, %v1002_v42  ;;  %v739_v42 = vrot.slane %v3604_v14, 1 }
 0x1c4   : > { %v439_v32 = vadd.f32 %v3494_v23, %v438_v28  ;;  %v611_v38 = vsel %vm590_vm2, %v610_v31, %v3613_v26  ;;  %v1006_v25 = vsel %vm602_vm6, %v1005_v36, %v1004_v22 }
 0x1c6   : > { %v503_v39 = vmax.f32 %v439_v32, 0.0  ;;  %3018 = vmatmul.msk.bf16.gmra.mxu3 %vm351_vm1, %v3484_v18  ;;  %v928_v18 = vrot.slane %v3500_v30, 5 }
 0x1c8   : > { %v3630_v44 = vmin.f32 %v503_v39, 6.0  ;;  %v930_v58 = vsel %vm590_vm2, %v929_v46, %v928_v18  ;;  %v1078_v46 = vrot.slane %v3613_v26, 7 }
 0x1c9   : > { %v932_v59 = vsel %vm593_vm3, %v931_v49, %v930_v58 }
 0x1ca   : > { %v612_v56 = vrot.slane %v3630_v44, 6  ;;  %v934_v16 = vsel %vm596_vm4, %v933_v51, %v932_v59  ;;  %v1081_v45 = vrot.slane %v3630_v44, 5 }
 0x1cb   : > { %916 = vrot.lane.b32.xlu2 %v873_v50, %s3314_s12  ;;  %v440_v53 = vpop.f32.mrf.mxu0  ;;  %v936_v2 = vsel %vm599_vm5, %v935_v55, %v934_v16 }
 0x1cc   : > { %v441_v57 = vadd.f32 %v3494_v23, %v440_v53  ;;  %v613_v62 = vsel %vm593_vm3, %v612_v56, %v611_v38  ;;  %v937_v5 = vsel %vm602_vm6, %v3523_v54, %v936_v2  ;;  %v1007_v54 = vsel %vm605_vm7, %v3530_v61, %v1006_v25 }
 0x1cd   : > { %v939_v7 = vsel %vm605_vm7, %v938_v60, %v937_v5  ;;  %v1009_v28 = vsel %vm608_vm8, %v1008_v48, %v1007_v54  ;;  %v1080_v53 = vsel %vm590_vm2, %v1079_v43, %v1078_v46  ;;  %v672_v2 = vrot.slane %v3630_v44, 7 }
 0x1ce   : > { %v504_v63 = vmax.f32 %v441_v57, 0.0  ;;  %v941_v9 = vsel %vm608_vm8, %v940_v0, %v939_v7  ;;  %v1082_v56 = vsel %vm593_vm3, %v1081_v45, %v1080_v53  ;;  %v738_v25 = vrot.slane %v3613_v26, 2 }
 0x1cf   : > { %v673_v13 = vsel %vm593_vm3, %v672_v2, %v671_v11  ;;  %v807_v43 = vrot.slane %v3604_v14, 2 }
 0x1d0   : > { %v3650_v3 = vmin.f32 %v504_v63, 6.0 }
 0x1d2   : > { %v614_v15 = vrot.slane %v3650_v3, 5  ;;  %v1083_v47 = vrot.slane %v3650_v3, 4  ;;  %v674_v7 = vrot.slane %v3650_v3, 6  ;;  %v742_v54 = vrot.slane %v3650_v3, 7 }
 0x1d3   : > { %984 = vrot.lane.b32.xlu2 %v941_v9, %s3315_s28  ;;  %v443_v12 = vpop.f32.mrf.mxu0 }
 0x1d4   : > { %v444_v29 = vadd.f32 %v3494_v23, %v443_v12  ;;  %v615_v30 = vsel %vm596_vm4, %v614_v15, %v613_v62  ;;  %v1084_v60 = vsel %vm596_vm4, %v1083_v47, %v1082_v56  ;;  %v675_v17 = vsel %vm596_vm4, %v674_v7, %v673_v13 }
 0x1d5   : > { %v875_v13 = vrot.slane %v3604_v14, 3 }
 0x1d6   : > { %v505_v21 = vmax.f32 %v444_v29, 0.0  ;;  %3019 = vmatmul.msk.bf16.gmra.mxu3 %vm351_vm1, %v3487_v20 }
 0x1d8   : > { %v3673_v24 = vmin.f32 %v505_v21, 6.0 }
 0x1da   : > { %v616_v20 = vrot.slane %v3673_v24, 4  ;;  %v1085_v50 = vrot.slane %v3673_v24, 3  ;;  %v676_v9 = vrot.slane %v3673_v24, 5  ;;  %v812_v56 = vrot.slane %v3673_v24, 7 }
 0x1db   : > { %1052 = vrot.lane.b32.xlu2 %v1009_v28, %s3316_s29  ;;  %v445_v31 = vpop.f32.mrf.mxu0 }
 0x1dc   : > { %v446_v32 = vadd.f32 %v3494_v23, %v445_v31  ;;  %v617_v27 = vsel %vm599_vm5, %v616_v20, %v615_v30  ;;  %v1086_v62 = vsel %vm599_vm5, %v1085_v50, %v1084_v60  ;;  %v677_v19 = vsel %vm599_vm5, %v676_v9, %v675_v17 }
 0x1dd   : > { %v744_v31 = vrot.slane %v3673_v24, 6  ;;  %v877_v17 = vrot.slane %v3630_v44, 2 }
 0x1de   : > { %v506_v33 = vmax.f32 %v446_v32, 0.0 }
 0x1e0   : > { %v3683_v34 = vmin.f32 %v506_v33, 6.0 }
 0x1e2   : > { %v618_v37 = vrot.slane %v3683_v34, 3  ;;  %v1087_v55 = vrot.slane %v3683_v34, 2  ;;  %v678_v12 = vrot.slane %v3683_v34, 4  ;;  %v746_v33 = vrot.slane %v3683_v34, 5 }
 0x1e4   : > { %v619_v61 = vsel %vm602_vm6, %v618_v37, %v617_v27  ;;  %v1088_v16 = vsel %vm602_vm6, %v1087_v55, %v1086_v62  ;;  %v679_v21 = vsel %vm602_vm6, %v678_v12, %v677_v19  ;;  %v740_v27 = vsel %vm590_vm2, %v739_v42, %v738_v25 }
 0x1e5   : > { %v814_v62 = vrot.slane %v3683_v34, 6  ;;  %v874_v19 = vrot.slane %v3613_v26, 4 }
 0x1e6   : > { %3020 = vmatmul.msk.bf16.gmra.mxu3 %vm351_vm1, %v350_v35  ;;  %v741_v35 = vsel %vm593_vm3, %v3630_v44, %v740_v27 }
 0x1e7   : > { %v876_v25 = vsel %vm590_vm2, %v875_v13, %v874_v19  ;;  %v1015_v19 = vrot.slane %v3650_v3, 3 }
 0x1e9   : > { %v448_v38 = vpop.f32.mrf.mxu3 }
 0x1ea   : > { %v449_v39 = vadd.f32 %v3494_v23, %v448_v38  ;;  %v743_v38 = vsel %vm596_vm4, %v742_v54, %v741_v35  ;;  %v882_v54 = vrot.slane %v3683_v34, 7 }
 0x1ec   : > { %v507_v40 = vmax.f32 %v449_v39, 0.0 }
 0x1ee   : > { %v3689_v41 = vmin.f32 %v507_v40, 6.0  ;;  %v745_v40 = vsel %vm599_vm5, %v744_v31, %v743_v38 }
 0x1ef   : > { %v747_v47 = vsel %vm602_vm6, %v746_v33, %v745_v40  ;;  %v943_v40 = vrot.slane %v3604_v14, 4 }
 0x1f0   : > { %v620_v18 = vrot.slane %v3689_v41, 2  ;;  %v1089_v57 = vrot.slane %v3689_v41, 1  ;;  %v680_v15 = vrot.slane %v3689_v41, 3  ;;  %v748_v37 = vrot.slane %v3689_v41, 4 }
 0x1f1   : > { %v450_v49 = vpop.f32.mrf.mxu3  ;;  %v816_v2 = vrot.slane %v3689_v41, 5  ;;  %v884_v31 = vrot.slane %v3689_v41, 6 }
 0x1f2   : > { %v451_v51 = vadd.f32 %v3494_v23, %v450_v49  ;;  %v621_v58 = vsel %vm605_vm7, %v620_v18, %v619_v61  ;;  %v1090_v0 = vsel %vm605_vm7, %v1089_v57, %v1088_v16  ;;  %v681_v48 = vsel %vm605_vm7, %v680_v15, %v679_v21 }
 0x1f3   : > { %v809_v49 = vrot.slane %v3630_v44, 1  ;;  %v749_v50 = vsel %vm605_vm7, %v748_v37, %v747_v47  ;;  %v806_v18 = vrot.slane %v3613_v26, 3  ;;  %v945_v47 = vrot.slane %v3630_v44, 3 }
 0x1f4   : > { %v508_v59 = vmax.f32 %v451_v51, 0.0 }
 0x1f5   : > { %v808_v55 = vsel %vm590_vm2, %v807_v43, %v806_v18  ;;  %v947_v18 = vrot.slane %v3650_v3, 2 }
 0x1f6   : > { %v3705_v63 = vmin.f32 %v508_v59, 6.0  ;;  %v810_v60 = vsel %vm593_vm3, %v809_v49, %v808_v55 }
 0x1f8   : > { %v1091_v5 = vsel %vm608_vm8, %v3705_v63, %v1090_v0  ;;  %v622_v10 = vrot.slane %v3705_v63, 1  ;;  %v682_v36 = vrot.slane %v3705_v63, 2  ;;  %v750_v39 = vrot.slane %v3705_v63, 3 }
 0x1f9   : > { %v453_v8 = vpop.f32.mrf.mxu3  ;;  %1122 = vrot.lane.b32.xlu1 %v1091_v5, %s3310_s17  ;;  %v811_v0 = vsel %vm596_vm4, %v3650_v3, %v810_v60  ;;  %v818_v6 = vrot.slane %v3705_v63, 4  ;;  %v886_v35 = vrot.slane %v3705_v63, 5  ;;  %v952_v60 = vrot.slane %v3689_v41, 7 }
 0x1fa   : > { %v3723_v29 = vsel %vm608_vm8, %v622_v10, %v621_v58  ;;  %v454_v30 = vadd.f32 %v3494_v23, %v453_v8  ;;  %v683_v22 = vsel %vm608_vm8, %v682_v36, %v681_v48  ;;  %v751_v51 = vsel %vm608_vm8, %v750_v39, %v749_v50 }
 0x1fb   : > { %v813_v10 = vsel %vm599_vm5, %v812_v56, %v811_v0  ;;  %v942_v50 = vrot.slane %v3613_v26, 5 }
 0x1fc   : > { %v509_v20 = vmax.f32 %v454_v30, 0.0  ;;  %v815_v12 = vsel %vm602_vm6, %v814_v62, %v813_v10  ;;  %v879_v30 = vrot.slane %v3650_v3, 1 }
 0x1fd   : > { %v817_v15 = vsel %vm605_vm7, %v816_v2, %v815_v12  ;;  %v1011_v12 = vrot.slane %v3604_v14, 5 }
 0x1fe   : > { %v3747_v45 = vmin.f32 %v509_v20, 6.0  ;;  %v819_v36 = vsel %vm608_vm8, %v818_v6, %v817_v15  ;;  %v1013_v15 = vrot.slane %v3630_v44, 4  ;;  %v1019_v44 = vrot.slane %v3683_v34, 1 }
 0x200   : > { %v1092_v16 = vrot.slane %v3747_v45, 7 }
 0x201   : > { %v455_v28 = vpop.f32.mrf.mxu3  ;;  %714 = vrot.lane.b32.xlu1 %v683_v22, %s3311_s23 }
 0x202   : > { %v456_v32 = vadd.f32 %v3494_v23, %v455_v28  ;;  %v878_v28 = vsel %vm593_vm3, %v877_v17, %v876_v25 }
 0x203   : > { %v880_v33 = vsel %vm596_vm4, %v879_v30, %v878_v28 }
 0x204   : > { %v510_v61 = vmax.f32 %v456_v32, 0.0 }
 0x206   : > { %v3749_v46 = vmin.f32 %v510_v61, 6.0  ;;  %v881_v61 = vsel %vm599_vm5, %v3673_v24, %v880_v33 }
 0x207   : > { %v883_v39 = vsel %vm602_vm6, %v882_v54, %v881_v61 }
 0x208   : > { %v1093_v57 = vrot.slane %v3749_v46, 6  ;;  %v624_v58 = vrot.slane %v3749_v46, 7  ;;  %v885_v43 = vsel %vm605_vm7, %v884_v31, %v883_v39 }
 0x209   : > { %v458_v53 = vpop.f32.mrf.mxu3  ;;  %782 = vrot.lane.b32.xlu1 %v751_v51, %s3312_s30  ;;  %v887_v49 = vsel %vm608_vm8, %v886_v35, %v885_v43 }
 0x20a   : > { %v459_v59 = vadd.f32 %v3494_v23, %v458_v53  ;;  %v1094_v7 = vsel %vm590_vm2, %v1093_v57, %v1092_v16  ;;  %v625_v8 = vsel %vm590_vm2, %v624_v58, %v3747_v45  ;;  %v949_v53 = vrot.slane %v3673_v24, 1 }
 0x20b   : > { %v944_v58 = vsel %vm590_vm2, %v943_v40, %v942_v50  ;;  %v753_v40 = vrot.slane %v3749_v46, 1  ;;  %v752_v50 = vrot.slane %v3747_v45, 2 }
 0x20c   : > { %v511_v5 = vmax.f32 %v459_v59, 0.0  ;;  %v946_v59 = vsel %vm593_vm3, %v945_v47, %v944_v58  ;;  %v821_v58 = vrot.slane %v3749_v46, 2 }
 0x20d   : > { %v3772_v9 = vpop.permute.xlu2 %1120  ;;  %v948_v2 = vsel %vm596_vm4, %v947_v18, %v946_v59  ;;  %v684_v18 = vrot.slane %v3747_v45, 1 }
 0x20e   : > { %v3775_v11 = vmin.f32 %v511_v5, 6.0  ;;  %v954_v5 = vrot.slane %v3705_v63, 6 }
 0x210   : > { %v1095_v42 = vrot.slane %v3775_v11, 5  ;;  %v626_v48 = vrot.slane %v3775_v11, 6 }
 0x211   : > { %v460_v21 = vpop.f32.mrf.mxu3  ;;  %850 = vrot.lane.b32.xlu1 %v819_v36, %s3313_s10  ;;  %v1010_v36 = vrot.slane %v3613_v26, 6 }
 0x212   : > { %v461_v22 = vadd.f32 %v3494_v23, %v460_v21  ;;  %v1096_v20 = vsel %vm593_vm3, %v1095_v42, %v1094_v7  ;;  %v627_v32 = vsel %vm593_vm3, %v626_v48, %v625_v8  ;;  %v950_v7 = vsel %vm599_vm5, %v949_v53, %v948_v2 }
 0x213   : > { %v951_v10 = vsel %vm602_vm6, %v3683_v34, %v950_v7  ;;  %v1017_v21 = vrot.slane %v3673_v24, 2  ;;  %v1022_v24 = vrot.slane %v3705_v63, 7 }
 0x214   : > { %v512_v27 = vmax.f32 %v461_v22, 0.0  ;;  %v953_v13 = vsel %vm605_vm7, %v952_v60, %v951_v10  ;;  %v1012_v22 = vsel %vm590_vm2, %v1011_v12, %v1010_v36 }
 0x215   : > { %v3796_v37 = vpop.permute.xlu2 %780  ;;  %v955_v17 = vsel %vm608_vm8, %v954_v5, %v953_v13  ;;  %v1014_v25 = vsel %vm593_vm3, %v1013_v15, %v1012_v22 }
 0x216   : > { %v3800_v38 = vmin.f32 %v512_v27, 6.0  ;;  %v1016_v28 = vsel %vm596_vm4, %v1015_v19, %v1014_v25 }
 0x218   : > { %v1097_v55 = vrot.slane %v3800_v38, 4  ;;  %v628_v56 = vrot.slane %v3800_v38, 5  ;;  %v756_v5 = vrot.slane %v3800_v38, 7  ;;  %v688_v7 = vrot.slane %v3800_v38, 6 }
 0x219   : > { %v463_v51 = vpop.f32.mrf.mxu3  ;;  %918 = vrot.lane.b32.xlu1 %v887_v49, %s3314_s12 }
 0x21a   : > { %v464_v57 = vadd.f32 %v3494_v23, %v463_v51  ;;  %v1098_v62 = vsel %vm596_vm4, %v1097_v55, %v1096_v20  ;;  %v629_v16 = vsel %vm596_vm4, %v628_v56, %v627_v32  ;;  %v1018_v20 = vsel %vm599_vm5, %v1017_v21, %v1016_v28 }
 0x21b   : > { %v1020_v32 = vsel %vm602_vm6, %v1019_v44, %v1018_v20  ;;  %v754_v56 = vsel %vm590_vm2, %v753_v40, %v752_v50 }
 0x21c   : > { %v513_v0 = vmax.f32 %v464_v57, 0.0  ;;  %v1021_v27 = vsel %vm605_vm7, %v3689_v41, %v1020_v32  ;;  %v685_v57 = vsel %vm590_vm2, %v3749_v46, %v684_v18  ;;  %v755_v59 = vsel %vm593_vm3, %v3775_v11, %v754_v56 }
 0x21d   : > { %v849_v6 = vpop.permute.xlu2 %848  ;;  %v1023_v35 = vsel %vm608_vm8, %v1022_v24, %v1021_v27  ;;  %v757_v25 = vsel %vm596_vm4, %v756_v5, %v755_v59  ;;  %v823_v24 = vrot.slane %v3775_v11, 1  ;;  %v893_v5 = vrot.slane %v3800_v38, 1 }
 0x21e   : > { %v3822_v8 = vmin.f32 %v513_v0, 6.0 }
 0x220   : > { %v1099_v42 = vrot.slane %v3822_v8, 3  ;;  %v630_v48 = vrot.slane %v3822_v8, 4  ;;  %v758_v10 = vrot.slane %v3822_v8, 6  ;;  %v690_v12 = vrot.slane %v3822_v8, 5 }
 0x221   : > { %v465_v30 = vpop.f32.mrf.mxu3  ;;  %986 = vrot.lane.b32.xlu1 %v955_v17, %s3315_s28 }
 0x222   : > { %v466_v14 = vadd.f32 %v3494_v23, %v465_v30  ;;  %v1100_v26 = vsel %vm599_vm5, %v1099_v42, %v1098_v62  ;;  %v631_v3 = vsel %vm599_vm5, %v630_v48, %v629_v16 }
 0x224   : > { %v514_v54 = vmax.f32 %v466_v14, 0.0 }
 0x225   : > { %v917_v31 = vpop.permute.xlu2 %916 }
 0x226   : > { %v3848_v34 = vmin.f32 %v514_v54, 6.0  ;;  %v759_v54 = vsel %vm599_vm5, %v758_v10, %v757_v25  ;;  %v959_v25 = vrot.slane %v3775_v11, 3 }
 0x227   : > { %v713_v33 = vpop.permute.xlu0 %712 }
 0x228   : > { %v1133_v63 = vsel %vm1132_vm9, %v3579_v52, %v713_v33  ;;  %v1101_v41 = vrot.slane %v3848_v34, 2  ;;  %v632_v47 = vrot.slane %v3848_v34, 3  ;;  %v760_v36 = vrot.slane %v3848_v34, 5 }
 0x229   : > { %v468_v61 = vpop.f32.mrf.mxu3  ;;  %1054 = vrot.lane.b32.xlu1 %v1023_v35, %s3316_s29  ;;  %v1138_v51 = vsel %vm1137_vm10, %v1133_v63, %v3796_v37  ;;  %v686_v37 = vrot.slane %v3775_v11, 7  ;;  %v692_v19 = vrot.slane %v3848_v34, 4 }
 0x22a   : > { %v469_v39 = vadd.f32 %v3494_v23, %v468_v61  ;;  %v1102_v52 = vsel %vm602_vm6, %v1101_v41, %v1100_v26  ;;  %v633_v55 = vsel %vm602_vm6, %v632_v47, %v631_v3  ;;  %v1143_v60 = vsel %vm1142_vm11, %v1138_v51, %v849_v6 }
 0x22b   : > { %v1148_v15 = vsel %vm1147_vm12, %v1143_v60, %v917_v31  ;;  %v687_v48 = vsel %vm593_vm3, %v686_v37, %v685_v57  ;;  %v761_v31 = vsel %vm602_vm6, %v760_v36, %v759_v54  ;;  %v826_v41 = vrot.slane %v3822_v8, 7 }
 0x22c   : > { %v515_v43 = vmax.f32 %v469_v39, 0.0  ;;  %v689_v26 = vsel %vm596_vm4, %v688_v7, %v687_v48 }
 0x22d   : > { %v985_v49 = vpop.permute.xlu2 %984  ;;  %v691_v28 = vsel %vm599_vm5, %v690_v12, %v689_v26  ;;  %v896_v12 = vrot.slane %v3848_v34, 7 }
 0x22e   : > { %v3862_v53 = vmin.f32 %v515_v43, 6.0  ;;  %v1153_v30 = vsel %vm1152_vm13, %v1148_v15, %v985_v49  ;;  %v693_v32 = vsel %vm602_vm6, %v692_v19, %v691_v28  ;;  %v820_v43 = vrot.slane %v3747_v45, 3 }
 0x22f   : > { %v828_v49 = vrot.slane %v3848_v34, 6  ;;  %v956_v28 = vrot.slane %v3747_v45, 5 }
 0x230   : > { %v1103_v16 = vrot.slane %v3862_v53, 1  ;;  %v634_v0 = vrot.slane %v3862_v53, 2  ;;  %v762_v42 = vrot.slane %v3862_v53, 4  ;;  %v694_v14 = vrot.slane %v3862_v53, 3 }
 0x231   : > { %v470_v62 = vpop.f32.mrf.mxu3  ;;  %v822_v47 = vsel %vm590_vm2, %v821_v58, %v820_v43  ;;  %v830_v51 = vrot.slane %v3862_v53, 5  ;;  %v889_v58 = vrot.slane %v3749_v46, 3  ;;  %v898_v15 = vrot.slane %v3862_v53, 6 }
 0x232   : > { %v471_v2 = vadd.f32 %v3494_v23, %v470_v62  ;;  %v1104_v13 = vsel %vm605_vm7, %v1103_v16, %v1102_v52  ;;  %v635_v6 = vsel %vm605_vm7, %v634_v0, %v633_v55  ;;  %v763_v35 = vsel %vm605_vm7, %v762_v42, %v761_v31 }
 0x233   : > { %v824_v18 = vsel %vm593_vm3, %v823_v24, %v822_v47  ;;  %v891_v62 = vrot.slane %v3775_v11, 2  ;;  %v957_v42 = vrot.slane %v3749_v46, 4  ;;  %v961_v24 = vrot.slane %v3800_v38, 2 }
 0x234   : > { %v516_v17 = vmax.f32 %v471_v2, 0.0  ;;  %v825_v52 = vsel %vm596_vm4, %v3800_v38, %v824_v18  ;;  %v888_v2 = vrot.slane %v3747_v45, 4  ;;  %v963_v31 = vrot.slane %v3822_v8, 1 }
 0x235   : > { %v1053_v21 = vpop.permute.xlu2 %1052  ;;  %v827_v56 = vsel %vm599_vm5, %v826_v41, %v825_v52  ;;  %v1025_v41 = vrot.slane %v3749_v46, 5  ;;  %v1027_v18 = vrot.slane %v3775_v11, 4  ;;  %v1033_v11 = vrot.slane %v3848_v34, 1 }
 0x236   : > { %v3890_v22 = vmin.f32 %v516_v17, 6.0  ;;  %v1158_v44 = vsel %vm1157_vm14, %v1153_v30, %v1053_v21  ;;  %v829_v57 = vsel %vm602_vm6, %v828_v49, %v827_v56  ;;  %v890_v10 = vsel %vm590_vm2, %v889_v58, %v888_v2 }
 0x237   : > { %v1163_v3 = vsel %vm1162_vm15, %v1158_v44, %v3772_v9  ;;  %v695_v9 = vsel %vm605_vm7, %v694_v14, %v693_v32  ;;  %v831_v60 = vsel %vm605_vm7, %v830_v51, %v829_v57  ;;  %v1024_v56 = vrot.slane %v3747_v45, 6 }
 0x238   : > { %1181 = vst [vmem:[#allocation2 + $0x11] sm:$0xff] %v1163_v3  ;;  %v764_v20 = vrot.slane %v3890_v22, 3  ;;  %v696_v27 = vrot.slane %v3890_v22, 2  ;;  %v3908_v61 = vsel %vm608_vm8, %v3890_v22, %v1104_v13  ;;  %v636_v39 = vrot.slane %v3890_v22, 1 }
 0x239   : > { %v473_v33 = vpop.f32.mrf.mxu3  ;;  %v832_v55 = vrot.slane %v3890_v22, 4  ;;  %v900_v19 = vrot.slane %v3890_v22, 5  ;;  %v1029_v57 = vrot.slane %v3800_v38, 3  ;;  %v1031_v58 = vrot.slane %v3822_v8, 2 }
 0x23a   : > { %v765_v63 = vsel %vm608_vm8, %v764_v20, %v763_v35  ;;  %v697_v40 = vsel %vm608_vm8, %v696_v27, %v695_v9  ;;  %v3920_v50 = vsel %vm608_vm8, %v636_v39, %v635_v6  ;;  %v474_v59 = vadd.f32 %v3494_v23, %v473_v33 }
 0x23b   : > { %784 = vrot.lane.b32.xlu2 %v765_v63, %s3312_s30  ;;  %716 = vrot.lane.b32.xlu1 %v697_v40, %s3311_s23  ;;  %v833_v0 = vsel %vm608_vm8, %v832_v55, %v831_v60  ;;  %v892_v6 = vsel %vm593_vm3, %v891_v62, %v890_v10  ;;  %v958_v27 = vsel %vm590_vm2, %v957_v42, %v956_v28  ;;  %v966_v35 = vrot.slane %v3862_v53, 7 }
 0x23c   : > { %v517_v13 = vmax.f32 %v474_v59, 0.0  ;;  %v894_v36 = vsel %vm596_vm4, %v893_v5, %v892_v6  ;;  %v960_v33 = vsel %vm593_vm3, %v959_v25, %v958_v27  ;;  %v968_v63 = vrot.slane %v3890_v22, 6 }
 0x23d   : > { %v895_v30 = vsel %vm599_vm5, %v3822_v8, %v894_v36  ;;  %v962_v39 = vsel %vm596_vm4, %v961_v24, %v960_v33  ;;  %v1036_v45 = vrot.slane %v3890_v22, 7 }
 0x23e   : > { %v897_v21 = vsel %vm602_vm6, %v896_v12, %v895_v30  ;;  %v3950_v48 = vmin.f32 %v517_v13, 6.0  ;;  %v964_v40 = vsel %vm599_vm5, %v963_v31, %v962_v39 }
 0x23f   : > { %v899_v44 = vsel %vm605_vm7, %v898_v15, %v897_v21  ;;  %v965_v43 = vsel %vm602_vm6, %v3848_v34, %v964_v40  ;;  %v3136_v34 = vld [vmem:[%s5769_s2] ss:$0 sm:$0xff] }
 0x240   : > { %v901_v54 = vsel %vm608_vm8, %v900_v19, %v899_v44  ;;  %v967_v49 = vsel %vm605_vm7, %v966_v35, %v965_v43  ;;  %v698_v28 = vrot.slane %v3950_v48, 1 }
 0x241   : > { %v475_v37 = vpop.f32.mrf.mxu3  ;;  %v969_v55 = vsel %vm608_vm8, %v968_v63, %v967_v49 }
 0x242   : > { %v476_v16 = vadd.f32 %v3494_v23, %v475_v37  ;;  %v1026_v37 = vsel %vm590_vm2, %v1025_v41, %v1024_v56 }
 0x243   : > { %852 = vrot.lane.b32.xlu2 %v833_v0, %s3313_s10  ;;  %v1028_v60 = vsel %vm593_vm3, %v1027_v18, %v1026_v37 }
 0x244   : > { %v518_v7 = vmax.f32 %v476_v16, 0.0  ;;  %v1030_v62 = vsel %vm596_vm4, %v1029_v57, %v1028_v60 }
 0x245   : > { %v1032_v38 = vsel %vm599_vm5, %v1031_v58, %v1030_v62 }
 0x246   : > { %v3942_v17 = vmin.f32 %v518_v7, 6.0  ;;  %v1034_v16 = vsel %vm602_vm6, %v1033_v11, %v1032_v38 }
 0x247   : > { %v1035_v0 = vsel %vm605_vm7, %v3862_v53, %v1034_v16 }
 0x248   : > { %v638_v26 = vrot.slane %v3942_v17, 7  ;;  %v1037_v7 = vsel %vm608_vm8, %v1036_v45, %v1035_v0  ;;  %v699_v63 = vsel %vm590_vm2, %v3942_v17, %v698_v28  ;;  %v835_v11 = vrot.slane %v3942_v17, 2 }
 0x249   : > { %v478_v14 = vpop.f32.mrf.mxu3 }
 0x24a   : > { %v479_v3 = vadd.f32 %v3494_v23, %v478_v14  ;;  %v639_v20 = vsel %vm590_vm2, %v638_v26, %v3950_v48 }
 0x24b   : > { %920 = vrot.lane.b32.xlu2 %v901_v54, %s3314_s12 }
 0x24c   : > { %v519_v32 = vmax.f32 %v479_v3, 0.0  ;;  %v767_v3 = vrot.slane %v3942_v17, 1 }
 0x24e   : > { %v3966_v9 = vmin.f32 %v519_v32, 6.0  ;;  %v766_v32 = vrot.slane %v3950_v48, 2 }
 0x250   : > { %v640_v51 = vrot.slane %v3966_v9, 6  ;;  %v700_v24 = vrot.slane %v3966_v9, 7  ;;  %v837_v0 = vrot.slane %v3966_v9, 1 }
 0x251   : > { %v480_v47 = vpop.f32.mrf.mxu3 }
 0x252   : > { %v481_v52 = vadd.f32 %v3494_v23, %v480_v47  ;;  %v641_v46 = vsel %vm593_vm3, %v640_v51, %v639_v20  ;;  %v768_v47 = vsel %vm590_vm2, %v767_v3, %v766_v32 }
 0x253   : > { %988 = vrot.lane.b32.xlu2 %v969_v55, %s3315_s28  ;;  %v769_v51 = vsel %vm593_vm3, %v3966_v9, %v768_v47  ;;  %v701_v55 = vsel %vm593_vm3, %v700_v24, %v699_v63  ;;  %v902_v24 = vrot.slane %v3950_v48, 4  ;;  %v971_v47 = vrot.slane %v3942_v17, 4 }
 0x254   : > { %v520_v59 = vmax.f32 %v481_v52, 0.0 }
 0x256   : > { %v3987_v23 = vmin.f32 %v520_v59, 6.0 }
 0x258   : > { %v642_v2 = vrot.slane %v3987_v23, 5  ;;  %v770_v27 = vrot.slane %v3987_v23, 7  ;;  %v702_v33 = vrot.slane %v3987_v23, 6 }
 0x259   : > { %v483_v8 = vpop.f32.mrf.mxu3 }
 0x25a   : > { %v484_v5 = vadd.f32 %v3136_v34, %v483_v8  ;;  %v643_v22 = vsel %vm596_vm4, %v642_v2, %v641_v46  ;;  %v771_v58 = vsel %vm596_vm4, %v770_v27, %v769_v51  ;;  %v703_v46 = vsel %vm596_vm4, %v702_v33, %v701_v55 }
 0x25b   : > { %1056 = vrot.lane.b32.xlu2 %v1037_v7, %s3316_s29  ;;  %v834_v7 = vrot.slane %v3950_v48, 3  ;;  %v970_v51 = vrot.slane %v3950_v48, 5 }
 0x25c   : > { %v521_v10 = vmax.f32 %v484_v5, 0.0 }
 0x25e   : > { %v4002_v12 = vmin.f32 %v521_v10, 6.0 }
 0x260   : > { %v644_v6 = vrot.slane %v4002_v12, 4  ;;  %v772_v39 = vrot.slane %v4002_v12, 6  ;;  %v704_v40 = vrot.slane %v4002_v12, 5  ;;  %v840_v10 = vrot.slane %v4002_v12, 7 }
 0x261   : > { %v485_v13 = vpop.f32.mrf.mxu3 }
 0x262   : > { %v486_v53 = vadd.f32 %v3136_v34, %v485_v13  ;;  %v645_v15 = vsel %vm599_vm5, %v644_v6, %v643_v22  ;;  %v773_v59 = vsel %vm599_vm5, %v772_v39, %v771_v58  ;;  %v705_v37 = vsel %vm599_vm5, %v704_v40, %v703_v46 }
 0x263   : > { %v836_v6 = vsel %vm590_vm2, %v835_v11, %v834_v7  ;;  %v972_v58 = vsel %vm590_vm2, %v971_v47, %v970_v51 }
 0x264   : > { %v522_v36 = vmax.f32 %v486_v53, 0.0 }
 0x266   : > { %v4006_v19 = vmin.f32 %v522_v36, 6.0 }
 0x268   : > { %v646_v21 = vrot.slane %v4006_v19, 3  ;;  %v774_v49 = vrot.slane %v4006_v19, 5  ;;  %v706_v18 = vrot.slane %v4006_v19, 4  ;;  %v842_v53 = vrot.slane %v4006_v19, 6 }
 0x269   : > { %v488_v30 = vpop.f32.mrf.mxu3  ;;  %v910_v27 = vrot.slane %v4006_v19, 7 }
 0x26a   : > { %v489_v42 = vadd.f32 %v3136_v34, %v488_v30  ;;  %v647_v44 = vsel %vm602_vm6, %v646_v21, %v645_v15  ;;  %v775_v60 = vsel %vm602_vm6, %v774_v49, %v773_v59  ;;  %v707_v45 = vsel %vm602_vm6, %v706_v18, %v705_v37 }
 0x26b   : > { %v4009_v14 = vpop.permute.xlu1 %1122  ;;  %v838_v15 = vsel %vm593_vm3, %v837_v0, %v836_v6  ;;  %v973_v49 = vrot.slane %v3966_v9, 3  ;;  %v1038_v0 = vrot.slane %v3950_v48, 6 }
 0x26c   : > { %v523_v25 = vmax.f32 %v489_v42, 0.0  ;;  %v839_v30 = vsel %vm596_vm4, %v3987_v23, %v838_v15 }
 0x26d   : > { %v841_v42 = vsel %vm599_vm5, %v840_v10, %v839_v30  ;;  %v974_v46 = vsel %vm593_vm3, %v973_v49, %v972_v58  ;;  %v1047_v10 = vrot.slane %v4006_v19, 1 }
 0x26e   : > { %v4012_v26 = vmin.f32 %v523_v25, 6.0  ;;  %v903_v25 = vrot.slane %v3942_v17, 3 }
 0x270   : > { %v648_v31 = vrot.slane %v4012_v26, 2  ;;  %v776_v52 = vrot.slane %v4012_v26, 4  ;;  %v708_v56 = vrot.slane %v4012_v26, 3  ;;  %v844_v36 = vrot.slane %v4012_v26, 5 }
 0x271   : > { %v490_v54 = vpop.f32.mrf.mxu3  ;;  %v904_v32 = vsel %vm590_vm2, %v903_v25, %v902_v24  ;;  %v912_v39 = vrot.slane %v4012_v26, 6  ;;  %v980_v59 = vrot.slane %v4012_v26, 7  ;;  %v1111_v24 = vrot.slane %v3987_v23, 4 }
 0x272   : > { %v491_v20 = vadd.f32 %v3136_v34, %v490_v54  ;;  %v649_v43 = vsel %vm605_vm7, %v648_v31, %v647_v44  ;;  %v777_v16 = vsel %vm605_vm7, %v776_v52, %v775_v60  ;;  %v709_v8 = vsel %vm605_vm7, %v708_v56, %v707_v45 }
 0x273   : > { %v4021_v35 = vpop.permute.xlu1 %714  ;;  %v843_v44 = vsel %vm602_vm6, %v842_v53, %v841_v42  ;;  %v905_v54 = vrot.slane %v3966_v9, 2  ;;  %v907_v31 = vrot.slane %v3987_v23, 1  ;;  %v975_v52 = vrot.slane %v3987_v23, 2 }
 0x274   : > { %v524_v41 = vmax.f32 %v491_v20, 0.0  ;;  %v845_v3 = vsel %vm605_vm7, %v844_v36, %v843_v44  ;;  %v977_v56 = vrot.slane %v4002_v12, 1  ;;  %v1039_v45 = vrot.slane %v3942_v17, 5 }
 0x275   : > { %v906_v33 = vsel %vm593_vm3, %v905_v54, %v904_v32  ;;  %v976_v37 = vsel %vm596_vm4, %v975_v52, %v974_v46  ;;  %v1134_v36 = vsel %vm1132_vm9, %v3723_v29, %v4021_v35  ;;  %v1107_v44 = vrot.slane %v3942_v17, 6 }
 0x276   : > { %v4036_v57 = vmin.f32 %v524_v41, 6.0  ;;  %v908_v63 = vsel %vm596_vm4, %v907_v31, %v906_v33  ;;  %v978_v60 = vsel %vm599_vm5, %v977_v56, %v976_v37  ;;  %v1040_v7 = vsel %vm590_vm2, %v1039_v45, %v1038_v0 }
 0x277   : > { %v1109_v54 = vrot.slane %v3966_v9, 5  ;;  %v1106_v35 = vrot.slane %v3950_v48, 7  ;;  %v1113_v17 = vrot.slane %v4002_v12, 3 }
 0x278   : > { %v778_v62 = vrot.slane %v4036_v57, 3  ;;  %v710_v38 = vrot.slane %v4036_v57, 2  ;;  %v650_v2 = vrot.slane %v4036_v57, 1  ;;  %v846_v21 = vrot.slane %v4036_v57, 4 }
 0x279   : > { %v914_v40 = vrot.slane %v4036_v57, 5  ;;  %v982_v11 = vrot.slane %v4036_v57, 6  ;;  %v1050_v15 = vrot.slane %v4036_v57, 7  ;;  %v1108_v32 = vsel %vm590_vm2, %v1107_v44, %v1106_v35 }
 0x27a   : > { %v779_v34 = vsel %vm608_vm8, %v778_v62, %v777_v16  ;;  %v711_v5 = vsel %vm608_vm8, %v710_v38, %v709_v8  ;;  %v4060_v13 = vsel %vm608_vm8, %v650_v2, %v649_v43  ;;  %v847_v28 = vsel %vm608_vm8, %v846_v21, %v845_v3 }
 0x27b   : > { %v4054_v22 = vpop.permute.xlu1 %782  ;;  %786 = vrot.lane.b32.xlu1 %v779_v34, %s3312_s30  ;;  %718 = vrot.lane.b32.xlu2 %v711_v5, %s3311_s23  ;;  %v909_v43 = vsel %vm599_vm5, %v4002_v12, %v908_v63  ;;  %v979_v62 = vsel %vm602_vm6, %v4006_v19, %v978_v60  ;;  %v1041_v16 = vrot.slane %v3966_v9, 4  ;;  %v1043_v2 = vrot.slane %v3987_v23, 3 }
 0x27c   : > { %v911_v41 = vsel %vm602_vm6, %v910_v27, %v909_v43  ;;  %v981_v38 = vsel %vm605_vm7, %v980_v59, %v979_v62  ;;  %v1045_v5 = vrot.slane %v4002_v12, 2  ;;  %v1139_v21 = vsel %vm1137_vm10, %v1134_v36, %v4054_v22 }
 0x27d   : > { %v983_v8 = vsel %vm608_vm8, %v982_v11, %v981_v38  ;;  %v1042_v6 = vsel %vm593_vm3, %v1041_v16, %v1040_v7  ;;  %v1115_v9 = vrot.slane %v4006_v19, 2  ;;  %v1110_v48 = vsel %vm593_vm3, %v1109_v54, %v1108_v32 }
 0x27e   : > { %v1044_v53 = vsel %vm596_vm4, %v1043_v2, %v1042_v6  ;;  %v1117_v23 = vrot.slane %v4012_v26, 1  ;;  %v1112_v33 = vsel %vm596_vm4, %v1111_v24, %v1110_v48 }
 0x27f   : > { %v1046_v30 = vsel %vm599_vm5, %v1045_v5, %v1044_v53 }
 0x280   : > { %v1048_v42 = vsel %vm602_vm6, %v1047_v10, %v1046_v30 }
 0x281   : > { %v1049_v3 = vsel %vm605_vm7, %v4012_v26, %v1048_v42 }
 0x282   : > { %v1051_v29 = vsel %vm608_vm8, %v1050_v15, %v1049_v3 }
 0x283   : > { %v851_v20 = vpop.permute.xlu1 %850  ;;  %854 = vrot.lane.b32.xlu1 %v847_v28, %s3313_s10  ;;  %1124 = vrot.lane.b32.xlu2 %v3908_v61, %s3310_s17  ;;  %v913_v61 = vsel %vm605_vm7, %v912_v39, %v911_v41  ;;  %v1114_v39 = vsel %vm599_vm5, %v1113_v17, %v1112_v33 }
 0x284   : > { %v915_v18 = vsel %vm608_vm8, %v914_v40, %v913_v61  ;;  %v1144_v25 = vsel %vm1142_vm11, %v1139_v21, %v851_v20  ;;  %v1116_v12 = vsel %vm602_vm6, %v1115_v9, %v1114_v39 }
 0x285   : > { %v1118_v63 = vsel %vm605_vm7, %v1117_v23, %v1116_v12 }
 0x286   : > { %v1119_v40 = vsel %vm608_vm8, %v4036_v57, %v1118_v63 }
 0x28b   : > { %v919_v55 = vpop.permute.xlu1 %918  ;;  %922 = vrot.lane.b32.xlu1 %v915_v18, %s3314_s12 }
 0x28c   : > { %v1149_v28 = vsel %vm1147_vm12, %v1144_v25, %v919_v55 }
 0x293   : > { %v987_v34 = vpop.permute.xlu1 %986  ;;  %990 = vrot.lane.b32.xlu1 %v983_v8, %s3315_s28 }
 0x294   : > { %v1154_v22 = vsel %vm1152_vm13, %v1149_v28, %v987_v34 }
 0x295   : > { %v785_v19 = vpop.permute.xlu2 %784 }
 0x29b   : > { %v1055_v31 = vpop.permute.xlu1 %1054  ;;  %1058 = vrot.lane.b32.xlu1 %v1051_v29, %s3316_s29 }
 0x29c   : > { %v1159_v20 = vsel %vm1157_vm14, %v1154_v22, %v1055_v31 }
 0x29d   : > { %v1164_v27 = vsel %vm1162_vm15, %v1159_v20, %v4009_v14  ;;  %v853_v14 = vpop.permute.xlu2 %852 }
 0x29e   : > { %1182 = vst [vmem:[#allocation2 + $0x21] sm:$0xff] %v1164_v27 }
 0x2a3   : > { %1126 = vrot.lane.b32.xlu1 %v1119_v40, %s3310_s17 }
 0x2a5   : > { %v921_v43 = vpop.permute.xlu2 %920 }
 0x2ad   : > { %v989_v41 = vpop.permute.xlu2 %988  ;;  %v717_v47 = vpop.permute.xlu1 %716 }
 0x2ae   : > { %v1135_v61 = vsel %vm1132_vm9, %v3920_v50, %v717_v47 }
 0x2af   : > { %v1140_v49 = vsel %vm1137_vm10, %v1135_v61, %v785_v19 }
 0x2b0   : > { %v1145_v51 = vsel %vm1142_vm11, %v1140_v49, %v853_v14 }
 0x2b1   : > { %v1150_v52 = vsel %vm1147_vm12, %v1145_v51, %v921_v43 }
 0x2b2   : > { %v1155_v57 = vsel %vm1152_vm13, %v1150_v52, %v989_v41 }
 0x2b5   : > { %v1057_v26 = vpop.permute.xlu2 %1056 }
 0x2b6   : > { %v1160_v55 = vsel %vm1157_vm14, %v1155_v57, %v1057_v26 }
 0x2d5   : > { %v719_v18 = vpop.permute.xlu2 %718 }
 0x2d6   : > { %v1136_v60 = vsel %vm1132_vm9, %v4060_v13, %v719_v18 }
 0x2dd   : > { %v1125_v56 = vpop.permute.xlu2 %1124 }
 0x2de   : > { %v1165_v58 = vsel %vm1162_vm15, %v1160_v55, %v1125_v56 }
 0x2df   : > { %1183 = vst [vmem:[#allocation2 + $0x31] sm:$0xff] %v1165_v58 }
 0x2ed   : > { %v787_v46 = vpop.permute.xlu1 %786 }
 0x2ee   : > { %v1141_v62 = vsel %vm1137_vm10, %v1136_v60, %v787_v46 }
 0x2f5   : > { %v855_v59 = vpop.permute.xlu1 %854 }
 0x2f6   : > { %v1146_v45 = vsel %vm1142_vm11, %v1141_v62, %v855_v59 }
 0x2fd   : > { %v923_v37 = vpop.permute.xlu1 %922 }
 0x2fe   : > { %v1151_v38 = vsel %vm1147_vm12, %v1146_v45, %v923_v37 }
 0x305   : > { %v991_v50 = vpop.permute.xlu1 %990 }
 0x306   : > { %v1156_v16 = vsel %vm1152_vm13, %v1151_v38, %v991_v50 }
 0x30d   : > { %v1059_v11 = vpop.permute.xlu1 %1058 }
 0x30e   : > { %v1161_v8 = vsel %vm1157_vm14, %v1156_v16, %v1059_v11 }
 0x315   : > { %v1127_v0 = vpop.permute.xlu1 %1126 }
 0x316   : > { %v1166_v2 = vsel %vm1162_vm15, %v1161_v8, %v1127_v0 }
 0x317   : > { %1184 = vst [vmem:[#allocation2 + $0x41] sm:$0xff] %v1166_v2 }
 0x318 LB: >> { %s3021_s14 = sshll.u32 %s3304_s13, 4  ;;  %s3317_s9 = smov 16   ;;  %v3137_v42 = vld [vmem:[#allocation7 + $0x1] ss:$0 sm:$0xff]  ;;  %v3146_v44 = vld [vmem:[#allocation7] ss:$0 sm:$0xff]  ;;  %s3304_s13 = sphi %s4171_s13, %s1191_s13  }
 0x319   : >> { %s1193_s16 = scalar_lea.vmem [#allocation2], %s3021_s14  ;;  %s3318_s19 = smov 112   ;;  %v3148_v29 = vld [vmem:[#allocation7 + $0x2] ss:$0 sm:$0xff]  ;;  %v3138_v35 = vld [vmem:[#allocation7 + $0x4] ss:$0 sm:$0xff] }
 0x31a   : >> { %v3147_v24 = vld [vmem:[#allocation7 + $0x3] ss:$0 sm:$0xff]  ;;  %v3150_v27 = vld [vmem:[#allocation7 + $0x5] ss:$0 sm:$0xff]  ;;  %v3142_v63 = vld [vmem:[#allocation7 + $0x7] ss:$0 sm:$0xff] }
 0x31b   : >> { %v3149_v19 = vld [vmem:[#allocation7 + $0x6] ss:$0 sm:$0xff]  ;;  %v3151_v47 = vld [vmem:[#allocation7 + $0x8] ss:$0 sm:$0xff]  ;;  %v3152_v52 = vld [vmem:[#allocation7 + $0x9] ss:$0 sm:$0xff] }
 0x31c   : >> { %v3139_v56 = vld [vmem:[#allocation7 + $0xa] ss:$0 sm:$0xff]  ;;  %v3153_v50 = vld [vmem:[#allocation7 + $0xb] ss:$0 sm:$0xff]  ;;  %v3154_v38 = vld [vmem:[#allocation7 + $0xc] ss:$0 sm:$0xff] }
 0x31d   : >> { %v3140_v0 = vld [vmem:[#allocation7 + $0xd] ss:$0 sm:$0xff]  ;;  %s3030_s3 = sshll.u32 %s3304_s13, 2  ;;  %s1191_s13 = sadd.s32 1, %s3304_s13  }
 0x31e   : >> { %v1194_v13 = vld [vmem:[%s1193_s16] sm:$0xff]  ;;  %v4177_v7 = vld [vmem:[%s1193_s16 + $0x10] sm:$0xff]  ;;  %s1406_s14 = scalar_lea.vmem [#allocation3], %s3030_s3  ;;  %p1188_p1 = scmp.ge.s32.totalorder %s1191_s13, 4  }
 0x31f   : >> { %v1216_v34 = vld [vmem:[%s1193_s16 + $0x1] sm:$0xff]  ;;  %1196 = vrot.lane.b32.xlu0 %v1194_v13, %s3317_s9  ;;  %v4181_v10 = vld [vmem:[%s1193_s16 + $0x11] sm:$0xff]  ;;  %v1206_v54 = vmul.f32 %v3137_v42, %v1194_v13  ;;  %v1275_v62 = vmul.f32 %v3139_v56, %v4177_v7  ;;  %vm1420_vm1 = vcmask (%p1188_p1), 1040384   ;;  %vm2503_vm6 = vcmask (%p1188_p1), 1042432  }
 0x320   : >> { %1218 = vrot.lane.b32.xlu1 %v1216_v34, %s3317_s9  ;;  %v1238_v5 = vld [vmem:[%s1193_s16 + $0x2] sm:$0xff]  ;;  %v4184_v6 = vld [vmem:[%s1193_s16 + $0x12] sm:$0xff]  ;;  %v1228_v23 = vmul.f32 %v3138_v35, %v1216_v34  ;;  %vm2504_vm7 = vsmask.f32 (%p1188_p1), 2304  ;;  %vm2667_vm10 = vcmask (%p1188_p1), 1043456  }
 0x321   : >> { %1240 = vrot.lane.b32.xlu2 %v1238_v5, %s3317_s9  ;;  %v4189_v53 = vld [vmem:[%s1193_s16 + $0x20] sm:$0xff]  ;;  %v1250_v49 = vmul.f32 %v3142_v63, %v1238_v5  ;;  %vm4995_vm8 = vmand (%p1188_p1), %vm2503_vm6, %vm2504_vm7  ;;  %vm2668_vm11 = vsmask.f32 (%p1188_p1), 3328 }
 0x322   : >> { %v4193_v15 = vld [vmem:[%s1193_s16 + $0x21] sm:$0xff]  ;;  %vm5407_vm12 = vmand (%p1188_p1), %vm2667_vm10, %vm2668_vm11 }
 0x323   : >> { %v4196_v36 = vld [vmem:[%s1193_s16 + $0x22] sm:$0xff]  ;;  %s2896_s16 = sshll.u32 (%p1188_p1), %s4169_s11, 4  ;;  %s2897_s16 = int_to_ptr.vmem [resolvable:$true] %s2896_s16 }
 0x327   : >> { %1208 = vrot.lane.b32.xlu0 %v1194_v13, %s3318_s19 }
 0x328   : >> { %1230 = vrot.lane.b32.xlu1 %v1216_v34, %s3318_s19 }
 0x329   : >> { %1252 = vrot.lane.b32.xlu2 %v1238_v5, %s3318_s19 }
 0x32f   : >> { %1265 = vrot.lane.b32.xlu0 %v4177_v7, %s3317_s9 }
 0x330   : >> { %1277 = vrot.lane.b32.xlu1 %v4177_v7, %s3318_s19 }
 0x331   : >> { %1287 = vrot.lane.b32.xlu2 %v4181_v10, %s3317_s9 }
 0x337   : >> { %1299 = vrot.lane.b32.xlu0 %v4181_v10, %s3318_s19 }
 0x338   : >> { %1309 = vrot.lane.b32.xlu1 %v4184_v6, %s3317_s9 }
 0x339   : >> { %1321 = vrot.lane.b32.xlu2 %v4184_v6, %s3318_s19 }
 0x33f   : >> { %1334 = vrot.lane.b32.xlu0 %v4189_v53, %s3317_s9 }
 0x340   : >> { %1346 = vrot.lane.b32.xlu1 %v4189_v53, %s3318_s19 }
 0x341   : >> { %1356 = vrot.lane.b32.xlu2 %v4193_v15, %s3317_s9 }
 0x347   : >> { %1368 = vrot.lane.b32.xlu0 %v4193_v15, %s3318_s19 }
 0x348   : >> { %1378 = vrot.lane.b32.xlu1 %v4196_v36, %s3317_s9 }
 0x349   : >> { %1390 = vrot.lane.b32.xlu2 %v4196_v36, %s3318_s19 }
 0x37b   : >> { %v1241_v25 = vpop.permute.xlu2 %1240 }
 0x37c   : >> { %v1243_v43 = vsel %vm1132_vm9, 0.0, %v1241_v25 }
 0x37d   : >> { %v1246_v18 = vmul.f32 %v3149_v19, %v1243_v43 }
 0x383   : >> { %v1253_v12 = vpop.permute.xlu2 %1252 }
 0x384   : >> { %v1255_v61 = vsel %vm1162_vm15, %v1253_v12, 0.0 }
 0x385   : >> { %v1258_v46 = vmul.f32 %v3151_v47, %v1255_v61  ;;  %v3160_v47 = vld [vmem:[#allocation7 + $0x15] ss:$0 sm:$0xff] }
 0x38b   : >> { %v1288_v11 = vpop.permute.xlu2 %1287 }
 0x38c   : >> { %v1290_v8 = vsel %vm1132_vm9, 0.0, %v1288_v11 }
 0x38d   : >> { %v1293_v5 = vmul.f32 %v3154_v38, %v1290_v8  ;;  %v3163_v38 = vld [vmem:[#allocation7 + $0x1a] ss:$0 sm:$0xff] }
 0x391   : >> { %v1197_v30 = vpop.permute.xlu0 %1196 }
 0x392   : >> { %v1219_v21 = vpop.permute.xlu1 %1218  ;;  %v1199_v3 = vsel %vm1132_vm9, 0.0, %v1197_v30  ;;  %v3155_v30 = vld [vmem:[#allocation7 + $0xe] ss:$0 sm:$0xff] }
 0x393   : >> { %v1202_v28 = vmul.f32 %v3146_v44, %v1199_v3  ;;  %v1221_v17 = vsel %vm1132_vm9, 0.0, %v1219_v21  ;;  %v1297_v44 = vmul.f32 %v3140_v0, %v4181_v10  ;;  %v3156_v3 = vld [vmem:[#allocation7 + $0xf] ss:$0 sm:$0xff] }
 0x394   : >> { %v1224_v33 = vmul.f32 %v3147_v24, %v1221_v17 }
 0x395   : >> { %v1207_v32 = vadd.f32 %v1206_v54, %v1202_v28  ;;  %v1322_v54 = vpop.permute.xlu2 %1321  ;;  %v3141_v28 = vld [vmem:[#allocation7 + $0x10] ss:$0 sm:$0xff] }
 0x399   : >> { %v1209_v22 = vpop.permute.xlu0 %1208 }
 0x39a   : >> { %v1231_v31 = vpop.permute.xlu1 %1230  ;;  %v1211_v20 = vsel %vm1162_vm15, %v1209_v22, 0.0 }
 0x39b   : >> { %v1214_v9 = vmul.f32 %v3148_v29, %v1211_v20  ;;  %v1233_v48 = vsel %vm1162_vm15, %v1231_v31, 0.0  ;;  %v3157_v31 = vld [vmem:[#allocation7 + $0x11] ss:$0 sm:$0xff]  ;;  %v1324_v20 = vsel %vm1162_vm15, %v1322_v54, 0.0 }
 0x39c   : >> { %v1236_v14 = vmul.f32 %v3150_v27, %v1233_v48  ;;  %v3158_v27 = vld [vmem:[#allocation7 + $0x12] ss:$0 sm:$0xff] }
 0x39d   : >> { %v1215_v39 = vadd.f32 %v1214_v9, %v1207_v32  ;;  %v1319_v32 = vmul.f32 %v3141_v28, %v4184_v6  ;;  %v1357_v19 = vpop.permute.xlu2 %1356 }
 0x39e   : >> { %v1359_v6 = vsel %vm1132_vm9, 0.0, %v1357_v19 }
 0x39f   : >> { %v1225_v40 = vadd.f32 %v1224_v33, %v1215_v39  ;;  %v1327_v39 = vmul.f32 %v3157_v31, %v1324_v20 }
 0x3a1   : >> { %v1229_v41 = vadd.f32 %v1228_v23, %v1225_v40  ;;  %v1266_v26 = vpop.permute.xlu0 %1265  ;;  %v3143_v23 = vld [vmem:[#allocation7 + $0x13] ss:$0 sm:$0xff]  ;;  %v3159_v40 = vld [vmem:[#allocation7 + $0x14] ss:$0 sm:$0xff] }
 0x3a2   : >> { %v1278_v57 = vpop.permute.xlu1 %1277  ;;  %v1268_v55 = vsel %vm1132_vm9, 0.0, %v1266_v26  ;;  %v1344_v43 = vmul.f32 %v3143_v23, %v4189_v53  ;;  %v3144_v26 = vld [vmem:[#allocation7 + $0x16] ss:$0 sm:$0xff] }
 0x3a3   : >> { %v1237_v51 = vadd.f32 %v1236_v14, %v1229_v41  ;;  %v1271_v37 = vmul.f32 %v3152_v52, %v1268_v55  ;;  %v1280_v60 = vsel %vm1162_vm15, %v1278_v57, 0.0  ;;  %v1362_v52 = vmul.f32 %v3160_v47, %v1359_v6  ;;  %v3161_v57 = vld [vmem:[#allocation7 + $0x17] ss:$0 sm:$0xff] }
 0x3a4   : >> { %v1283_v13 = vmul.f32 %v3153_v50, %v1280_v60 }
 0x3a5   : >> { %v1247_v58 = vadd.f32 %v1246_v18, %v1237_v51  ;;  %v1391_v60 = vpop.permute.xlu2 %1390 }
 0x3a7   : >> { %v1251_v59 = vadd.f32 %v1250_v49, %v1247_v58  ;;  %v1366_v58 = vmul.f32 %v3144_v26, %v4193_v15  ;;  %v1399_v15 = vperm.slane %v3467_v1, 0 }
 0x3a9   : >> { %v1259_v45 = vadd.f32 %v1258_v46, %v1251_v59  ;;  %v1300_v16 = vpop.permute.xlu0 %1299  ;;  %v3162_v59 = vld [vmem:[#allocation7 + $0x18] ss:$0 sm:$0xff] }
 0x3aa   : >> { %v1310_v21 = vpop.permute.xlu1 %1309  ;;  %v1302_v42 = vsel %vm1162_vm15, %v1300_v16, 0.0  ;;  %v1393_v16 = vsel %vm1162_vm15, %v1391_v60, 0.0 }
 0x3ab   : >> { %v1272_v2 = vadd.f32 %v1271_v37, %v1259_v45  ;;  %v1312_v7 = vsel %vm1132_vm9, 0.0, %v1310_v21  ;;  %v1305_v35 = vmul.f32 %v3155_v30, %v1302_v42  ;;  %v3145_v37 = vld [vmem:[#allocation7 + $0x19] ss:$0 sm:$0xff] }
 0x3ac   : >> { %v1315_v22 = vmul.f32 %v3156_v3, %v1312_v7  ;;  %v1388_v8 = vmul.f32 %v3145_v37, %v4196_v36 }
 0x3ad   : >> { %v1276_v34 = vadd.f32 %v1275_v62, %v1272_v2 }
 0x3af   : >> { %v1284_v25 = vadd.f32 %v1283_v13, %v1276_v34  ;;  %v1396_v13 = vmul.f32 %v3163_v38, %v1393_v16 }
 0x3b1   : >> { %v1294_v29 = vadd.f32 %v1293_v5, %v1284_v25  ;;  %v1335_v17 = vpop.permute.xlu0 %1334  ;;  %v3319_v25 = vmov (%p1188_p1), 0  }
 0x3b2   : >> { %v1347_v48 = vpop.permute.xlu1 %1346  ;;  %v1337_v10 = vsel %vm1132_vm9, 0.0, %v1335_v17  ;;  %3164 = vset.pattern.permute.xlu2 (%p1188_p1), %v3319_v25  ;;  %3165 = vset.pattern.permute.xlu0 (%p1188_p1), %v3319_v25 }
 0x3b3   : >> { %v1298_v24 = vadd.f32 %v1297_v44, %v1294_v29  ;;  %v1340_v63 = vmul.f32 %v3158_v27, %v1337_v10  ;;  %v1349_v14 = vsel %vm1162_vm15, %v1347_v48, 0.0 }
 0x3b4   : >> { %v1352_v49 = vmul.f32 %v3159_v40, %v1349_v14 }
 0x3b5   : >> { %v1306_v9 = vadd.f32 %v1305_v35, %v1298_v24 }
 0x3b7   : >> { %v1316_v33 = vadd.f32 %v1315_v22, %v1306_v9 }
 0x3b9   : >> { %v1320_v12 = vadd.f32 %v1319_v32, %v1316_v33  ;;  %v1369_v18 = vpop.permute.xlu0 %1368 }
 0x3ba   : >> { %v1379_v55 = vpop.permute.xlu1 %1378  ;;  %v1371_v56 = vsel %vm1162_vm15, %v1369_v18, 0.0 }
 0x3bb   : >> { %v1328_v41 = vadd.f32 %v1327_v39, %v1320_v12  ;;  %v1381_v53 = vsel %vm1132_vm9, 0.0, %v1379_v55  ;;  %v1374_v11 = vmul.f32 %v3161_v57, %v1371_v56 }
 0x3bc   : >> { %v1384_v45 = vmul.f32 %v3162_v59, %v1381_v53 }
 0x3bd   : >> { %v1341_v61 = vadd.f32 %v1340_v63, %v1328_v41 }
 0x3bf   : >> { %v1345_v51 = vadd.f32 %v1344_v43, %v1341_v61 }
 0x3c1   : >> { %v1353_v46 = vadd.f32 %v1352_v49, %v1345_v51 }
 0x3c3   : >> { %v1363_v50 = vadd.f32 %v1362_v52, %v1353_v46 }
 0x3c5   : >> { %v1367_v62 = vadd.f32 %v1366_v58, %v1363_v50 }
 0x3c7   : >> { %v1375_v0 = vadd.f32 %v1374_v11, %v1367_v62 }
 0x3c9   : >> { %v1385_v2 = vadd.f32 %v1384_v45, %v1375_v0 }
 0x3cb   : >> { %v1389_v34 = vadd.f32 %v1388_v8, %v1385_v2 }
 0x3cd   : >> { %v1397_v5 = vadd.f32 %v1396_v13, %v1389_v34 }
 0x3cf   : >> { %v1401_v30 = vadd.f32 %v1399_v15, %v1397_v5 }
 0x3d1   : >> { %v1402_v21 = vmax.f32 %v1401_v30, 0.0 }
 0x3d3   : >> { %v1403_v42 = vmin.f32 %v1402_v21, 6.0  ;;  %1190 = sbr.rel (!%p1188_p1) target bundleno = 792 (0x318), region = 110 }
 0x3d5   : >> { %v1404_v44 = vpack.c.bf16 %v1403_v42, %v1403_v42 }
 0x3d7   : >> { %1407 = vst [vmem:[%s1406_s14] sm:$0xf] %v1404_v44 }
 0x3de   : > { %v1408_v36 = vld [vmem:[#allocation3] sm:$0xf]  ;;  %v1409_v23 = vld [vmem:[#allocation3 + $0x4] sm:$0xf]  ;;  %v1410_v11 = vld [vmem:[#allocation3 + $0x8] sm:$0xf] }
 0x3df   : > { %v1416_v3 = vrot.slane %v1408_v36, 3  ;;  %v1417_v63 = vrot.slane %v1409_v23, 3  ;;  %v1418_v16 = vrot.slane %v1410_v11, 3 }
 0x3e1   : > { %v1423_v54 = vsel %vm1420_vm1, %v1408_v36, %v1416_v3  ;;  %v1428_v7 = vsel %vm593_vm3, %v1408_v36, %v1416_v3  ;;  %v1425_v28 = vsel %vm590_vm2, %v1408_v36, %v1416_v3  ;;  %v1431_v9 = vsel %vm596_vm4, %v1408_v36, %v1416_v3 }
 0x3e2   : > { %v3031_v29 = vpack.i.b16 %v1423_v54, %v1423_v54  ;;  %v1430_v35 = vrot.slane %v1428_v7, 2  ;;  %v1427_v24 = vrot.slane %v1425_v28, 1  ;;  %v1474_v22 = vunpack.i.h.s16 %v1423_v54 }
 0x3e3   : > { %v1433_v12 = vrot.slane %v1431_v9, 3  ;;  %v1436_v41 = vsel %vm1420_vm1, %v1409_v23, %v1417_v63  ;;  %v1438_v47 = vsel %vm590_vm2, %v1409_v23, %v1417_v63  ;;  %v1441_v56 = vsel %vm593_vm3, %v1409_v23, %v1417_v63 }
 0x3e4   : > { %v4233_v31 = vperm.slane %v3031_v29, 0  ;;  %v3033_v17 = vpack.i.b16 %v1430_v35, %v1430_v35  ;;  %v3032_v20 = vpack.i.b16 %v1427_v24, %v1427_v24  ;;  %v1478_v1 = vunpack.i.h.s16 %v1430_v35 }
 0x3e5   : > { %v1476_v32 = vunpack.i.h.s16 %v1427_v24  ;;  %v1506_v10 = vpack.i.b16 %v1474_v22, %v1474_v22  ;;  %v1480_v43 = vunpack.i.h.s16 %v1433_v12  ;;  %v3034_v6 = vpack.i.b16 %v1433_v12, %v1433_v12 }
 0x3e6   : > { %1601 = vrot.lane.b32.xlu0 %v4233_v31, %s3310_s17  ;;  %v4238_v27 = vperm.slane %v3033_v17, 0  ;;  %v4240_v48 = vperm.slane %v3032_v20, 0  ;;  %v1510_v33 = vpack.i.b16 %v1478_v1, %v1478_v1  ;;  %v3035_v26 = vpack.i.b16 %v1436_v41, %v1436_v41 }
 0x3e7   : > { %v1508_v39 = vpack.i.b16 %v1476_v32, %v1476_v32  ;;  %v4246_v40 = vperm.slane %v1506_v10, 0  ;;  %v1512_v61 = vpack.i.b16 %v1480_v43, %v1480_v43  ;;  %v1440_v49 = vrot.slane %v1438_v47, 1 }
 0x3e8   : > { %5824 = vst [vmem:[#allocation14_spill] sm:$0xff] %v4238_v27  ;;  %1609 = vrot.lane.b32.xlu2 %v4238_v27, %s3310_s17  ;;  %1605 = vrot.lane.b32.xlu1 %v4240_v48, %s3310_s17  ;;  %v4248_v19 = vperm.slane %v1510_v33, 0  ;;  %v4260_v18 = vperm.slane %v3034_v6, 0  ;;  %v1482_v51 = vunpack.i.h.s16 %v1436_v41  ;;  %v4262_v52 = vperm.slane %v3035_v26, 0 }
 0x3e9   : > { %5825 = vst [vmem:[#allocation15_spill] sm:$0xff] %v4240_v48  ;;  %v4250_v14 = vperm.slane %v1508_v39, 0  ;;  %v4264_v57 = vperm.slane %v1512_v61, 0  ;;  %v1484_v55 = vunpack.i.h.s16 %v1440_v49  ;;  %v3036_v59 = vpack.i.b16 %v1440_v49, %v1440_v49 }
 0x3ea   : > { %5826 = vst [vmem:[#allocation16_spill] sm:$0xff] %v4246_v40  ;;  %v1514_v58 = vpack.i.b16 %v1482_v51, %v1482_v51  ;;  %v1443_v53 = vrot.slane %v1441_v56, 2  ;;  %v1444_v37 = vsel %vm596_vm4, %v1409_v23, %v1417_v63  ;;  %v1449_v13 = vsel %vm1420_vm1, %v1410_v11, %v1418_v16  ;;  %v1411_v23 = vld [vmem:[#allocation3 + $0xc] sm:$0xf] }
 0x3eb   : > { %5827 = vst [vmem:[#allocation17_spill] sm:$0xff] %v4248_v19  ;;  %v1516_v46 = vpack.i.b16 %v1484_v55, %v1484_v55  ;;  %v4278_v62 = vperm.slane %v3036_v59, 0  ;;  %v1446_v45 = vrot.slane %v1444_v37, 3  ;;  %v1490_v21 = vunpack.i.h.s16 %v1449_v13 }
 0x3ec   : > { %5828 = vst [vmem:[#allocation18_spill] sm:$0xff] %v4262_v52  ;;  %v4274_v50 = vperm.slane %v1514_v58, 0  ;;  %v1486_v38 = vunpack.i.h.s16 %v1443_v53  ;;  %v3037_v8 = vpack.i.b16 %v1443_v53, %v1443_v53  ;;  %v1451_v42 = vsel %vm590_vm2, %v1410_v11, %v1418_v16 }
 0x3ed   : > { %5829 = vst [vmem:[#allocation19_spill] sm:$0xff] %v4264_v57  ;;  %v4276_v60 = vperm.slane %v1516_v46, 0  ;;  %v3038_v0 = vpack.i.b16 %v1446_v45, %v1446_v45  ;;  %v1488_v34 = vunpack.i.h.s16 %v1446_v45  ;;  %v1522_v36 = vpack.i.b16 %v1490_v21, %v1490_v21 }
 0x3ee   : > { %1603 = vrot.lane.b32.xlu0 %v4246_v40, %s3310_s17  ;;  %5830 = vst [vmem:[#allocation20_spill] sm:$0xff] %v4274_v50  ;;  %v1518_v2 = vpack.i.b16 %v1486_v38, %v1486_v38  ;;  %v4287_v15 = vperm.slane %v3037_v8, 0  ;;  %v3039_v25 = vpack.i.b16 %v1449_v13, %v1449_v13  ;;  %v1453_v3 = vrot.slane %v1451_v42, 1 }
 0x3ef   : > { %5831 = vst [vmem:[#allocation21_spill] sm:$0xff] %v4276_v60  ;;  %v4289_v5 = vperm.slane %v3038_v0, 0  ;;  %v1520_v44 = vpack.i.b16 %v1488_v34, %v1488_v34  ;;  %v1454_v54 = vsel %vm593_vm3, %v1410_v11, %v1418_v16  ;;  %v4303_v28 = vperm.slane %v1522_v36, 0 }
 0x3f0   : > { %1611 = vrot.lane.b32.xlu2 %v4248_v19, %s3310_s17  ;;  %1607 = vrot.lane.b32.xlu1 %v4250_v14, %s3310_s17  ;;  %5832 = vst [vmem:[#allocation22_spill] sm:$0xff] %v4278_v62  ;;  %v4291_v30 = vperm.slane %v1518_v2, 0  ;;  %v4305_v29 = vperm.slane %v3039_v25, 0  ;;  %v1456_v35 = vrot.slane %v1454_v54, 2  ;;  %v1492_v24 = vunpack.i.h.s16 %v1453_v3 }
 0x3f1   : > { %v4301_v7 = vperm.slane %v1520_v44, 0  ;;  %v1457_v22 = vsel %vm596_vm4, %v1410_v11, %v1418_v16  ;;  %v3040_v17 = vpack.i.b16 %v1453_v3, %v1453_v3  ;;  %v1419_v63 = vrot.slane %v1411_v23, 3 }
 0x3f2   : > { %v3041_v20 = vpack.i.b16 %v1456_v35, %v1456_v35  ;;  %v1524_v1 = vpack.i.b16 %v1492_v24, %v1492_v24  ;;  %v1459_v32 = vrot.slane %v1457_v22, 3  ;;  %v1494_v10 = vunpack.i.h.s16 %v1456_v35 }
 0x3f3   : > { %v4314_v9 = vperm.slane %v3040_v17, 0  ;;  %v1462_v6 = vsel %vm1420_vm1, %v1411_v23, %v1419_v63  ;;  %v1464_v26 = vsel %vm590_vm2, %v1411_v23, %v1419_v63  ;;  %v1467_v58 = vsel %vm593_vm3, %v1411_v23, %v1419_v63 }
 0x3f4   : > { %v4316_v33 = vperm.slane %v3041_v20, 0  ;;  %v4318_v39 = vperm.slane %v1524_v1, 0  ;;  %v1496_v12 = vunpack.i.h.s16 %v1459_v32  ;;  %v1526_v43 = vpack.i.b16 %v1494_v10, %v1494_v10 }
 0x3f5   : > { %v3042_v47 = vpack.i.b16 %v1459_v32, %v1459_v32  ;;  %v1466_v55 = vrot.slane %v1464_v26, 1  ;;  %v1498_v56 = vunpack.i.h.s16 %v1462_v6  ;;  %v3043_v46 = vpack.i.b16 %v1462_v6, %v1462_v6 }
 0x3f6   : > { %1613 = vrot.lane.b32.xlu0 %v4260_v18, %s3310_s17  ;;  %v1528_v41 = vpack.i.b16 %v1496_v12, %v1496_v12  ;;  %v4328_v61 = vperm.slane %v1526_v43, 0  ;;  %v1469_v37 = vrot.slane %v1467_v58, 2  ;;  %v1470_v0 = vsel %vm596_vm4, %v1411_v23, %v1419_v63 }
 0x3f7   : > { %v4332_v51 = vperm.slane %v3042_v47, 0  ;;  %v3044_v59 = vpack.i.b16 %v1466_v55, %v1466_v55  ;;  %v1530_v53 = vpack.i.b16 %v1498_v56, %v1498_v56  ;;  %v4341_v11 = vperm.slane %v3043_v46, 0 }
 0x3f8   : > { %1617 = vrot.lane.b32.xlu2 %v4262_v52, %s3310_s17  ;;  %1615 = vrot.lane.b32.xlu1 %v4264_v57, %s3310_s17  ;;  %v4330_v49 = vperm.slane %v1528_v41, 0  ;;  %v1500_v45 = vunpack.i.h.s16 %v1466_v55  ;;  %v1502_v8 = vunpack.i.h.s16 %v1469_v37  ;;  %v3045_v34 = vpack.i.b16 %v1469_v37, %v1469_v37 }
 0x3f9   : > { %5833 = vst [vmem:[#allocation23_spill] sm:$0xff] %v4332_v51  ;;  %v4343_v38 = vperm.slane %v3044_v59, 0  ;;  %v4345_v16 = vperm.slane %v1530_v53, 0  ;;  %v1472_v21 = vrot.slane %v1470_v0, 3  ;;  %vm2178_vm2 = vsmask.f32 256 }
 0x3fa   : > { %5834 = vst [vmem:[#allocation24_spill] sm:$0xff] %v4341_v11  ;;  %v1532_v2 = vpack.i.b16 %v1500_v45, %v1500_v45  ;;  %v1534_v13 = vpack.i.b16 %v1502_v8, %v1502_v8  ;;  %v4358_v36 = vperm.slane %v3045_v34, 0  ;;  %vm2341_vm3 = vsmask.f32 1280  ;;  %vm4793_vm4 = vmand %vm1420_vm1, %vm2178_vm2 }
 0x3fb   : > { %5835 = vst [vmem:[#allocation25_spill] sm:$0xff] %v4345_v16  ;;  %v1504_v25 = vunpack.i.h.s16 %v1472_v21  ;;  %v3046_v3 = vpack.i.b16 %v1472_v21, %v1472_v21  ;;  %vm4810_vm5 = vmand %vm400_vm0, %vm2341_vm3 }
 0x3fc   : > { %v4354_v42 = vperm.slane %v1532_v2, 0  ;;  %v4356_v44 = vperm.slane %v1534_v13, 0 }
 0x3fd   : > { %v1536_v54 = vpack.i.b16 %v1504_v25, %v1504_v25  ;;  %v4366_v35 = vperm.slane %v3046_v3, 0 }
 0x3fe   : > { %1619 = vrot.lane.b32.xlu0 %v4274_v50, %s3310_s17  ;;  %5836 = vst [vmem:[#allocation26_spill] sm:$0xff] %v4354_v42 }
 0x3ff   : > { %v4368_v24 = vperm.slane %v1536_v54, 0 }
 0x400   : > { %1623 = vrot.lane.b32.xlu2 %v4276_v60, %s3310_s17  ;;  %1621 = vrot.lane.b32.xlu1 %v4278_v62, %s3310_s17 }
 0x406   : > { %1625 = vrot.lane.b32.xlu0 %v4287_v15, %s3310_s17 }
 0x408   : > { %1629 = vrot.lane.b32.xlu2 %v4289_v5, %s3310_s17  ;;  %1627 = vrot.lane.b32.xlu1 %v4291_v30, %s3310_s17 }
 0x40e   : > { %1631 = vrot.lane.b32.xlu0 %v4301_v7, %s3310_s17 }
 0x410   : > { %1635 = vrot.lane.b32.xlu2 %v4303_v28, %s3310_s17  ;;  %1633 = vrot.lane.b32.xlu1 %v4305_v29, %s3310_s17 }
 0x416   : > { %1637 = vrot.lane.b32.xlu0 %v4314_v9, %s3310_s17 }
 0x418   : > { %1641 = vrot.lane.b32.xlu2 %v4316_v33, %s3310_s17  ;;  %1639 = vrot.lane.b32.xlu1 %v4318_v39, %s3310_s17 }
 0x41e   : > { %1643 = vrot.lane.b32.xlu0 %v4328_v61, %s3310_s17 }
 0x420   : > { %1647 = vrot.lane.b32.xlu2 %v4330_v49, %s3310_s17  ;;  %1645 = vrot.lane.b32.xlu1 %v4332_v51, %s3310_s17 }
 0x426   : > { %1649 = vrot.lane.b32.xlu0 %v4341_v11, %s3310_s17 }
 0x428   : > { %1653 = vrot.lane.b32.xlu2 %v4343_v38, %s3310_s17  ;;  %1651 = vrot.lane.b32.xlu1 %v4345_v16, %s3310_s17 }
 0x42e   : > { %1655 = vrot.lane.b32.xlu0 %v4354_v42, %s3310_s17 }
 0x430   : > { %1659 = vrot.lane.b32.xlu2 %v4356_v44, %s3310_s17  ;;  %1657 = vrot.lane.b32.xlu1 %v4358_v36, %s3310_s17 }
 0x436   : > { %1661 = vrot.lane.b32.xlu0 %v4366_v35, %s3310_s17 }
 0x438   : > { %1663 = vrot.lane.b32.xlu1 %v4368_v24, %s3310_s17  ;;  %1697 = vrot.lane.b32.xlu2 %v4233_v31, %s3316_s29 }
 0x43e   : > { %1699 = vrot.lane.b32.xlu0 %v4246_v40, %s3316_s29 }
 0x440   : > { %1701 = vrot.lane.b32.xlu1 %v4240_v48, %s3316_s29  ;;  %1703 = vrot.lane.b32.xlu2 %v4250_v14, %s3316_s29 }
 0x442   : > { %v4382_v22 = vpop.permute.xlu2 %1609 }
 0x443   : > { %5837 = vst [vmem:[#allocation27_spill] sm:$0xff] %v4382_v22 }
 0x446   : > { %1705 = vrot.lane.b32.xlu0 %v4238_v27, %s3316_s29 }
 0x448   : > { %1707 = vrot.lane.b32.xlu1 %v4248_v19, %s3316_s29  ;;  %1709 = vrot.lane.b32.xlu2 %v4260_v18, %s3316_s29 }
 0x44a   : > { %v4390_v17 = vpop.permute.xlu2 %1611 }
 0x44b   : > { %5838 = vst [vmem:[#allocation28_spill] sm:$0xff] %v4390_v17 }
 0x44e   : > { %1711 = vrot.lane.b32.xlu0 %v4264_v57, %s3316_s29 }
 0x450   : > { %1713 = vrot.lane.b32.xlu1 %v4262_v52, %s3316_s29  ;;  %1715 = vrot.lane.b32.xlu2 %v4274_v50, %s3316_s29 }
 0x452   : > { %v4398_v20 = vpop.permute.xlu2 %1617 }
 0x453   : > { %5839 = vst [vmem:[#allocation29_spill] sm:$0xff] %v4398_v20 }
 0x456   : > { %1717 = vrot.lane.b32.xlu0 %v4278_v62, %s3316_s29 }
 0x458   : > { %1719 = vrot.lane.b32.xlu1 %v4276_v60, %s3316_s29  ;;  %1721 = vrot.lane.b32.xlu2 %v4287_v15, %s3316_s29  ;;  %v4406_v1 = vpop.permute.xlu0 %1601 }
 0x45a   : > { %v4408_v32 = vpop.permute.xlu2 %1623  ;;  %v4410_v10 = vpop.permute.xlu1 %1605 }
 0x45b   : > { %5840 = vst [vmem:[#allocation30_spill] sm:$0xff] %v4408_v32 }
 0x45c   : > { %5841 = vst [vmem:[#allocation31_spill] sm:$0xff] %v4410_v10 }
 0x45e   : > { %1723 = vrot.lane.b32.xlu0 %v4291_v30, %s3316_s29 }
 0x460   : > { %1725 = vrot.lane.b32.xlu1 %v4289_v5, %s3316_s29  ;;  %1727 = vrot.lane.b32.xlu2 %v4301_v7, %s3316_s29  ;;  %v4418_v23 = vpop.permute.xlu0 %1603 }
 0x461   : > { %5842 = vst [vmem:[#allocation32_spill] sm:$0xff] %v4418_v23 }
 0x462   : > { %v4420_v12 = vpop.permute.xlu2 %1629  ;;  %v4422_v63 = vpop.permute.xlu1 %1607 }
 0x463   : > { %5843 = vst [vmem:[#allocation33_spill] sm:$0xff] %v4422_v63 }
 0x466   : > { %1729 = vrot.lane.b32.xlu0 %v4305_v29, %s3316_s29 }
 0x468   : > { %1731 = vrot.lane.b32.xlu1 %v4303_v28, %s3316_s29  ;;  %1733 = vrot.lane.b32.xlu2 %v4314_v9, %s3316_s29  ;;  %v4430_v43 = vpop.permute.xlu0 %1613 }
 0x469   : > { %5844 = vst [vmem:[#allocation34_spill] sm:$0xff] %v4430_v43 }
 0x46a   : > { %v4432_v41 = vpop.permute.xlu2 %1635  ;;  %v4434_v47 = vpop.permute.xlu1 %1615 }
 0x46b   : > { %5845 = vst [vmem:[#allocation35_spill] sm:$0xff] %v4434_v47 }
 0x46e   : > { %1735 = vrot.lane.b32.xlu0 %v4318_v39, %s3316_s29 }
 0x470   : > { %1737 = vrot.lane.b32.xlu1 %v4316_v33, %s3316_s29  ;;  %1739 = vrot.lane.b32.xlu2 %v4328_v61, %s3316_s29  ;;  %v4442_v6 = vpop.permute.xlu0 %1619 }
 0x471   : > { %5846 = vst [vmem:[#allocation36_spill] sm:$0xff] %v4442_v6 }
 0x472   : > { %v4444_v26 = vpop.permute.xlu2 %1641  ;;  %v4446_v55 = vpop.permute.xlu1 %1621 }
 0x473   : > { %5847 = vst [vmem:[#allocation37_spill] sm:$0xff] %v4446_v55 }
 0x476   : > { %1741 = vrot.lane.b32.xlu0 %v4332_v51, %s3316_s29 }
 0x478   : > { %1743 = vrot.lane.b32.xlu1 %v4330_v49, %s3316_s29  ;;  %1745 = vrot.lane.b32.xlu2 %v4341_v11, %s3316_s29  ;;  %v4454_v56 = vpop.permute.xlu0 %1625 }
 0x479   : > { %5848 = vst [vmem:[#allocation38_spill] sm:$0xff] %v4454_v56 }
 0x47a   : > { %v4456_v58 = vpop.permute.xlu2 %1647  ;;  %v4458_v46 = vpop.permute.xlu1 %1627 }
 0x47b   : > { %5849 = vst [vmem:[#allocation39_spill] sm:$0xff] %v4458_v46 }
 0x47e   : > { %1747 = vrot.lane.b32.xlu0 %v4345_v16, %s3316_s29 }
 0x480   : > { %1749 = vrot.lane.b32.xlu1 %v4343_v38, %s3316_s29  ;;  %1751 = vrot.lane.b32.xlu2 %v4354_v42, %s3316_s29  ;;  %v4466_v59 = vpop.permute.xlu0 %1631 }
 0x482   : > { %v4468_v53 = vpop.permute.xlu2 %1653  ;;  %v4470_v37 = vpop.permute.xlu1 %1633 }
 0x486   : > { %1753 = vrot.lane.b32.xlu0 %v4358_v36, %s3316_s29 }
 0x488   : > { %1755 = vrot.lane.b32.xlu1 %v4356_v44, %s3316_s29  ;;  %1757 = vrot.lane.b32.xlu2 %v4366_v35, %s3316_s29  ;;  %v4478_v45 = vpop.permute.xlu0 %1637 }
 0x48a   : > { %v4480_v8 = vpop.permute.xlu2 %1659  ;;  %v4482_v0 = vpop.permute.xlu1 %1639 }
 0x48e   : > { %1759 = vrot.lane.b32.xlu0 %v4368_v24, %s3316_s29 }
 0x490   : > { %1761 = vrot.lane.b32.xlu1 %v4233_v31, %s3315_s28  ;;  %1763 = vrot.lane.b32.xlu2 %v4246_v40, %s3315_s28  ;;  %v4490_v2 = vpop.permute.xlu0 %1643 }
 0x492   : > { %v4492_v13 = vpop.permute.xlu1 %1645  ;;  %v4494_v34 = vpop.permute.xlu2 %1697 }
 0x493   : > { %5850 = vst [vmem:[#allocation40_spill] sm:$0xff] %v4494_v34 }
 0x496   : > { %1765 = vrot.lane.b32.xlu0 %v4240_v48, %s3315_s28 }
 0x498   : > { %1767 = vrot.lane.b32.xlu1 %v4250_v14, %s3315_s28  ;;  %1769 = vrot.lane.b32.xlu2 %v4238_v27, %s3315_s28  ;;  %v4502_v21 = vpop.permute.xlu0 %1649 }
 0x499   : > { %5851 = vst [vmem:[#allocation41_spill] sm:$0xff] %v4502_v21 }
 0x49a   : > { %v4504_v25 = vpop.permute.xlu1 %1651  ;;  %v4506_v3 = vpop.permute.xlu2 %1703 }
 0x49b   : > { %5852 = vst [vmem:[#allocation42_spill] sm:$0xff] %v4504_v25 }
 0x49c   : > { %5853 = vst [vmem:[#allocation43_spill] sm:$0xff] %v4506_v3 }
 0x49e   : > { %1771 = vrot.lane.b32.xlu0 %v4248_v19, %s3315_s28 }
 0x4a0   : > { %1773 = vrot.lane.b32.xlu1 %v4260_v18, %s3315_s28  ;;  %1775 = vrot.lane.b32.xlu2 %v4264_v57, %s3315_s28  ;;  %v4514_v54 = vpop.permute.xlu0 %1655 }
 0x4a1   : > { %5854 = vst [vmem:[#allocation44_spill] sm:$0xff] %v4514_v54 }
 0x4a2   : > { %v4516_v4 = vpop.permute.xlu1 %1657  ;;  %v4518_v46 = vpop.permute.xlu2 %1709 }
 0x4a3   : > { %5855 = vst [vmem:[#allocation45_spill] sm:$0xff] %v4516_v4 }
 0x4a4   : > { %5856 = vst [vmem:[#allocation46_spill] sm:$0xff] %v4518_v46 }
 0x4a6   : > { %1777 = vrot.lane.b32.xlu0 %v4262_v52, %s3315_s28 }
 0x4a8   : > { %1779 = vrot.lane.b32.xlu1 %v4274_v50, %s3315_s28  ;;  %1781 = vrot.lane.b32.xlu2 %v4278_v62, %s3315_s28  ;;  %v4526_v32 = vpop.permute.xlu0 %1661 }
 0x4a9   : > { %5857 = vst [vmem:[#allocation47_spill] sm:$0xff] %v4526_v32 }
 0x4aa   : > { %v4528_v55 = vpop.permute.xlu1 %1663  ;;  %v4530_v20 = vpop.permute.xlu2 %1715 }
 0x4ab   : > { %5858 = vst [vmem:[#allocation48_spill] sm:$0xff] %v4528_v55 }
 0x4ac   : > { %5859 = vst [vmem:[#allocation49_spill] sm:$0xff] %v4530_v20 }
 0x4ae   : > { %1783 = vrot.lane.b32.xlu0 %v4276_v60, %s3315_s28 }
 0x4b0   : > { %1785 = vrot.lane.b32.xlu1 %v4287_v15, %s3315_s28  ;;  %1787 = vrot.lane.b32.xlu2 %v4291_v30, %s3315_s28  ;;  %v4538_v47 = vpop.permute.xlu0 %1699 }
 0x4b1   : > { %5860 = vst [vmem:[#allocation50_spill] sm:$0xff] %v4538_v47 }
 0x4b2   : > { %v4540_v17 = vpop.permute.xlu1 %1701  ;;  %v4542_v22 = vpop.permute.xlu2 %1721 }
 0x4b3   : > { %5861 = vst [vmem:[#allocation51_spill] sm:$0xff] %v4540_v17 }
 0x4b4   : > { %5862 = vst [vmem:[#allocation52_spill] sm:$0xff] %v4542_v22 }
 0x4b6   : > { %1789 = vrot.lane.b32.xlu0 %v4289_v5, %s3315_s28 }
 0x4b8   : > { %1791 = vrot.lane.b32.xlu1 %v4301_v7, %s3315_s28  ;;  %1793 = vrot.lane.b32.xlu2 %v4305_v29, %s3315_s28  ;;  %v4550_v55 = vpop.permute.xlu0 %1705 }
 0x4b9   : > { %5863 = vst [vmem:[#allocation53_spill] sm:$0xff] %v4550_v55 }
 0x4ba   : > { %v4552_v32 = vpop.permute.xlu1 %1707  ;;  %v4554_v56 = vpop.permute.xlu2 %1727 }
 0x4bb   : > { %5864 = vst [vmem:[#allocation54_spill] sm:$0xff] %v4552_v32 }
 0x4be   : > { %1795 = vrot.lane.b32.xlu0 %v4303_v28, %s3315_s28 }
 0x4c0   : > { %1797 = vrot.lane.b32.xlu1 %v4314_v9, %s3315_s28  ;;  %1799 = vrot.lane.b32.xlu2 %v4318_v39, %s3315_s28  ;;  %v4562_v22 = vpop.permute.xlu0 %1711 }
 0x4c1   : > { %5865 = vst [vmem:[#allocation55_spill] sm:$0xff] %v4562_v22 }
 0x4c2   : > { %v4564_v17 = vpop.permute.xlu1 %1713  ;;  %v4566_v10 = vpop.permute.xlu2 %1733 }
 0x4c3   : > { %5866 = vst [vmem:[#allocation56_spill] sm:$0xff] %v4564_v17 }
 0x4c6   : > { %1801 = vrot.lane.b32.xlu0 %v4316_v33, %s3315_s28 }
 0x4c8   : > { %1803 = vrot.lane.b32.xlu1 %v4328_v61, %s3315_s28  ;;  %1805 = vrot.lane.b32.xlu2 %v4332_v51, %s3315_s28  ;;  %v4574_v32 = vpop.permute.xlu0 %1717 }
 0x4c9   : > { %5867 = vst [vmem:[#allocation57_spill] sm:$0xff] %v4574_v32 }
 0x4ca   : > { %v4576_v55 = vpop.permute.xlu1 %1719  ;;  %v4578_v47 = vpop.permute.xlu2 %1739 }
 0x4cb   : > { %5868 = vst [vmem:[#allocation58_spill] sm:$0xff] %v4576_v55 }
 0x4ce   : > { %1807 = vrot.lane.b32.xlu0 %v4330_v49, %s3315_s28 }
 0x4d0   : > { %1809 = vrot.lane.b32.xlu1 %v4341_v11, %s3315_s28  ;;  %1811 = vrot.lane.b32.xlu2 %v4345_v16, %s3315_s28  ;;  %v4586_v17 = vpop.permute.xlu0 %1723 }
 0x4d1   : > { %5869 = vst [vmem:[#allocation59_spill] sm:$0xff] %v4586_v17 }
 0x4d2   : > { %v4588_v22 = vpop.permute.xlu1 %1725  ;;  %v4590_v23 = vpop.permute.xlu2 %1745 }
 0x4d3   : > { %5870 = vst [vmem:[#allocation60_spill] sm:$0xff] %v4590_v23 }
 0x4d6   : > { %1813 = vrot.lane.b32.xlu0 %v4343_v38, %s3315_s28 }
 0x4d8   : > { %1815 = vrot.lane.b32.xlu1 %v4354_v42, %s3315_s28  ;;  %1817 = vrot.lane.b32.xlu2 %v4358_v36, %s3315_s28  ;;  %v4598_v55 = vpop.permute.xlu0 %1729 }
 0x4da   : > { %v4600_v32 = vpop.permute.xlu1 %1731  ;;  %v4602_v20 = vpop.permute.xlu2 %1751 }
 0x4db   : > { %5871 = vst [vmem:[#allocation61_spill] sm:$0xff] %v4602_v20 }
 0x4de   : > { %1819 = vrot.lane.b32.xlu0 %v4356_v44, %s3315_s28 }
 0x4e0   : > { %1821 = vrot.lane.b32.xlu1 %v4366_v35, %s3315_s28  ;;  %1823 = vrot.lane.b32.xlu2 %v4368_v24, %s3315_s28  ;;  %v4610_v17 = vpop.permute.xlu0 %1735 }
 0x4e2   : > { %v4612_v6 = vpop.permute.xlu1 %1737  ;;  %v4614_v46 = vpop.permute.xlu2 %1757 }
 0x4e3   : > { %5872 = vst [vmem:[#allocation62_spill] sm:$0xff] %v4614_v46 }
 0x4e6   : > { %1857 = vrot.lane.b32.xlu0 %v4233_v31, %s3314_s12 }
 0x4e8   : > { %1859 = vrot.lane.b32.xlu1 %v4246_v40, %s3314_s12  ;;  %1861 = vrot.lane.b32.xlu2 %v4240_v48, %s3314_s12  ;;  %v4622_v4 = vpop.permute.xlu0 %1741 }
 0x4e9   : > { %5873 = vst [vmem:[#allocation63_spill] sm:$0xff] %v4622_v4 }
 0x4ea   : > { %v4624_v20 = vpop.permute.xlu1 %1743  ;;  %v4626_v43 = vpop.permute.xlu2 %1763 }
 0x4eb   : > { %5874 = vst [vmem:[#allocation64_spill] sm:$0xff] %v4626_v43 }
 0x4ee   : > { %1863 = vrot.lane.b32.xlu0 %v4250_v14, %s3314_s12 }
 0x4f0   : > { %1865 = vrot.lane.b32.xlu1 %v4238_v27, %s3314_s12  ;;  %1867 = vrot.lane.b32.xlu2 %v4248_v19, %s3314_s12  ;;  %v4634_v46 = vpop.permute.xlu0 %1747 }
 0x4f1   : > { %5875 = vst [vmem:[#allocation65_spill] sm:$0xff] %v4634_v46 }
 0x4f2   : > { %v4636_v54 = vpop.permute.xlu1 %1749  ;;  %v4638_v3 = vpop.permute.xlu2 %1769 }
 0x4f3   : > { %5876 = vst [vmem:[#allocation66_spill] sm:$0xff] %v4638_v3 }
 0x4f6   : > { %1869 = vrot.lane.b32.xlu0 %v4260_v18, %s3314_s12 }
 0x4f8   : > { %1871 = vrot.lane.b32.xlu1 %v4264_v57, %s3314_s12  ;;  %1873 = vrot.lane.b32.xlu2 %v4262_v52, %s3314_s12  ;;  %v4646_v43 = vpop.permute.xlu0 %1753 }
 0x4f9   : > { %5877 = vst [vmem:[#allocation67_spill] sm:$0xff] %v4646_v43 }
 0x4fa   : > { %v4648_v25 = vpop.permute.xlu1 %1755  ;;  %v4650_v23 = vpop.permute.xlu2 %1775 }
 0x4fb   : > { %5878 = vst [vmem:[#allocation68_spill] sm:$0xff] %v4650_v23 }
 0x4fe   : > { %1875 = vrot.lane.b32.xlu0 %v4274_v50, %s3314_s12 }
 0x500   : > { %1877 = vrot.lane.b32.xlu1 %v4278_v62, %s3314_s12  ;;  %1879 = vrot.lane.b32.xlu2 %v4276_v60, %s3314_s12  ;;  %v4658_v3 = vpop.permute.xlu0 %1759 }
 0x501   : > { %5879 = vst [vmem:[#allocation69_spill] sm:$0xff] %v4658_v3 }
 0x502   : > { %v4660_v46 = vpop.permute.xlu1 %1761  ;;  %v4662_v63 = vpop.permute.xlu2 %1781 }
 0x503   : > { %5880 = vst [vmem:[#allocation70_spill] sm:$0xff] %v4660_v46 }
 0x504   : > { %5881 = vst [vmem:[#allocation71_spill] sm:$0xff] %v4662_v63 }
 0x506   : > { %1881 = vrot.lane.b32.xlu0 %v4287_v15, %s3314_s12 }
 0x508   : > { %1883 = vrot.lane.b32.xlu1 %v4291_v30, %s3314_s12  ;;  %1885 = vrot.lane.b32.xlu2 %v4289_v5, %s3314_s12  ;;  %v4670_v23 = vpop.permute.xlu0 %1765 }
 0x509   : > { %5882 = vst [vmem:[#allocation72_spill] sm:$0xff] %v4670_v23 }
 0x50a   : > { %v4672_v43 = vpop.permute.xlu1 %1767  ;;  %v4674_v21 = vpop.permute.xlu2 %1787 }
 0x50b   : > { %5883 = vst [vmem:[#allocation73_spill] sm:$0xff] %v4672_v43 }
 0x50c   : > { %5884 = vst [vmem:[#allocation74_spill] sm:$0xff] %v4674_v21 }
 0x50e   : > { %1887 = vrot.lane.b32.xlu0 %v4301_v7, %s3314_s12 }
 0x510   : > { %1889 = vrot.lane.b32.xlu1 %v4305_v29, %s3314_s12  ;;  %1891 = vrot.lane.b32.xlu2 %v4303_v28, %s3314_s12  ;;  %v4682_v3 = vpop.permute.xlu0 %1771 }
 0x511   : > { %5885 = vst [vmem:[#allocation75_spill] sm:$0xff] %v4682_v3 }
 0x512   : > { %v4684_v63 = vpop.permute.xlu1 %1773  ;;  %v4686_v46 = vpop.permute.xlu2 %1793 }
 0x513   : > { %5886 = vst [vmem:[#allocation76_spill] sm:$0xff] %v4684_v63 }
 0x516   : > { %1893 = vrot.lane.b32.xlu0 %v4314_v9, %s3314_s12 }
 0x518   : > { %1895 = vrot.lane.b32.xlu1 %v4318_v39, %s3314_s12  ;;  %1897 = vrot.lane.b32.xlu2 %v4316_v33, %s3314_s12  ;;  %v4694_v21 = vpop.permute.xlu0 %1777 }
 0x519   : > { %5887 = vst [vmem:[#allocation77_spill] sm:$0xff] %v4694_v21 }
 0x51a   : > { %v4696_v23 = vpop.permute.xlu1 %1779  ;;  %v4698_v43 = vpop.permute.xlu2 %1799 }
 0x51b   : > { %5888 = vst [vmem:[#allocation78_spill] sm:$0xff] %v4696_v23 }
 0x51e   : > { %1899 = vrot.lane.b32.xlu0 %v4328_v61, %s3314_s12 }
 0x520   : > { %1901 = vrot.lane.b32.xlu1 %v4332_v51, %s3314_s12  ;;  %1903 = vrot.lane.b32.xlu2 %v4330_v49, %s3314_s12  ;;  %v4706_v3 = vpop.permute.xlu0 %1783 }
 0x521   : > { %5889 = vst [vmem:[#allocation79_spill] sm:$0xff] %v4706_v3 }
 0x522   : > { %v4708_v63 = vpop.permute.xlu1 %1785  ;;  %v4710_v4 = vpop.permute.xlu2 %1805 }
 0x523   : > { %5890 = vst [vmem:[#allocation80_spill] sm:$0xff] %v4708_v63 }
 0x524   : > { %5891 = vst [vmem:[#allocation81_spill] sm:$0xff] %v4710_v4 }
 0x526   : > { %1905 = vrot.lane.b32.xlu0 %v4341_v11, %s3314_s12 }
 0x528   : > { %1907 = vrot.lane.b32.xlu1 %v4345_v16, %s3314_s12  ;;  %1909 = vrot.lane.b32.xlu2 %v4343_v38, %s3314_s12  ;;  %v1790_v21 = vpop.permute.xlu0 %1789 }
 0x52a   : > { %v4718_v23 = vpop.permute.xlu1 %1791  ;;  %v4720_v34 = vpop.permute.xlu2 %1811 }
 0x52b   : > { %5892 = vst [vmem:[#allocation82_spill] sm:$0xff] %v4720_v34 }
 0x52e   : > { %1911 = vrot.lane.b32.xlu0 %v4354_v42, %s3314_s12 }
 0x530   : > { %1913 = vrot.lane.b32.xlu1 %v4358_v36, %s3314_s12  ;;  %1915 = vrot.lane.b32.xlu2 %v4356_v44, %s3314_s12  ;;  %v1796_v3 = vpop.permute.xlu0 %1795 }
 0x532   : > { %v4728_v63 = vpop.permute.xlu1 %1797  ;;  %v4730_v16 = vpop.permute.xlu2 %1817 }
 0x533   : > { %5893 = vst [vmem:[#allocation83_spill] sm:$0xff] %v4730_v16 }
 0x536   : > { %1917 = vrot.lane.b32.xlu0 %v4366_v35, %s3314_s12 }
 0x538   : > { %1919 = vrot.lane.b32.xlu1 %v4368_v24, %s3314_s12  ;;  %1921 = vrot.lane.b32.xlu2 %v4233_v31, %s3313_s10  ;;  %v1802_v34 = vpop.permute.xlu0 %1801  ;;  %s3055_s12 = sshll.u32 %s3384_s8, 3  ;;  %s2883_s8 = scalar_lea.sflag [#allocation6], %s3451_s21 }
 0x539   : > { %s2894_s13 = scalar_lea.hbm %s5774_s7, %s3055_s12 }
 0x53a   : > { %v4738_v11 = vpop.permute.xlu1 %1803  ;;  %v4740_v4 = vpop.permute.xlu2 %1823  ;;  %s2898_s9 = sshll.u32 %s2894_s13, 4  ;;  %s2899_s9 = int_to_ptr.hbm [resolvable:$true] %s2898_s9 }
 0x53b   : > { %5894 = vst [vmem:[#allocation84_spill] sm:$0xff] %v4740_v4  ;;  %s3240_s19 = sshra.s32 %s2899_s9, 4  ;;  %s3241_s19 = int_to_ptr.hbm [resolvable:$true] %s3240_s19 }
 0x53c   : > { %s3242_s3 = scalar_lea.hbm %s3241_s19, 8  ;;  %p3247_p8 = scmp.lt.s32.totalorder %s3241_s19, %s5774_s7 }
 0x53d   : > { %p3243_p3 = scmp.ne.s32.totalorder %s3241_s19, %s3242_s3 }
 0x53e   : > { %1923 = vrot.lane.b32.xlu0 %v4246_v40, %s3313_s10 }
 0x53f   : > { %p3244_p5 = pnand %p3243_p3, %p3420_p13 }
 0x540   : > { %1925 = vrot.lane.b32.xlu1 %v4240_v48, %s3313_s10  ;;  %1927 = vrot.lane.b32.xlu2 %v4250_v14, %s3313_s10  ;;  %v4748_v16 = vpop.permute.xlu0 %1807 }
 0x541   : > { %p3245_p12 = pneg %p3244_p5 }
 0x542   : > { %v4750_v42 = vpop.permute.xlu1 %1809  ;;  %v4752_v51 = vpop.permute.xlu2 %1861 }
 0x543   : > { %5895 = vst [vmem:[#allocation85_spill] sm:$0xff] %v4752_v51 }
 0x546   : > { %1929 = vrot.lane.b32.xlu0 %v4238_v27, %s3313_s10 }
 0x548   : > { %1931 = vrot.lane.b32.xlu1 %v4248_v19, %s3313_s10  ;;  %1933 = vrot.lane.b32.xlu2 %v4260_v18, %s3313_s10  ;;  %v4760_v4 = vpop.permute.xlu0 %1813 }
 0x54a   : > { %v4762_v48 = vpop.permute.xlu1 %1815  ;;  %v4764_v40 = vpop.permute.xlu2 %1867 }
 0x54b   : > { %5896 = vst [vmem:[#allocation86_spill] sm:$0xff] %v4762_v48 }
 0x54c   : > { %5897 = vst [vmem:[#allocation87_spill] sm:$0xff] %v4764_v40 }
 0x54e   : > { %1935 = vrot.lane.b32.xlu0 %v4264_v57, %s3313_s10 }
 0x550   : > { %1937 = vrot.lane.b32.xlu1 %v4262_v52, %s3313_s10  ;;  %1939 = vrot.lane.b32.xlu2 %v4274_v50, %s3313_s10  ;;  %v4772_v27 = vpop.permute.xlu0 %1819 }
 0x552   : > { %v4774_v19 = vpop.permute.xlu1 %1821  ;;  %v4776_v51 = vpop.permute.xlu2 %1873 }
 0x553   : > { %5898 = vst [vmem:[#allocation88_spill] sm:$0xff] %v4774_v19 }
 0x554   : > { %5899 = vst [vmem:[#allocation89_spill] sm:$0xff] %v4776_v51  ;;  %v2194_v51 = vsel %vm4793_vm4, %v4289_v5, %v4420_v12 }
 0x556   : > { %1941 = vrot.lane.b32.xlu0 %v4278_v62, %s3313_s10 }
 0x558   : > { %1943 = vrot.lane.b32.xlu1 %v4276_v60, %s3313_s10  ;;  %1945 = vrot.lane.b32.xlu2 %v4287_v15, %s3313_s10  ;;  %v4784_v57 = vpop.permute.xlu0 %1857  ;;  %v2270_v60 = vsel %vm1420_vm1, %v2194_v51, %v4588_v22  ;;  %v2197_v51 = vsel %vm4793_vm4, %v4303_v28, %v4432_v41  ;;  %v2200_v41 = vsel %vm4793_vm4, %v4316_v33, %v4444_v26 }
 0x559   : > { %v2357_v12 = vsel %vm4810_vm5, %v2270_v60, %v1790_v21  ;;  %v2203_v26 = vsel %vm4793_vm4, %v4330_v49, %v4456_v58 }
 0x55a   : > { %v4786_v52 = vpop.permute.xlu1 %1859  ;;  %v4788_v40 = vpop.permute.xlu2 %1879 }
 0x55b   : > { %5900 = vst [vmem:[#allocation90_spill] sm:$0xff] %v4786_v52 }
 0x55c   : > { %5901 = vst [vmem:[#allocation91_spill] sm:$0xff] %v4788_v40 }
 0x55e   : > { %1947 = vrot.lane.b32.xlu0 %v4291_v30, %s3313_s10 }
 0x560   : > { %1949 = vrot.lane.b32.xlu1 %v4289_v5, %s3313_s10  ;;  %1981 = vrot.lane.b32.xlu2 %v4366_v35, %s3313_s10  ;;  %v4805_v40 = vpop.permute.xlu0 %1863 }
 0x562   : > { %v4814_v52 = vpop.permute.xlu1 %1865  ;;  %v1886_v50 = vpop.permute.xlu2 %1885 }
 0x563   : > { %v4819_v48 = vsel %vm400_vm0, %v2357_v12, %v1886_v50  ;;  %v2282_v50 = vsel %vm1420_vm1, %v2197_v51, %v4600_v32 }
 0x564   : > { %5906 = vst [vmem:[#allocation92_spill] sm:$0xff] %v4819_v48  ;;  %v2360_v12 = vsel %vm4810_vm5, %v2282_v50, %v1796_v3  ;;  %v2294_v3 = vsel %vm1420_vm1, %v2200_v41, %v4612_v6 }
 0x566   : > { %1983 = vrot.lane.b32.xlu0 %v4368_v24, %s3313_s10 }
 0x568   : > { %2077 = vrot.lane.b32.xlu1 %v4366_v35, %s3312_s30  ;;  %2079 = vrot.lane.b32.xlu2 %v4368_v24, %s3312_s30  ;;  %v4831_v22 = vpop.permute.xlu0 %1869 }
 0x56a   : > { %v4835_v60 = vpop.permute.xlu1 %1871  ;;  %v1892_v21 = vpop.permute.xlu2 %1891 }
 0x56b   : > { %v4840_v48 = vsel %vm400_vm0, %v2360_v12, %v1892_v21  ;;  %v2363_v21 = vsel %vm4810_vm5, %v2294_v3, %v1802_v34  ;;  %v2306_v34 = vsel %vm1420_vm1, %v2203_v26, %v4624_v20  ;;  %v2206_v26 = vsel %vm4793_vm4, %v4343_v38, %v4468_v53 }
 0x56c   : > { %5907 = vst [vmem:[#allocation93_spill] sm:$0xff] %v4840_v48  ;;  %v2318_v53 = vsel %vm1420_vm1, %v2206_v26, %v4636_v54  ;;  %v2198_v54 = vsel %vm4793_vm4, %v4314_v9, %v4478_v45  ;;  %v2199_v26 = vsel %vm4793_vm4, %v4318_v39, %v4482_v0  ;;  %v5962_v48 = vld [vmem:[#allocation21_spill] sm:$0xff] }
 0x56d   : > { %v2290_v45 = vsel %vm1420_vm1, %v2199_v26, %v4610_v17  ;;  %v5921_v26 = vld [vmem:[#allocation81_spill] sm:$0xff] }
 0x56e   : > { %2141 = vrot.lane.b32.xlu0 %v4366_v35, %s3311_s23 }
 0x570   : > { %2143 = vrot.lane.b32.xlu1 %v4368_v24, %s3311_s23  ;;  %1951 = vrot.lane.b32.xlu2 %v4301_v7, %s3313_s10  ;;  %v4852_v32 = vpop.permute.xlu0 %1875 }
 0x572   : > { %v4856_v51 = vpop.permute.xlu1 %1877  ;;  %v1898_v50 = vpop.permute.xlu2 %1897 }
 0x573   : > { %v4861_v12 = vsel %vm400_vm0, %v2363_v21, %v1898_v50  ;;  %v2366_v50 = vsel %vm4810_vm5, %v2306_v34, %v4748_v16  ;;  %v2195_v21 = vsel %vm4793_vm4, %v4301_v7, %v4466_v59  ;;  %v2196_v16 = vsel %vm4793_vm4, %v4305_v29, %v4470_v37 }
 0x574   : > { %5908 = vst [vmem:[#allocation94_spill] sm:$0xff] %v4861_v12  ;;  %v2274_v20 = vsel %vm1420_vm1, %v2195_v21, %v4554_v56  ;;  %v2278_v34 = vsel %vm1420_vm1, %v2196_v16, %v4598_v55  ;;  %v6005_v12 = vld [vmem:[#allocation88_spill] sm:$0xff] }
 0x575   : > { %v2358_v56 = vsel %vm4810_vm5, %v2274_v20, %v4718_v23  ;;  %v2369_v23 = vsel %vm4810_vm5, %v2318_v53, %v4760_v4  ;;  %v2209_v4 = vsel %vm4793_vm4, %v4356_v44, %v4480_v8 }
 0x576   : > { %1977 = vrot.lane.b32.xlu0 %v4358_v36, %s3313_s10  ;;  %v2330_v8 = vsel %vm1420_vm1, %v2209_v4, %v4648_v25  ;;  %v2201_v25 = vsel %vm4793_vm4, %v4328_v61, %v4490_v2 }
 0x578   : > { %1979 = vrot.lane.b32.xlu1 %v4356_v44, %s3313_s10  ;;  %2045 = vrot.lane.b32.xlu2 %v4289_v5, %s3312_s30  ;;  %v4873_v6 = vpop.permute.xlu0 %1881 }
 0x57a   : > { %v4877_v41 = vpop.permute.xlu1 %1883  ;;  %v1904_v3 = vpop.permute.xlu2 %1903 }
 0x57b   : > { %v4883_v58 = vsel %vm400_vm0, %v2366_v50, %v1904_v3  ;;  %v2359_v50 = vsel %vm4810_vm5, %v2278_v34, %v4686_v46  ;;  %v2286_v46 = vsel %vm1420_vm1, %v2198_v54, %v4566_v10  ;;  %v5912_v34 = vld [vmem:[#allocation23_spill] sm:$0xff] }
 0x57c   : > { %v2202_v53 = vsel %vm4793_vm4, %v5912_v34, %v4492_v13  ;;  %v5917_v13 = vld [vmem:[#allocation63_spill] sm:$0xff] }
 0x57e   : > { %2047 = vrot.lane.b32.xlu0 %v4301_v7, %s3312_s30 }
 0x580   : > { %2073 = vrot.lane.b32.xlu1 %v4358_v36, %s3312_s30  ;;  %2075 = vrot.lane.b32.xlu2 %v4356_v44, %s3312_s30  ;;  %v1888_v59 = vpop.permute.xlu0 %1887 }
 0x581   : > { %v4913_v3 = vsel %vm400_vm0, %v2358_v56, %v1888_v59 }
 0x582   : > { %v1890_v37 = vpop.permute.xlu1 %1889  ;;  %v1910_v21 = vpop.permute.xlu2 %1909 }
 0x583   : > { %v4922_v20 = vsel %vm400_vm0, %v2359_v50, %v1890_v37  ;;  %v4925_v55 = vsel %vm400_vm0, %v2369_v23, %v1910_v21  ;;  %v5913_v37 = vld [vmem:[#allocation40_spill] sm:$0xff]  ;;  %v2302_v21 = vsel %vm1420_vm1, %v2202_v53, %v5917_v13  ;;  %v5918_v23 = vld [vmem:[#allocation70_spill] sm:$0xff]  ;;  %v5928_v53 = vld [vmem:[#allocation25_spill] sm:$0xff] }
 0x584   : > { %5909 = vst [vmem:[#allocation95_spill] sm:$0xff] %v4922_v20  ;;  %v5975_v20 = vld [vmem:[#allocation54_spill] sm:$0xff] }
 0x586   : > { %2109 = vrot.lane.b32.xlu0 %v4289_v5, %s3311_s23  ;;  %v2361_v5 = vsel %vm4810_vm5, %v2286_v46, %v4728_v63  ;;  %v2372_v63 = vsel %vm4810_vm5, %v2330_v8, %v4772_v27  ;;  %v2180_v27 = vsel %vm4793_vm4, %v4233_v31, %v4406_v1 }
 0x587   : > { %v2214_v50 = vsel %vm1420_vm1, %v2180_v27, %v5913_v37 }
 0x588   : > { %2111 = vrot.lane.b32.xlu1 %v4301_v7, %s3311_s23  ;;  %2137 = vrot.lane.b32.xlu2 %v4358_v36, %s3311_s23  ;;  %v1894_v10 = vpop.permute.xlu0 %1893  ;;  %v2362_v7 = vsel %vm4810_vm5, %v2290_v45, %v4698_v43  ;;  %v2298_v43 = vsel %vm1420_vm1, %v2201_v25, %v4578_v47  ;;  %v2343_v54 = vsel %vm4810_vm5, %v2214_v50, %v5918_v23  ;;  %v5926_v25 = vld [vmem:[#allocation60_spill] sm:$0xff]  ;;  %v5929_v50 = vld [vmem:[#allocation43_spill] sm:$0xff] }
 0x589   : > { %v4955_v16 = vsel %vm400_vm0, %v2361_v5, %v1894_v10  ;;  %v2364_v1 = vsel %vm4810_vm5, %v2298_v43, %v4738_v11  ;;  %v5009_v4 = vsel %vm400_vm0, %v2343_v54, %v4784_v57  ;;  %v2365_v5 = vsel %vm4810_vm5, %v2302_v21, %v5921_v26  ;;  %v5927_v43 = vld [vmem:[#allocation42_spill] sm:$0xff]  ;;  %v5930_v21 = vld [vmem:[#allocation65_spill] sm:$0xff] }
 0x58a   : > { %5910 = vst [vmem:[#allocation96_spill] sm:$0xff] %v4955_v16  ;;  %v1896_v0 = vpop.permute.xlu1 %1895  ;;  %v1916_v56 = vpop.permute.xlu2 %1915  ;;  %v2205_v37 = vsel %vm4793_vm4, %v5928_v53, %v5927_v43  ;;  %v5931_v54 = vld [vmem:[#allocation73_spill] sm:$0xff]  ;;  %v5936_v43 = vld [vmem:[#allocation34_spill] sm:$0xff]  ;;  %v5987_v16 = vld [vmem:[#allocation68_spill] sm:$0xff] }
 0x58b   : > { %v4964_v59 = vsel %vm400_vm0, %v2362_v7, %v1896_v0  ;;  %v4967_v17 = vsel %vm400_vm0, %v2372_v63, %v1916_v56  ;;  %5920 = vst [vmem:[#allocation40_spill] sm:$0xff] %v5009_v4  ;;  %v5923_v0 = vld [vmem:[#allocation41_spill] sm:$0xff]  ;;  %v5924_v7 = vld [vmem:[#allocation24_spill] sm:$0xff]  ;;  %v2314_v23 = vsel %vm1420_vm1, %v2205_v37, %v5930_v21  ;;  %v2186_v37 = vsel %vm4793_vm4, %v4260_v18, %v5936_v43  ;;  %v5939_v21 = vld [vmem:[#allocation46_spill] sm:$0xff] }
 0x58c   : > { %5911 = vst [vmem:[#allocation97_spill] sm:$0xff] %v4964_v59  ;;  %v2204_v57 = vsel %vm4793_vm4, %v5924_v7, %v5923_v0  ;;  %v5925_v56 = vld [vmem:[#allocation33_spill] sm:$0xff]  ;;  %v5995_v59 = vld [vmem:[#allocation58_spill] sm:$0xff] }
 0x58d   : > { %v2183_v63 = vsel %vm4793_vm4, %v4250_v14, %v5925_v56  ;;  %v2310_v27 = vsel %vm1420_vm1, %v2204_v57, %v5926_v25  ;;  %v5933_v57 = vld [vmem:[#allocation82_spill] sm:$0xff]  ;;  %v5956_v25 = vld [vmem:[#allocation64_spill] sm:$0xff] }
 0x58e   : > { %2139 = vrot.lane.b32.xlu0 %v4356_v44, %s3311_s23  ;;  %v5914_v44 = vld [vmem:[#allocation26_spill] sm:$0xff] }
 0x590   : > { %1973 = vrot.lane.b32.xlu1 %v4343_v38, %s3313_s10  ;;  %1975 = vrot.lane.b32.xlu2 %v5914_v44, %s3313_s10  ;;  %v1900_v2 = vpop.permute.xlu0 %1899 }
 0x591   : > { %v5005_v46 = vsel %vm400_vm0, %v2364_v1, %v1900_v2  ;;  %v2226_v1 = vsel %vm1420_vm1, %v2183_v63, %v5929_v50  ;;  %v2367_v2 = vsel %vm4810_vm5, %v2310_v27, %v4750_v42  ;;  %v2368_v42 = vsel %vm4810_vm5, %v2314_v23, %v5933_v57  ;;  %v5935_v27 = vld [vmem:[#allocation44_spill] sm:$0xff]  ;;  %v5937_v50 = vld [vmem:[#allocation61_spill] sm:$0xff]  ;;  %v5941_v57 = vld [vmem:[#allocation67_spill] sm:$0xff] }
 0x592   : > { %5919 = vst [vmem:[#allocation23_spill] sm:$0xff] %v5005_v46  ;;  %v1902_v11 = vpop.permute.xlu1 %1901  ;;  %v5014_v10 = vpop.permute.xlu2 %1921  ;;  %v2238_v23 = vsel %vm1420_vm1, %v2186_v37, %v5939_v21  ;;  %v5957_v21 = vld [vmem:[#allocation51_spill] sm:$0xff] }
 0x593   : > { %5922 = vst [vmem:[#allocation26_spill] sm:$0xff] %v5014_v10  ;;  %v5017_v45 = vsel %vm400_vm0, %v2365_v5, %v1902_v11  ;;  %v2346_v11 = vsel %vm4810_vm5, %v2226_v1, %v5931_v54  ;;  %v5940_v54 = vld [vmem:[#allocation86_spill] sm:$0xff] }
 0x594   : > { %v5058_v5 = vsel %vm400_vm0, %v2346_v11, %v4805_v40  ;;  %v2207_v40 = vsel %vm4793_vm4, %v5914_v44, %v5935_v27  ;;  %v5942_v27 = vld [vmem:[#allocation76_spill] sm:$0xff]  ;;  %v5959_v10 = vld [vmem:[#allocation90_spill] sm:$0xff] }
 0x595   : > { %5932 = vst [vmem:[#allocation63_spill] sm:$0xff] %v5058_v5  ;;  %v2322_v1 = vsel %vm1420_vm1, %v2207_v40, %v5937_v50  ;;  %v5944_v50 = vld [vmem:[#allocation83_spill] sm:$0xff] }
 0x596   : > { %2041 = vrot.lane.b32.xlu0 %v4287_v15, %s3312_s30  ;;  %v2370_v11 = vsel %vm4810_vm5, %v2322_v1, %v5940_v54  ;;  %v5982_v5 = vld [vmem:[#allocation35_spill] sm:$0xff] }
 0x598   : > { %2043 = vrot.lane.b32.xlu1 %v4291_v30, %s3312_s30  ;;  %2069 = vrot.lane.b32.xlu2 %v4343_v38, %s3312_s30  ;;  %v1906_v13 = vpop.permute.xlu0 %1905 }
 0x599   : > { %v5054_v26 = vsel %vm400_vm0, %v2367_v2, %v1906_v13  ;;  %v5938_v2 = vld [vmem:[#allocation45_spill] sm:$0xff] }
 0x59a   : > { %v1908_v0 = vpop.permute.xlu1 %1907  ;;  %v5063_v56 = vpop.permute.xlu2 %1927  ;;  %v2208_v13 = vsel %vm4793_vm4, %v4358_v36, %v5938_v2  ;;  %v2349_v36 = vsel %vm4810_vm5, %v2238_v23, %v5942_v27  ;;  %v5947_v23 = vld [vmem:[#allocation20_spill] sm:$0xff] }
 0x59b   : > { %5934 = vst [vmem:[#allocation70_spill] sm:$0xff] %v5063_v56  ;;  %v5066_v63 = vsel %vm400_vm0, %v2368_v42, %v1908_v0  ;;  %v2326_v42 = vsel %vm1420_vm1, %v2208_v13, %v5941_v57  ;;  %v5107_v43 = vsel %vm400_vm0, %v2349_v36, %v4831_v22  ;;  %v5946_v22 = vld [vmem:[#allocation36_spill] sm:$0xff] }
 0x59c   : > { %5943 = vst [vmem:[#allocation81_spill] sm:$0xff] %v5107_v43  ;;  %v2371_v1 = vsel %vm4810_vm5, %v2326_v42, %v5944_v50  ;;  %v2189_v54 = vsel %vm4793_vm4, %v5947_v23, %v5946_v22  ;;  %v5949_v42 = vld [vmem:[#allocation78_spill] sm:$0xff]  ;;  %v5950_v50 = vld [vmem:[#allocation32_spill] sm:$0xff] }
 0x59d   : > { %v6006_v43 = vld [vmem:[#allocation84_spill] sm:$0xff] }
 0x59e   : > { %2071 = vrot.lane.b32.xlu0 %v5914_v44, %s3312_s30 }
 0x5a0   : > { %2105 = vrot.lane.b32.xlu1 %v4287_v15, %s3311_s23  ;;  %2107 = vrot.lane.b32.xlu2 %v4291_v30, %s3311_s23  ;;  %v1912_v0 = vpop.permute.xlu0 %1911 }
 0x5a1   : > { %v5103_v40 = vsel %vm400_vm0, %v2370_v11, %v1912_v0  ;;  %v5948_v11 = vld [vmem:[#allocation49_spill] sm:$0xff] }
 0x5a2   : > { %v1914_v37 = vpop.permute.xlu1 %1913  ;;  %v5112_v2 = vpop.permute.xlu2 %1933  ;;  %v2250_v0 = vsel %vm1420_vm1, %v2189_v54, %v5948_v11  ;;  %v5952_v54 = vld [vmem:[#allocation50_spill] sm:$0xff] }
 0x5a3   : > { %5945 = vst [vmem:[#allocation41_spill] sm:$0xff] %v5112_v2  ;;  %v5115_v13 = vsel %vm400_vm0, %v2371_v1, %v1914_v37  ;;  %v5951_v1 = vld [vmem:[#allocation16_spill] sm:$0xff] }
 0x5a4   : > { %v2181_v22 = vsel %vm4793_vm4, %v5951_v1, %v5950_v50 }
 0x5a5   : > { %v2218_v11 = vsel %vm1420_vm1, %v2181_v22, %v5952_v54  ;;  %v5958_v54 = vld [vmem:[#allocation52_spill] sm:$0xff] }
 0x5a6   : > { %2133 = vrot.lane.b32.xlu0 %v4343_v38, %s3311_s23  ;;  %v2352_v38 = vsel %vm4810_vm5, %v2250_v0, %v5949_v42  ;;  %v5954_v0 = vld [vmem:[#allocation15_spill] sm:$0xff]  ;;  %v2344_v50 = vsel %vm4810_vm5, %v2218_v11, %v5956_v25  ;;  %v5966_v11 = vld [vmem:[#allocation85_spill] sm:$0xff] }
 0x5a7   : > { %v5140_v27 = vsel %vm400_vm0, %v2352_v38, %v4852_v32  ;;  %v5953_v32 = vld [vmem:[#allocation31_spill] sm:$0xff]  ;;  %v5955_v38 = vld [vmem:[#allocation38_spill] sm:$0xff]  ;;  %v5175_v4 = vsel %vm400_vm0, %v2344_v50, %v5959_v10  ;;  %v5972_v10 = vld [vmem:[#allocation28_spill] sm:$0xff] }
 0x5a8   : > { %2135 = vrot.lane.b32.xlu1 %v5914_v44, %s3311_s23  ;;  %1969 = vrot.lane.b32.xlu2 %v5924_v7, %s3313_s10  ;;  %v5133_v57 = vpop.permute.xlu0 %1917  ;;  %v2182_v42 = vsel %vm4793_vm4, %v5954_v0, %v5953_v32  ;;  %v2192_v8 = vsel %vm4793_vm4, %v4287_v15, %v5955_v38  ;;  %5960 = vst [vmem:[#allocation24_spill] sm:$0xff] %v5175_v4  ;;  %v5961_v32 = vld [vmem:[#allocation22_spill] sm:$0xff]  ;;  %v5964_v38 = vld [vmem:[#allocation72_spill] sm:$0xff] }
 0x5a9   : > { %v2222_v22 = vsel %vm1420_vm1, %v2182_v42, %v5957_v21  ;;  %v2262_v44 = vsel %vm1420_vm1, %v2192_v8, %v5958_v54  ;;  %v5965_v21 = vld [vmem:[#allocation80_spill] sm:$0xff]  ;;  %v5974_v4 = vld [vmem:[#allocation66_spill] sm:$0xff] }
 0x5aa   : > { %v5142_v36 = vpop.permute.xlu1 %1919  ;;  %v5144_v37 = vpop.permute.xlu2 %1939  ;;  %v2345_v25 = vsel %vm4810_vm5, %v2222_v22, %v5964_v38  ;;  %v2355_v8 = vsel %vm4810_vm5, %v2262_v44, %v5965_v21  ;;  %v5970_v21 = vld [vmem:[#allocation14_spill] sm:$0xff] }
 0x5ab   : > { %v5195_v42 = vsel %vm400_vm0, %v2345_v25, %v5966_v11  ;;  %v5199_v50 = vsel %vm400_vm0, %v2355_v8, %v4873_v6  ;;  %v5969_v25 = vld [vmem:[#allocation27_spill] sm:$0xff]  ;;  %v5971_v8 = vld [vmem:[#allocation53_spill] sm:$0xff] }
 0x5ac   : > { %5967 = vst [vmem:[#allocation60_spill] sm:$0xff] %v5195_v42  ;;  %v2184_v6 = vsel %vm4793_vm4, %v5970_v21, %v5969_v25 }
 0x5ad   : > { %v2230_v11 = vsel %vm1420_vm1, %v2184_v6, %v5971_v8 }
 0x5ae   : > { %1971 = vrot.lane.b32.xlu0 %v5928_v53, %s3313_s10  ;;  %v2347_v38 = vsel %vm4810_vm5, %v2230_v11, %v5974_v4  ;;  %v5979_v4 = vld [vmem:[#allocation87_spill] sm:$0xff] }
 0x5af   : > { %v5232_v25 = vsel %vm400_vm0, %v2347_v38, %v4814_v52 }
 0x5b0   : > { %2037 = vrot.lane.b32.xlu1 %v5961_v32, %s3312_s30  ;;  %2039 = vrot.lane.b32.xlu2 %v5962_v48, %s3312_s30  ;;  %v5181_v15 = vpop.permute.xlu0 %1923  ;;  %5976 = vst [vmem:[#allocation25_spill] sm:$0xff] %v5232_v25 }
 0x5b1   : > { %5963 = vst [vmem:[#allocation33_spill] sm:$0xff] %v5181_v15  ;;  %v5973_v15 = vld [vmem:[#allocation17_spill] sm:$0xff] }
 0x5b2   : > { %v5201_v54 = vpop.permute.xlu1 %1925  ;;  %v5203_v22 = vpop.permute.xlu2 %1945  ;;  %v2185_v44 = vsel %vm4793_vm4, %v5973_v15, %v5972_v10  ;;  %v5978_v10 = vld [vmem:[#allocation75_spill] sm:$0xff] }
 0x5b3   : > { %5968 = vst [vmem:[#allocation42_spill] sm:$0xff] %v5201_v54  ;;  %v2234_v56 = vsel %vm1420_vm1, %v2185_v44, %v5975_v20  ;;  %v5984_v54 = vld [vmem:[#allocation55_spill] sm:$0xff] }
 0x5b4   : > { %v2348_v8 = vsel %vm4810_vm5, %v2234_v56, %v5978_v10  ;;  %v5983_v56 = vld [vmem:[#allocation19_spill] sm:$0xff] }
 0x5b5   : > { %v5249_v52 = vsel %vm400_vm0, %v2348_v8, %v5979_v4  ;;  %v2187_v10 = vsel %vm4793_vm4, %v5983_v56, %v5982_v5  ;;  %v5985_v8 = vld [vmem:[#allocation29_spill] sm:$0xff]  ;;  %v5986_v4 = vld [vmem:[#allocation18_spill] sm:$0xff] }
 0x5b6   : > { %2065 = vrot.lane.b32.xlu0 %v5924_v7, %s3312_s30  ;;  %5980 = vst [vmem:[#allocation65_spill] sm:$0xff] %v5249_v52  ;;  %v2242_v20 = vsel %vm1420_vm1, %v2187_v10, %v5984_v54  ;;  %v2188_v42 = vsel %vm4793_vm4, %v5986_v4, %v5985_v8  ;;  %v5989_v10 = vld [vmem:[#allocation77_spill] sm:$0xff] }
 0x5b7   : > { %v2350_v11 = vsel %vm4810_vm5, %v2242_v20, %v5987_v16  ;;  %v5994_v16 = vld [vmem:[#allocation71_spill] sm:$0xff] }
 0x5b8   : > { %2067 = vrot.lane.b32.xlu1 %v5928_v53, %s3312_s30  ;;  %2101 = vrot.lane.b32.xlu2 %v5961_v32, %s3311_s23  ;;  %v5238_v6 = vpop.permute.xlu0 %1929  ;;  %v5278_v5 = vsel %vm400_vm0, %v2350_v11, %v4835_v60  ;;  %v5992_v11 = vld [vmem:[#allocation57_spill] sm:$0xff] }
 0x5b9   : > { %5977 = vst [vmem:[#allocation43_spill] sm:$0xff] %v5238_v6 }
 0x5ba   : > { %v5251_v44 = vpop.permute.xlu1 %1931  ;;  %v5253_v38 = vpop.permute.xlu2 %1981 }
 0x5bb   : > { %5981 = vst [vmem:[#allocation73_spill] sm:$0xff] %v5251_v44  ;;  %v5988_v44 = vld [vmem:[#allocation56_spill] sm:$0xff] }
 0x5bc   : > { %v2246_v52 = vsel %vm1420_vm1, %v2188_v42, %v5988_v44  ;;  %v5990_v42 = vld [vmem:[#allocation89_spill] sm:$0xff] }
 0x5bd   : > { %v2351_v8 = vsel %vm4810_vm5, %v2246_v52, %v5989_v10  ;;  %v5991_v44 = vld [vmem:[#allocation37_spill] sm:$0xff] }
 0x5be   : > { %2103 = vrot.lane.b32.xlu0 %v5962_v48, %s3311_s23  ;;  %v5295_v60 = vsel %vm400_vm0, %v2351_v8, %v5990_v42  ;;  %v2190_v52 = vsel %vm4793_vm4, %v5961_v32, %v5991_v44  ;;  %v5993_v8 = vld [vmem:[#allocation30_spill] sm:$0xff] }
 0x5bf   : > { %v2254_v10 = vsel %vm1420_vm1, %v2190_v52, %v5992_v11  ;;  %v2191_v42 = vsel %vm4793_vm4, %v5962_v48, %v5993_v8  ;;  %v5996_v48 = vld [vmem:[#allocation79_spill] sm:$0xff] }
 0x5c0   : > { %2129 = vrot.lane.b32.xlu1 %v5924_v7, %s3311_s23  ;;  %2131 = vrot.lane.b32.xlu2 %v5928_v53, %s3311_s23  ;;  %v5284_v54 = vpop.permute.xlu0 %1935  ;;  %v2353_v53 = vsel %vm4810_vm5, %v2254_v10, %v5994_v16  ;;  %v2258_v6 = vsel %vm1420_vm1, %v2191_v42, %v5995_v59  ;;  %v5997_v16 = vld [vmem:[#allocation91_spill] sm:$0xff] }
 0x5c1   : > { %v5322_v32 = vsel %vm400_vm0, %v2353_v53, %v4856_v51  ;;  %v2354_v52 = vsel %vm4810_vm5, %v2258_v6, %v5996_v48  ;;  %v5998_v8 = vld [vmem:[#allocation39_spill] sm:$0xff] }
 0x5c2   : > { %v5297_v20 = vpop.permute.xlu1 %1937  ;;  %v2080_v7 = vpop.permute.xlu2 %2079  ;;  %v5339_v51 = vsel %vm400_vm0, %v2354_v52, %v5997_v16  ;;  %v2193_v6 = vsel %vm4793_vm4, %v4291_v30, %v5998_v8  ;;  %v5999_v42 = vld [vmem:[#allocation59_spill] sm:$0xff]  ;;  %v6000_v52 = vld [vmem:[#allocation74_spill] sm:$0xff]  ;;  %v6002_v8 = vld [vmem:[#allocation48_spill] sm:$0xff] }
 0x5c3   : > { %v2266_v48 = vsel %vm1420_vm1, %v2193_v6, %v5999_v42 }
 0x5c4   : > { %v2356_v16 = vsel %vm4810_vm5, %v2266_v48, %v6000_v52 }
 0x5c5   : > { %v5362_v59 = vsel %vm400_vm0, %v2356_v16, %v4877_v41  ;;  %v6001_v16 = vld [vmem:[#allocation47_spill] sm:$0xff] }
 0x5c6   : > { %1965 = vrot.lane.b32.xlu0 %v5912_v34, %s3313_s10  ;;  %v2210_v10 = vsel %vm4793_vm4, %v4366_v35, %v6001_v16 }
 0x5c8   : > { %1967 = vrot.lane.b32.xlu1 %v4330_v49, %s3313_s10  ;;  %2033 = vrot.lane.b32.xlu2 %v5986_v4, %s3312_s30  ;;  %v5328_v44 = vpop.permute.xlu0 %1941 }
 0x5ca   : > { %v5341_v53 = vpop.permute.xlu1 %1943  ;;  %v5343_v11 = vpop.permute.xlu2 %1951 }
 0x5ce   : > { %2035 = vrot.lane.b32.xlu0 %v5947_v23, %s3312_s30 }
 0x5d0   : > { %2061 = vrot.lane.b32.xlu1 %v5912_v34, %s3312_s30  ;;  %2063 = vrot.lane.b32.xlu2 %v4330_v49, %s3312_s30  ;;  %v5368_v30 = vpop.permute.xlu0 %1947 }
 0x5d2   : > { %v1950_v6 = vpop.permute.xlu1 %1949  ;;  %v2046_v42 = vpop.permute.xlu2 %2045 }
 0x5d6   : > { %2097 = vrot.lane.b32.xlu0 %v5986_v4, %s3311_s23  ;;  %v2211_v4 = vsel %vm4793_vm4, %v4368_v24, %v6002_v8 }
 0x5d8   : > { %2099 = vrot.lane.b32.xlu1 %v5947_v23, %s3311_s23  ;;  %2125 = vrot.lane.b32.xlu2 %v5912_v34, %s3311_s23  ;;  %v1984_v41 = vpop.permute.xlu0 %1983  ;;  %v6003_v23 = vld [vmem:[#allocation62_spill] sm:$0xff]  ;;  %v6004_v34 = vld [vmem:[#allocation69_spill] sm:$0xff] }
 0x5d9   : > { %v2334_v25 = vsel %vm1420_vm1, %v2210_v10, %v6003_v23  ;;  %v2338_v46 = vsel %vm1420_vm1, %v2211_v4, %v6004_v34 }
 0x5da   : > { %v2078_v48 = vpop.permute.xlu1 %2077  ;;  %v5380_v52 = vpop.permute.xlu2 %2075  ;;  %v2373_v2 = vsel %vm4810_vm5, %v2334_v25, %v6005_v12  ;;  %v2374_v35 = vsel %vm4810_vm5, %v2338_v46, %v6006_v43 }
 0x5db   : > { %v2497_v19 = vsel %vm400_vm0, %v2373_v2, %v5133_v57  ;;  %v2501_v24 = vsel %vm400_vm0, %v2374_v35, %v5142_v36 }
 0x5dc   : > { %v2536_v12 = vsel %vm4995_vm8, %v2497_v19, %v5253_v38  ;;  %v2537_v62 = vsel %vm4995_vm8, %v2501_v24, %v1984_v41  ;;  %v6009_v19 = vld [vmem:[#allocation92_spill] sm:$0xff] }
 0x5dd   : > { %v2661_v46 = vsel %vm2503_vm6, %v2536_v12, %v2078_v48  ;;  %v2665_v57 = vsel %vm2503_vm6, %v2537_v62, %v2080_v7  ;;  %v2520_v24 = vsel %vm4995_vm8, %v6009_v19, %v1950_v6  ;;  %v6010_v19 = vsel %vm4995_vm8, %v5362_v59, %v5368_v30 }
 0x5de   : > { %2127 = vrot.lane.b32.xlu0 %v4330_v49, %s3311_s23  ;;  %v2597_v12 = vsel %vm2503_vm6, %v2520_v24, %v2046_v42  ;;  %v6011_v59 = vsel %vm4995_vm8, %v5199_v50, %v5203_v22 }
 0x5e0   : > { %1961 = vrot.lane.b32.xlu1 %v4316_v33, %s3313_s10  ;;  %1963 = vrot.lane.b32.xlu2 %v4328_v61, %s3313_s10  ;;  %v2142_v49 = vpop.permute.xlu0 %2141 }
 0x5e1   : > { %v2700_v43 = vsel %vm5407_vm12, %v2661_v46, %v2142_v49 }
 0x5e2   : > { %v2144_v2 = vpop.permute.xlu1 %2143  ;;  %v2138_v36 = vpop.permute.xlu2 %2137  ;;  %v2771_v38 = vunpack.c.l.b16 %v2700_v43 }
 0x5e3   : > { %v2701_v25 = vsel %vm5407_vm12, %v2665_v57, %v2144_v2 }
 0x5e4   : > { %v2772_v8 = vunpack.c.l.b16 %v2701_v25 }
 0x5e6   : > { %2029 = vrot.lane.b32.xlu0 %v4260_v18, %s3312_s30  ;;  %v2788_v41 = vpack.c.b16 %v2772_v8, %v2771_v38 }
 0x5e8   : > { %2031 = vrot.lane.b32.xlu1 %v5983_v56, %s3312_s30  ;;  %2057 = vrot.lane.b32.xlu2 %v4316_v33, %s3312_s30  ;;  %v1978_v48 = vpop.permute.xlu0 %1977  ;;  %v2838_v16 = vsel %vm1132_vm9, %v2788_v41, 0 }
 0x5e9   : > { %2853 = vmatpush.bf16.xpose.msra.mxu2 %v2838_v16 }
 0x5ea   : > { %v1980_v7 = vpop.permute.xlu1 %1979  ;;  %v5433_v4 = vpop.permute.xlu2 %1975 }
 0x5ee   : > { %2059 = vrot.lane.b32.xlu0 %v4328_v61, %s3312_s30 }
 0x5f0   : > { %2093 = vrot.lane.b32.xlu1 %v4260_v18, %s3311_s23  ;;  %2095 = vrot.lane.b32.xlu2 %v5983_v56, %s3311_s23  ;;  %v2048_v23 = vpop.permute.xlu0 %2047  ;;  %v2521_v56 = vsel %vm4995_vm8, %v4913_v3, %v5343_v11  ;;  %v2535_v3 = vsel %vm4995_vm8, %v4967_v17, %v1980_v7 }
 0x5f1   : > { %v2601_v62 = vsel %vm2503_vm6, %v2521_v56, %v2048_v23 }
 0x5f2   : > { %v2074_v34 = vpop.permute.xlu1 %2073  ;;  %v2070_v35 = vpop.permute.xlu2 %2069 }
 0x5f6   : > { %2121 = vrot.lane.b32.xlu0 %v4316_v33, %s3311_s23 }
 0x5f8   : > { %2123 = vrot.lane.b32.xlu1 %v4328_v61, %s3311_s23  ;;  %1957 = vrot.lane.b32.xlu2 %v4314_v9, %s3313_s10  ;;  %v2110_v18 = vpop.permute.xlu0 %2109  ;;  %v2534_v61 = vsel %vm4995_vm8, %v5115_v13, %v1978_v48  ;;  %v2657_v13 = vsel %vm2503_vm6, %v2535_v3, %v5380_v52 }
 0x5f9   : > { %v2684_v6 = vsel %vm5407_vm12, %v2597_v12, %v2110_v18  ;;  %v2653_v49 = vsel %vm2503_vm6, %v2534_v61, %v2074_v34 }
 0x5fa   : > { %v2112_v33 = vpop.permute.xlu1 %2111  ;;  %v2108_v46 = vpop.permute.xlu2 %2107  ;;  %v2755_v43 = vunpack.c.l.b16 %v2684_v6  ;;  %v2698_v57 = vsel %vm5407_vm12, %v2653_v49, %v2138_v36 }
 0x5fb   : > { %v2685_v42 = vsel %vm5407_vm12, %v2601_v62, %v2112_v33  ;;  %v2769_v36 = vunpack.c.l.b16 %v2698_v57 }
 0x5fc   : > { %v2756_v2 = vunpack.c.l.b16 %v2685_v42 }
 0x5fe   : > { %1959 = vrot.lane.b32.xlu0 %v4318_v39, %s3313_s10  ;;  %v2780_v11 = vpack.c.b16 %v2756_v2, %v2755_v43 }
 0x600   : > { %2025 = vrot.lane.b32.xlu1 %v5970_v21, %s3312_s30  ;;  %2027 = vrot.lane.b32.xlu2 %v5973_v15, %s3312_s30  ;;  %v2140_v25 = vpop.permute.xlu0 %2139  ;;  %v2814_v38 = vsel %vm1132_vm9, %v2780_v11, 0 }
 0x601   : > { %v2699_v17 = vsel %vm5407_vm12, %v2657_v13, %v2140_v25  ;;  %2840 = vmatpush.bf16.xpose.msra.mxu1 %v2814_v38  ;;  %v6012_v38 = vsel %vm4995_vm8, %v5322_v32, %v5328_v44  ;;  %v6013_v32 = vsel %vm4995_vm8, %v5339_v51, %v5341_v53 }
 0x602   : > { %v2770_v8 = vunpack.c.l.b16 %v2699_v17  ;;  %v1974_v41 = vpop.permute.xlu1 %1973  ;;  %v5480_v48 = vpop.permute.xlu2 %1969 }
 0x604   : > { %v2787_v16 = vpack.c.b16 %v2770_v8, %v2769_v36 }
 0x606   : > { %2053 = vrot.lane.b32.xlu0 %v4314_v9, %s3312_s30  ;;  %v2835_v7 = vsel %vm1132_vm9, %v2787_v16, 0 }
 0x607   : > { %2854 = vmatpush.bf16.xpose.msra.mxu2 %v2835_v7 }
 0x608   : > { %2055 = vrot.lane.b32.xlu1 %v4318_v39, %s3312_s30  ;;  %2089 = vrot.lane.b32.xlu2 %v5970_v21, %s3311_s23  ;;  %v2042_v52 = vpop.permute.xlu0 %2041 }
 0x609   : > { %v2589_v30 = vsel %vm2503_vm6, %v6011_v59, %v2042_v52 }
 0x60a   : > { %v2044_v23 = vpop.permute.xlu1 %2043  ;;  %v2040_v34 = vpop.permute.xlu2 %2039 }
 0x60b   : > { %v2593_v24 = vsel %vm2503_vm6, %v6010_v19, %v2044_v23  ;;  %v2585_v44 = vsel %vm2503_vm6, %v6013_v32, %v2040_v34 }
 0x60c   : > { %v2683_v12 = vsel %vm5407_vm12, %v2593_v24, %v2108_v46 }
 0x60d   : > { %v2754_v6 = vunpack.c.l.b16 %v2683_v12 }
 0x60e   : > { %2091 = vrot.lane.b32.xlu0 %v5973_v15, %s3311_s23 }
 0x610   : > { %2117 = vrot.lane.b32.xlu1 %v4314_v9, %s3311_s23  ;;  %2119 = vrot.lane.b32.xlu2 %v4318_v39, %s3311_s23  ;;  %v2072_v21 = vpop.permute.xlu0 %2071  ;;  %v2532_v39 = vsel %vm4995_vm8, %v4925_v55, %v1974_v41  ;;  %v2533_v55 = vsel %vm4995_vm8, %v5103_v40, %v5433_v4 }
 0x611   : > { %v2645_v50 = vsel %vm2503_vm6, %v2532_v39, %v2070_v35  ;;  %v2649_v61 = vsel %vm2503_vm6, %v2533_v55, %v2072_v21 }
 0x612   : > { %v2106_v18 = vpop.permute.xlu1 %2105  ;;  %v2102_v56 = vpop.permute.xlu2 %2101 }
 0x613   : > { %v2682_v15 = vsel %vm5407_vm12, %v2589_v30, %v2106_v18 }
 0x614   : > { %v2753_v9 = vunpack.c.l.b16 %v2682_v15 }
 0x616   : > { %1953 = vrot.lane.b32.xlu0 %v4305_v29, %s3313_s10  ;;  %v2779_v62 = vpack.c.b16 %v2754_v6, %v2753_v9  ;;  %v6015_v6 = vsel %vm4995_vm8, %v5140_v27, %v5144_v37 }
 0x618   : > { %1955 = vrot.lane.b32.xlu1 %v4303_v28, %s3313_s10  ;;  %2021 = vrot.lane.b32.xlu2 %v5954_v0, %s3312_s30  ;;  %v2134_v22 = vpop.permute.xlu0 %2133  ;;  %v2811_v33 = vsel %vm1132_vm9, %v2779_v62, 0 }
 0x619   : > { %v2696_v46 = vsel %vm5407_vm12, %v2645_v50, %v2134_v22  ;;  %2841 = vmatpush.bf16.xpose.msra.mxu1 %v2811_v33 }
 0x61a   : > { %v2136_v42 = vpop.permute.xlu1 %2135  ;;  %v2132_v43 = vpop.permute.xlu2 %2131  ;;  %v2767_v35 = vunpack.c.l.b16 %v2696_v46 }
 0x61b   : > { %v2697_v49 = vsel %vm5407_vm12, %v2649_v61, %v2136_v42 }
 0x61c   : > { %v2768_v2 = vunpack.c.l.b16 %v2697_v49 }
 0x61e   : > { %2023 = vrot.lane.b32.xlu0 %v4250_v14, %s3312_s30  ;;  %v2786_v3 = vpack.c.b16 %v2768_v2, %v2767_v35 }
 0x620   : > { %2049 = vrot.lane.b32.xlu1 %v4305_v29, %s3312_s30  ;;  %2051 = vrot.lane.b32.xlu2 %v4303_v28, %s3312_s30  ;;  %v1972_v40 = vpop.permute.xlu0 %1971  ;;  %v2832_v4 = vsel %vm1132_vm9, %v2786_v3, 0 }
 0x621   : > { %2855 = vmatpush.bf16.xpose.msra.mxu2 %v2832_v4  ;;  %v2531_v8 = vsel %vm4995_vm8, %v5066_v63, %v1972_v40 }
 0x622   : > { %v2038_v11 = vpop.permute.xlu1 %2037  ;;  %v2034_v57 = vpop.permute.xlu2 %2033 }
 0x623   : > { %v2581_v17 = vsel %vm2503_vm6, %v6012_v38, %v2038_v11 }
 0x626   : > { %2085 = vrot.lane.b32.xlu0 %v5954_v0, %s3311_s23 }
 0x628   : > { %2087 = vrot.lane.b32.xlu1 %v4250_v14, %s3311_s23  ;;  %2113 = vrot.lane.b32.xlu2 %v4305_v29, %s3311_s23  ;;  %v2066_v13 = vpop.permute.xlu0 %2065  ;;  %v2680_v29 = vsel %vm5407_vm12, %v2581_v17, %v2102_v56 }
 0x629   : > { %v2751_v7 = vunpack.c.l.b16 %v2680_v29 }
 0x62a   : > { %v2068_v25 = vpop.permute.xlu1 %2067  ;;  %v2064_v14 = vpop.permute.xlu2 %2063 }
 0x62b   : > { %v2641_v0 = vsel %vm2503_vm6, %v2531_v8, %v2068_v25  ;;  %v6017_v8 = vld [vmem:[#allocation81_spill] sm:$0xff] }
 0x62c   : > { %v2695_v51 = vsel %vm5407_vm12, %v2641_v0, %v2132_v43  ;;  %v6018_v0 = vld [vmem:[#allocation41_spill] sm:$0xff] }
 0x62d   : > { %v2766_v19 = vunpack.c.l.b16 %v2695_v51 }
 0x62e   : > { %2115 = vrot.lane.b32.xlu0 %v4303_v28, %s3311_s23  ;;  %v2530_v28 = vsel %vm4995_vm8, %v5054_v26, %v5480_v48 }
 0x62f   : > { %v2637_v53 = vsel %vm2503_vm6, %v2530_v28, %v2066_v13 }
 0x630   : > { %2017 = vrot.lane.b32.xlu1 %v4233_v31, %s3312_s30  ;;  %2019 = vrot.lane.b32.xlu2 %v5951_v1, %s3312_s30  ;;  %v2104_v63 = vpop.permute.xlu0 %2103 }
 0x631   : > { %v2681_v41 = vsel %vm5407_vm12, %v2585_v44, %v2104_v63 }
 0x632   : > { %v2752_v36 = vunpack.c.l.b16 %v2681_v41  ;;  %v2130_v16 = vpop.permute.xlu1 %2129  ;;  %v2126_v12 = vpop.permute.xlu2 %2125 }
 0x633   : > { %v2694_v52 = vsel %vm5407_vm12, %v2637_v53, %v2130_v16  ;;  %v6021_v16 = vld [vmem:[#allocation23_spill] sm:$0xff] }
 0x634   : > { %v2765_v23 = vunpack.c.l.b16 %v2694_v52  ;;  %v2778_v34 = vpack.c.b16 %v2752_v36, %v2751_v7 }
 0x636   : > { %2081 = vrot.lane.b32.xlu0 %v4233_v31, %s3311_s23  ;;  %v2808_v26 = vsel %vm1132_vm9, %v2778_v34, 0  ;;  %v2785_v48 = vpack.c.b16 %v2766_v19, %v2765_v23  ;;  %v6014_v31 = vsel %vm4995_vm8, %v5295_v60, %v5297_v20 }
 0x637   : > { %2842 = vmatpush.bf16.xpose.msra.mxu1 %v2808_v26  ;;  %v2573_v15 = vsel %vm2503_vm6, %v6014_v31, %v2034_v57  ;;  %v6016_v57 = vsel %vm4995_vm8, %v5278_v5, %v5284_v54  ;;  %v6020_v54 = vld [vmem:[#allocation94_spill] sm:$0xff] }
 0x638   : > { %2083 = vrot.lane.b32.xlu1 %v5951_v1, %s3311_s23  ;;  %v1966_v24 = vpop.permute.xlu0 %1965  ;;  %v2829_v21 = vsel %vm1132_vm9, %v2785_v48, 0  ;;  %s3246_s23 = scalar_lea.hbm %s5774_s7, 16 }
 0x639   : > { %2856 = vmatpush.bf16.xpose.msra.mxu2 %v2829_v21  ;;  %v2528_v50 = vsel %vm4995_vm8, %v5017_v45, %v1966_v24  ;;  %p3248_p7 = scmp.lt.s32.totalorder %s3246_s23, %s3242_s3 }
 0x63a   : > { %v1968_v59 = vpop.permute.xlu1 %1967  ;;  %v1964_v56 = vpop.permute.xlu2 %1963 }
 0x63b   : > { %v2529_v55 = vsel %vm4995_vm8, %v4883_v58, %v1968_v59  ;;  %v2527_v7 = vsel %vm4995_vm8, %v6021_v16, %v1964_v56  ;;  %p3249_p9 = por %p3248_p7, %p3247_p8 }
 0x63c   : > { %v2633_v61 = vsel %vm2503_vm6, %v2529_v55, %v2064_v14  ;;  %v6019_v14 = vsel %vm4995_vm8, %v6017_v8, %v6018_v0 }
 0x63d   : > { %p3250_p10 = pnand %p3249_p9, %p3245_p12 }
 0x640   : > { %v2036_v30 = vpop.permute.xlu0 %2035 }
 0x641   : > { %v2577_v39 = vsel %vm2503_vm6, %v6015_v6, %v2036_v30 }
 0x642   : > { %v2062_v18 = vpop.permute.xlu1 %2061  ;;  %v2058_v46 = vpop.permute.xlu2 %2057 }
 0x643   : > { %v2629_v20 = vsel %vm2503_vm6, %v2528_v50, %v2062_v18 }
 0x644   : > { %v2692_v37 = vsel %vm5407_vm12, %v2629_v20, %v2126_v12 }
 0x645   : > { %v2763_v2 = vunpack.c.l.b16 %v2692_v37  ;;  %v6029_v37 = vld [vmem:[#allocation96_spill] sm:$0xff] }
 0x648   : > { %v2098_v9 = vpop.permute.xlu0 %2097 }
 0x649   : > { %v2678_v1 = vsel %vm5407_vm12, %v2573_v15, %v2098_v9  ;;  %v6022_v15 = vld [vmem:[#allocation25_spill] sm:$0xff]  ;;  %v6023_v9 = vld [vmem:[#allocation43_spill] sm:$0xff] }
 0x64a   : > { %v2100_v62 = vpop.permute.xlu1 %2099  ;;  %v2749_v22 = vunpack.c.l.b16 %v2678_v1  ;;  %v2096_v40 = vpop.permute.xlu2 %2095  ;;  %v6024_v1 = vsel %vm4995_vm8, %v6022_v15, %v6023_v9 }
 0x64b   : > { %v2679_v60 = vsel %vm5407_vm12, %v2577_v39, %v2100_v62  ;;  %v6025_v39 = vld [vmem:[#allocation97_spill] sm:$0xff] }
 0x64c   : > { %v2750_v33 = vunpack.c.l.b16 %v2679_v60 }
 0x64e   : > { %v2777_v27 = vpack.c.b16 %v2750_v33, %v2749_v22  ;;  %v6026_v22 = vld [vmem:[#allocation65_spill] sm:$0xff] }
 0x64f   : > { %v6027_v33 = vld [vmem:[#allocation73_spill] sm:$0xff] }
 0x650   : > { %v2128_v42 = vpop.permute.xlu0 %2127  ;;  %v2805_v45 = vsel %vm1132_vm9, %v2777_v27, 0  ;;  %v6028_v55 = vsel %vm4995_vm8, %v6026_v22, %v6027_v33 }
 0x651   : > { %v2693_v49 = vsel %vm5407_vm12, %v2633_v61, %v2128_v42  ;;  %2843 = vmatpush.bf16.xpose.msra.mxu1 %v2805_v45 }
 0x652   : > { %v2764_v43 = vunpack.c.l.b16 %v2693_v49  ;;  %v1962_v35 = vpop.permute.xlu1 %1961  ;;  %v1958_v38 = vpop.permute.xlu2 %1957 }
 0x653   : > { %v2526_v28 = vsel %vm4995_vm8, %v6020_v54, %v1962_v35  ;;  %v2524_v61 = vsel %vm4995_vm8, %v6029_v37, %v1958_v38  ;;  %v2703_v54 = vld [vmem:[%s5773_s6] sm:$0xf] }
 0x654   : > { %v2784_v3 = vpack.c.b16 %v2764_v43, %v2763_v2  ;;  %v2621_v51 = vsel %vm2503_vm6, %v2526_v28, %v2058_v46  ;;  %2706 = vperm.xlu2 %3164, %v2703_v54  }
 0x656   : > { %v2826_v58 = vsel %vm1132_vm9, %v2784_v3, 0 }
 0x657   : > { %2857 = vmatpush.bf16.xpose.msra.mxu2 %v2826_v58 }
 0x658   : > { %v2030_v4 = vpop.permute.xlu0 %2029 }
 0x659   : > { %v2565_v29 = vsel %vm2503_vm6, %v6019_v14, %v2030_v4 }
 0x65a   : > { %v2032_v11 = vpop.permute.xlu1 %2031  ;;  %v2028_v19 = vpop.permute.xlu2 %2027 }
 0x65b   : > { %v2569_v13 = vsel %vm2503_vm6, %v6016_v57, %v2032_v11  ;;  %v2561_v46 = vsel %vm2503_vm6, %v6028_v55, %v2028_v19 }
 0x65c   : > { %v2677_v17 = vsel %vm5407_vm12, %v2569_v13, %v2096_v40 }
 0x65d   : > { %v2748_v5 = vunpack.c.l.b16 %v2677_v17 }
 0x660   : > { %v2060_v25 = vpop.permute.xlu0 %2059 }
 0x661   : > { %v2625_v23 = vsel %vm2503_vm6, %v2527_v7, %v2060_v25  ;;  %v6036_v7 = vld [vmem:[#allocation95_spill] sm:$0xff] }
 0x662   : > { %v2094_v32 = vpop.permute.xlu1 %2093  ;;  %v2090_v18 = vpop.permute.xlu2 %2089 }
 0x663   : > { %v2676_v44 = vsel %vm5407_vm12, %v2565_v29, %v2094_v32  ;;  %v6030_v29 = vld [vmem:[#allocation60_spill] sm:$0xff]  ;;  %v6031_v32 = vld [vmem:[#allocation42_spill] sm:$0xff] }
 0x664   : > { %v2747_v63 = vunpack.c.l.b16 %v2676_v44  ;;  %v6032_v44 = vsel %vm4995_vm8, %v6030_v29, %v6031_v32 }
 0x666   : > { %v2776_v41 = vpack.c.b16 %v2748_v5, %v2747_v63 }
 0x668   : > { %v2122_v53 = vpop.permute.xlu0 %2121  ;;  %v2802_v36 = vsel %vm1132_vm9, %v2776_v41, 0  ;;  %v6033_v41 = vld [vmem:[#allocation63_spill] sm:$0xff] }
 0x669   : > { %v2690_v52 = vsel %vm5407_vm12, %v2621_v51, %v2122_v53  ;;  %2844 = vmatpush.bf16.xpose.msra.mxu1 %v2802_v36  ;;  %v6034_v51 = vld [vmem:[#allocation70_spill] sm:$0xff] }
 0x66a   : > { %v2124_v34 = vpop.permute.xlu1 %2123  ;;  %v2761_v48 = vunpack.c.l.b16 %v2690_v52  ;;  %v2120_v60 = vpop.permute.xlu2 %2119  ;;  %v6035_v53 = vsel %vm4995_vm8, %v6033_v41, %v6034_v51 }
 0x66b   : > { %v2691_v26 = vsel %vm5407_vm12, %v2625_v23, %v2124_v34 }
 0x66c   : > { %v2762_v24 = vunpack.c.l.b16 %v2691_v26 }
 0x66e   : > { %v2783_v21 = vpack.c.b16 %v2762_v24, %v2761_v48  ;;  %v6037_v24 = vld [vmem:[#allocation93_spill] sm:$0xff] }
 0x670   : > { %v1960_v12 = vpop.permute.xlu0 %1959  ;;  %v2823_v59 = vsel %vm1132_vm9, %v2783_v21, 0 }
 0x671   : > { %2858 = vmatpush.bf16.xpose.msra.mxu2 %v2823_v59  ;;  %v2525_v62 = vsel %vm4995_vm8, %v6025_v39, %v1960_v12 }
 0x672   : > { %v2026_v30 = vpop.permute.xlu1 %2025  ;;  %v2022_v38 = vpop.permute.xlu2 %2021 }
 0x673   : > { %v2557_v6 = vsel %vm2503_vm6, %v6024_v1, %v2026_v30  ;;  %v2549_v63 = vsel %vm2503_vm6, %v6032_v44, %v2022_v38 }
 0x674   : > { %v2674_v20 = vsel %vm5407_vm12, %v2557_v6, %v2090_v18 }
 0x675   : > { %v2745_v2 = vunpack.c.l.b16 %v2674_v20 }
 0x678   : > { %v2054_v56 = vpop.permute.xlu0 %2053 }
 0x679   : > { %v2613_v49 = vsel %vm2503_vm6, %v2524_v61, %v2054_v56 }
 0x67a   : > { %v2056_v31 = vpop.permute.xlu1 %2055  ;;  %v2052_v14 = vpop.permute.xlu2 %2051 }
 0x67b   : > { %v2617_v50 = vsel %vm2503_vm6, %v2525_v62, %v2056_v31 }
 0x67c   : > { %v2689_v45 = vsel %vm5407_vm12, %v2617_v50, %v2120_v60  ;;  %v6038_v50 = vld [vmem:[#allocation40_spill] sm:$0xff]  ;;  %v6039_v60 = vld [vmem:[#allocation26_spill] sm:$0xff] }
 0x67d   : > { %v2760_v4 = vunpack.c.l.b16 %v2689_v45  ;;  %v6040_v20 = vsel %vm4995_vm8, %v6038_v50, %v6039_v60 }
 0x680   : > { %v2092_v27 = vpop.permute.xlu0 %2091 }
 0x681   : > { %v2675_v42 = vsel %vm5407_vm12, %v2561_v46, %v2092_v27  ;;  %v6041_v46 = vld [vmem:[#allocation24_spill] sm:$0xff]  ;;  %v6042_v27 = vld [vmem:[#allocation33_spill] sm:$0xff] }
 0x682   : > { %v2746_v43 = vunpack.c.l.b16 %v2675_v42  ;;  %v2118_v35 = vpop.permute.xlu1 %2117  ;;  %v2114_v48 = vpop.permute.xlu2 %2113  ;;  %v6043_v37 = vsel %vm4995_vm8, %v6041_v46, %v6042_v27 }
 0x683   : > { %v2688_v3 = vsel %vm5407_vm12, %v2613_v49, %v2118_v35  ;;  %v2702_v49 = vld [vmem:[%s5772_s5] sm:$0x3] }
 0x684   : > { %v2759_v58 = vunpack.c.l.b16 %v2688_v3  ;;  %v2775_v40 = vpack.c.b16 %v2746_v43, %v2745_v2  ;;  %v6044_v3 = vld [vmem:[#allocation13_spill] sm:$0xff] }
 0x686   : > { %v2799_v11 = vsel %vm1132_vm9, %v2775_v40, 0  ;;  %v2782_v57 = vpack.c.b16 %v2760_v4, %v2759_v58  ;;  %v2866_v58 = vunpack.c.l.bf16 %v6044_v3 }
 0x687   : > { %2845 = vmatpush.bf16.xpose.msra.mxu1 %v2799_v11 }
 0x688   : > { %v1954_v13 = vpop.permute.xlu0 %1953  ;;  %v2820_v25 = vsel %vm1132_vm9, %v2782_v57, 0  ;;  %2868 = vst [vmem:[#allocation1] ss:$2 sm:$0xff] %v2866_v58 }
 0x689   : > { %2859 = vmatpush.bf16.xpose.msra.mxu2 %v2820_v25  ;;  %v2522_v52 = vsel %vm4995_vm8, %v6036_v7, %v1954_v13 }
 0x68a   : > { %v1956_v17 = vpop.permute.xlu1 %1955  ;;  %v2020_v62 = vpop.permute.xlu2 %2019 }
 0x68b   : > { %v2523_v21 = vsel %vm4995_vm8, %v6037_v24, %v1956_v17  ;;  %v2545_v61 = vsel %vm2503_vm6, %v6043_v37, %v2020_v62 }
 0x68c   : > { %v2609_v30 = vsel %vm2503_vm6, %v2523_v21, %v2052_v14 }
 0x68f   : > { %v2870_v4 = vld.sshfl [vmem:[#allocation1 + $0x8] sm:$0xff pattern:$0x75316420]  ;;  %v2869_v25 = vld.sshfl [vmem:[#allocation1] sm:$0xff pattern:$0x75316420] }
 0x690   : > { %v2024_v8 = vpop.permute.xlu0 %2023 }
 0x691   : > { %v2553_v36 = vsel %vm2503_vm6, %v6035_v53, %v2024_v8 }
 0x692   : > { %v2050_v0 = vpop.permute.xlu1 %2049 }
 0x693   : > { %v2605_v34 = vsel %vm2503_vm6, %v2522_v52, %v2050_v0 }
 0x694   : > { %v2686_v59 = vsel %vm5407_vm12, %v2605_v34, %v2114_v48 }
 0x695   : > { %v2757_v1 = vunpack.c.l.b16 %v2686_v59 }
 0x698   : > { %v2086_v5 = vpop.permute.xlu0 %2085 }
 0x699   : > { %v2672_v28 = vsel %vm5407_vm12, %v2549_v63, %v2086_v5 }
 0x69a   : > { %v2088_v16 = vpop.permute.xlu1 %2087  ;;  %v2743_v19 = vunpack.c.l.b16 %v2672_v28 }
 0x69b   : > { %v2673_v23 = vsel %vm5407_vm12, %v2553_v36, %v2088_v16 }
 0x69c   : > { %v2744_v26 = vunpack.c.l.b16 %v2673_v23 }
 0x69e   : > { %v2774_v12 = vpack.c.b16 %v2744_v26, %v2743_v19 }
 0x6a0   : > { %v2116_v18 = vpop.permute.xlu0 %2115  ;;  %v2796_v56 = vsel %vm1132_vm9, %v2774_v12, 0 }
 0x6a1   : > { %v2687_v31 = vsel %vm5407_vm12, %v2609_v30, %v2116_v18  ;;  %2846 = vmatpush.bf16.xpose.msra.mxu1 %v2796_v56 }
 0x6a2   : > { %v2758_v15 = vunpack.c.l.b16 %v2687_v31  ;;  %v2018_v9 = vpop.permute.xlu1 %2017 }
 0x6a3   : > { %v2541_v22 = vsel %vm2503_vm6, %v6040_v20, %v2018_v9 }
 0x6a4   : > { %v2781_v6 = vpack.c.b16 %v2758_v15, %v2757_v1 }
 0x6a6   : > { %v2817_v39 = vsel %vm1132_vm9, %v2781_v6, 0 }
 0x6a7   : > { %2860 = vmatpush.bf16.xpose.msra.mxu2 %v2817_v39 }
 0x6a8   : > { %v2082_v33 = vpop.permute.xlu0 %2081 }
 0x6a9   : > { %v2670_v55 = vsel %vm5407_vm12, %v2541_v22, %v2082_v33 }
 0x6aa   : > { %v2084_v42 = vpop.permute.xlu1 %2083  ;;  %v2741_v43 = vunpack.c.l.b16 %v2670_v55 }
 0x6ab   : > { %v2671_v45 = vsel %vm5407_vm12, %v2545_v61, %v2084_v42 }
 0x6ac   : > { %v2742_v35 = vunpack.c.l.b16 %v2671_v45 }
 0x6ae   : > { %3048 = vmatmul.msk.bf16.vlgmr.msra.gmra.mxu2 %vm1132_vm9, %v2702_v49  ;;  %v2773_v2 = vpack.c.b16 %v2742_v35, %v2741_v43  ;;  %v2707_v10 = vpop.permute.xlu2 %2706 }
 0x6b0   : > { %v2793_v47 = vsel %vm1132_vm9, %v2773_v2, 0 }
 0x6b1   : > { %2847 = vmatpush.bf16.xpose.msra.mxu1 %v2793_v47 }
 0x6b8   : > { %3047 = vmatmul.msk.bf16.vlgmr.msra.gmra.mxu1 %vm1132_vm9, %v2702_v49 }
 0x731   : > { %v2862_v40 = vpop.f32.mrf.mxu2 }
 0x732   : > { %v2863_v11 = vadd.f32 %v2862_v40, %v2707_v10 }
 0x734   : > { %v2874_v57 = vadd.f32 %v2870_v4, %v2863_v11 }
 0x735   : > { %v2849_v13 = vpop.f32.mrf.mxu1 }
 0x736   : > { %v2877_v38 = vrot.slane %v2874_v57, 4  ;;  %v2850_v17 = vadd.f32 %v2849_v13, %v2707_v10 }
 0x738   : > { %v2873_v8 = vadd.f32 %v2869_v25, %v2850_v17 }
 0x739   : > { %v2864_v0 = vpop.f32.mrf.mxu2 }
 0x73a   : > { %v2879_v14 = vsel %vm2667_vm10, %v2873_v8, %v2877_v38 }
 0x73b   : > { %2881 = vst [vmem:[%s4169_s11] sm:$0xff] %v2879_v14 }
 0x73c   : > { %3253 = shalt.err (!%p3250_p10)
}
 0x73d   : > { %3063 = dma.vmem_to_hbm [thread:$0]  (%p3420_p13), %s2897_s16, 128, %s2899_s9, %s2883_s8   ;;  %v2851_v29 = vpop.f32.mrf.mxu1 }
 0x73e PF: > { %s2910_s21 = sand.u32 1, %s3288_s24   ;;  %p6045_p11 = scmp.ge.s32.totalorder %s3300_s27, 2 }
 0x73f   : > { %s2911_s11 = scalar_lea.sflag [#allocation6], %s2910_s21 }
 0x740   : > { %p3074_p0 = pnand %p6045_p11, %p3425_p4 }
 0x742   : > { %p3075_p2 = pneg %p3074_p0 }
 0x744   : > { %3283 = dma.done.wait (%p3075_p2), %s2911_s11, 128  }
 0x745   : > { %3285 = vsyncadd (%p3075_p2), %s2911_s11, 4294967168  ;;  %p21_p6 = scmp.ge.s32.totalorder %s3400_s15, 4   ;;  %s6046_s24 = smov %s3292_s25 }
 0x746   : > { %s6047_s25 = smov %s3296_s26  ;;  %s6048_s26 = smov %s3412_s18 }
 0x747   : > { %s6049_s27 = smov %s3400_s15  ;;  %23 = sbr.rel (!%p21_p6) target bundleno = 8 (0x8), region = 121 }
 0x74c   :  { %2917 = vsyncpa [#allocation5], 1 }
 0x74d   :  { %2919 = vsyncpa [#allocation5 + $0x1], 1 }
 0x74e   :  { %2920 = vsyncpa [#allocation8], 1 }
 0x74f   :  { %2921 = vsyncpa [#allocation6], 1 }
 0x750   :  { %2923 = vsyncpa [#allocation6 + $0x1], 1 }

</bundles_post_ra>
